<compile_context>
chip_gen: v5e
topology: v5e:2x2
jax: 0.10.0
libtpu: 0.0.40
codegen_flags: <defaults>
</compile_context>

<pallas_src>
import numpy as np
import jax
import jax.numpy as jnp
from jax.experimental import pallas as pl
from jax.experimental.pallas import tpu as pltpu


def _round_up(x, m):
    return ((x + m - 1) // m) * m


def _device_kind():
    try:
        return jax.devices()[0].device_kind.lower()
    except Exception:
        return ""


def _has_megacore():
    # Chips whose "parallel" grid axes shard across more than one TensorCore.
    kind = _device_kind()
    return ("v7" in kind) or ("v4" in kind) or ("v5p" in kind)


def _pick_vmem_limit():
    kind = _device_kind()
    if "v7" in kind:
        return 48 * 1024 * 1024      # 64 MiB physical per TensorCore on v7x
    if any(s in kind for s in ("v4", "v5", "v6")):
        return 96 * 1024 * 1024      # 128 MiB physical VMEM
    return 32 * 1024 * 1024          # conservative default


def _pad_gate_cols(w, H, Hp):
    """[..., 3H] -> [..., 3Hp] with gate g placed at columns [g*Hp, g*Hp+H)."""
    lead = w.shape[:-1]
    out = jnp.zeros(lead + (3 * Hp,), w.dtype)
    for g in range(3):
        out = out.at[..., g * Hp:g * Hp + H].set(w[..., g * H:(g + 1) * H])
    return out


def _gru_cell(gi, gh, bhn, h, t_abs, lens):
    """One GRU step in f32.

    gi already contains b_ih and the recurrent r/z biases; bhn is b_hn.
    """
    Hp = gh.shape[-1] // 3
    r = jax.nn.sigmoid(gi[:, :Hp] + gh[:, :Hp])
    z = jax.nn.sigmoid(gi[:, Hp:2 * Hp] + gh[:, Hp:2 * Hp])
    n = jnp.tanh(gi[:, 2 * Hp:] + r * (gh[:, 2 * Hp:] + bhn))
    h_new = (1.0 - z) * n + z * h
    upd = t_abs < lens                        # [B_pad, 1]: inside the sequence
    h_next = jnp.where(upd, h_new, h)         # freeze past sequence end
    out = jnp.where(upd, h_next, 0.0)         # pad_packed: zero padded outputs
    return h_next, out


# ----------------------------------------------------------------------------
# Kernel A (single-TC chips): both directions fused in one body per time chunk,
# interleaved per step.  grid = (NC,)  [sequential]
# ----------------------------------------------------------------------------
def _bigru_fused_kernel(lens_ref, gi_f_ref, gi_b_ref, whh_ref, bhn_ref,
                        out_f_ref, out_b_ref, hN_ref, hf_scr, hb_scr):
    c = pl.program_id(0)
    nc = pl.num_programs(0)
    TC = gi_f_ref.shape[0]

    @pl.when(c == 0)
    def _():
        hf_scr[...] = jnp.zeros_like(hf_scr)
        hb_scr[...] = jnp.zeros_like(hb_scr)

    # TODO(synk): W_hh could be kept MXU-resident across the chunk via
    # pltpu.matmul_push_rhs/acc_lhs/pop; here we rely on Mosaic hoisting the
    # loop-invariant weight loads/pushes out of the unrolled loop.
    whh_f = whh_ref[0]                   # [Hp, 3Hp] bf16
    whh_b = whh_ref[1]
    bhn_f = bhn_ref[0]                   # [1, Hp] f32
    bhn_b = bhn_ref[1]
    lens = lens_ref[...]                 # [B_pad, 1] int32

    t0_f = c * TC                        # absolute time of fwd local step 0
    t0_b = (nc - 1 - c) * TC             # absolute time of bwd chunk's step 0

    def step(i, carry):
        h_f, h_b = carry
        j = TC - 1 - i                   # backward walks the chunk in reverse
        gi_f = gi_f_ref[i].astype(jnp.float32)
        gi_b = gi_b_ref[j].astype(jnp.float32)
        gh_f = jnp.dot(h_f.astype(whh_f.dtype), whh_f,
                       preferred_element_type=jnp.float32)
        gh_b = jnp.dot(h_b.astype(whh_b.dtype), whh_b,
                       preferred_element_type=jnp.float32)
        h_f, o_f = _gru_cell(gi_f, gh_f, bhn_f, h_f, t0_f + i, lens)
        h_b, o_b = _gru_cell(gi_b, gh_b, bhn_b, h_b, t0_b + j, lens)
        out_f_ref[i] = o_f.astype(out_f_ref.dtype)
        out_b_ref[j] = o_b.astype(out_b_ref.dtype)
        return (h_f, h_b)

    unroll = True if TC <= 16 else 8
    h_f, h_b = jax.lax.fori_loop(0, TC, step, (hf_scr[...], hb_scr[...]),
                                 unroll=unroll)
    hf_scr[...] = h_f
    hb_scr[...] = h_b

    @pl.when(c == nc - 1)
    def _():
        hN_ref[0] = h_f.astype(hN_ref.dtype)
        hN_ref[1] = h_b.astype(hN_ref.dtype)


# ----------------------------------------------------------------------------
# Kernel B (megacore chips): one direction per grid slice so the two scans run
# on separate TensorCores.  grid = (2 [parallel], NC [sequential])
# ----------------------------------------------------------------------------
def _bigru_split_kernel(lens_ref, gi_ref, whh_ref, bhn_ref,
                        out_ref, hN_ref, h_scr):
    d = pl.program_id(0)                 # 0 = forward, 1 = backward
    c = pl.program_id(1)                 # sequential time-chunk index
    nc = pl.num_programs(1)
    TC = gi_ref.shape[0]

    @pl.when(c == 0)
    def _():
        h_scr[...] = jnp.zeros_like(h_scr)

    whh = whh_ref[0]                     # [Hp, 3Hp] bf16 for this direction
    bhn = bhn_ref[0]                     # [1, Hp] f32
    lens = lens_ref[...]                 # [B_pad, 1] int32

    cr = c + d * (nc - 1 - 2 * c)        # time chunk processed this grid step
    t0 = cr * TC

    def step(i, h):
        tl = i + d * (TC - 1 - 2 * i)    # reversed walk for the backward dir
        gi = gi_ref[tl].astype(jnp.float32)
        gh = jnp.dot(h.astype(whh.dtype), whh,
                     preferred_element_type=jnp.float32)
        h_next, o = _gru_cell(gi, gh, bhn, h, t0 + tl, lens)
        out_ref[0, tl] = o.astype(out_ref.dtype)
        return h_next

    unroll = True if TC <= 16 else 8
    h_final = jax.lax.fori_loop(0, TC, step, h_scr[...], unroll=unroll)
    h_scr[...] = h_final

    @pl.when(c == nc - 1)
    def _():
        hN_ref[0] = h_final.astype(hN_ref.dtype)


def _bigru_layer(gi_all, lens_col, whh2, bhn2, *, TC, fuse_dirs, vmem_limit):
    """Run both directions of one GRU layer.

    gi_all:   [T_pad, B_pad, 6Hp] bf16   precomputed input projections; columns
              [0:3Hp] = fwd gates (r|z|n), [3Hp:6Hp] = bwd gates; b_ih and the
              recurrent r/z biases already folded in.
    lens_col: [B_pad, 1] int32           sequence lengths
    whh2:     [2, Hp, 3Hp] bf16          recurrent weights (gate-padded)
    bhn2:     [2, 1, Hp] f32             n-gate recurrent bias
    Returns (out_f, out_b) each [T_pad, B_pad, Hp] bf16 and hN [2, B_pad, Hp] f32.
    """
    T_pad, B_pad, sixHp = gi_all.shape
    Hp = sixHp // 6
    NC = T_pad // TC

    out_seq = jax.ShapeDtypeStruct((T_pad, B_pad, Hp), jnp.bfloat16)
    out_hN = jax.ShapeDtypeStruct((2, B_pad, Hp), jnp.float32)

    if fuse_dirs:
        grid_spec = pltpu.PrefetchScalarGridSpec(
            num_scalar_prefetch=0,
            grid=(NC,),
            in_specs=[
                pl.BlockSpec((B_pad, 1), lambda c: (0, 0)),              # lens
                pl.BlockSpec((TC, B_pad, 3 * Hp), lambda c: (c, 0, 0)),  # gi fwd
                pl.BlockSpec((TC, B_pad, 3 * Hp),
                             lambda c: (NC - 1 - c, 0, 1)),              # gi bwd
                pl.BlockSpec((2, Hp, 3 * Hp), lambda c: (0, 0, 0)),      # W_hh
                pl.BlockSpec((2, 1, Hp), lambda c: (0, 0, 0)),           # b_hn
            ],
            out_specs=[
                pl.BlockSpec((TC, B_pad, Hp), lambda c: (c, 0, 0)),          # out fwd
                pl.BlockSpec((TC, B_pad, Hp), lambda c: (NC - 1 - c, 0, 0)),  # out bwd
                pl.BlockSpec((2, B_pad, Hp), lambda c: (0, 0, 0)),           # final h
            ],
            scratch_shapes=[pltpu.VMEM((B_pad, Hp), jnp.float32),
                            pltpu.VMEM((B_pad, Hp), jnp.float32)],
        )
        out_f, out_b, hN = pl.pallas_call(
            _bigru_fused_kernel,
            grid_spec=grid_spec,
            out_shape=(out_seq, out_seq, out_hN),
            compiler_params=pltpu.CompilerParams(
                dimension_semantics=("arbitrary",),
                vmem_limit_bytes=vmem_limit),
        )(lens_col, gi_all, gi_all, whh2, bhn2)
        return out_f, out_b, hN

    grid_spec = pltpu.PrefetchScalarGridSpec(
        num_scalar_prefetch=0,
        grid=(2, NC),
        in_specs=[
            pl.BlockSpec((B_pad, 1), lambda d, c: (0, 0)),               # lens
            pl.BlockSpec((TC, B_pad, 3 * Hp),
                         lambda d, c: (c + d * (NC - 1 - 2 * c), 0, d)),  # gi
            pl.BlockSpec((1, Hp, 3 * Hp), lambda d, c: (d, 0, 0)),       # W_hh
            pl.BlockSpec((1, 1, Hp), lambda d, c: (d, 0, 0)),            # b_hn
        ],
        out_specs=[
            pl.BlockSpec((1, TC, B_pad, Hp),
                         lambda d, c: (d, c + d * (NC - 1 - 2 * c), 0, 0)),
            pl.BlockSpec((1, B_pad, Hp), lambda d, c: (d, 0, 0)),
        ],
        scratch_shapes=[pltpu.VMEM((B_pad, Hp), jnp.float32)],
    )
    out2, hN = pl.pallas_call(
        _bigru_split_kernel,
        grid_spec=grid_spec,
        out_shape=(jax.ShapeDtypeStruct((2, T_pad, B_pad, Hp), jnp.bfloat16),
                   out_hN),
        compiler_params=pltpu.CompilerParams(
            dimension_semantics=("parallel", "arbitrary"),
            vmem_limit_bytes=vmem_limit),
    )(lens_col, gi_all, whh2, bhn2)
    return out2[0], out2[1], hN


# ----------------------------------------------------------------------------
# DynamicEncoder: parameters + forward glue (embedding, hoisted projections,
# layer stacking).
# ----------------------------------------------------------------------------
class DynamicEncoderPallas:
    def __init__(self, input_size, embed_size, hidden_size, n_layers, dropout,
                 bidir=True, extra_size=0, key=None, time_chunk=32,
                 fuse_dirs=None):
        assert bidir, "reference module is used with bidir=True"
        self.input_size = input_size
        self.embed_size = embed_size
        self.hidden_size = hidden_size
        self.n_layers = n_layers
        # TODO(synk): inter-layer dropout is a training-time op; inference only.
        self.dropout = dropout
        self.bidir = bidir
        self.extra_size = extra_size
        self.time_chunk = time_chunk
        self.fuse_dirs = fuse_dirs       # None -> auto (megacore => split grid)
        self.vmem_limit = _pick_vmem_limit()

        H = hidden_size
        self.Hp = Hp = _round_up(H, 128)  # lane-aligned padded hidden size

        if key is None:
            key = jax.random.PRNGKey(0)
        k_emb, key = jax.random.split(key)
        self.embedding = jax.random.normal(
            k_emb, (input_size, embed_size), jnp.float32)

        bound = 1.0 / np.sqrt(H)
        orth = jax.nn.initializers.orthogonal()

        self.layers = []
        self.layers_raw = []
        for layer in range(n_layers):
            in_dim = (embed_size + extra_size) if layer == 0 else 2 * H
            raw = []
            for _direction in range(2):
                key, k1, k2, k3, k4 = jax.random.split(key, 5)
                wih = jax.random.uniform(k1, (3 * H, in_dim), jnp.float32,
                                         -bound, bound)
                # orth_gru: orthogonal init per H-sized chunk of weight_hh.
                chunks = [orth(k, (H, H)) for k in jax.random.split(k2, 3)]
                whh = jnp.concatenate(chunks, axis=0)                  # [3H, H]
                bih = jax.random.uniform(k3, (3 * H,), jnp.float32, -bound, bound)
                bhh = jax.random.uniform(k4, (3 * H,), jnp.float32, -bound, bound)
                raw.append(dict(wih=wih, whh=whh, bih=bih, bhh=bhh))
            self.layers_raw.append(raw)

            # ---- pack/pad parameters for the kernels ------------------------
            wih_t = [_pad_gate_cols(rd["wih"].T, H, Hp) for rd in raw]  # [in,3Hp]
            if layer == 0:
                w_parts = (jnp.concatenate(wih_t, axis=-1)              # [in,6Hp]
                           .astype(jnp.bfloat16),)
            else:
                # Rows 0:H multiply the previous layer's fwd output, rows H:2H
                # the bwd output; row-pad H -> Hp (padded activations are 0).
                wf = jnp.concatenate(
                    [jnp.pad(w[:H], ((0, Hp - H), (0, 0))) for w in wih_t], -1)
                wb = jnp.concatenate(
                    [jnp.pad(w[H:2 * H], ((0, Hp - H), (0, 0))) for w in wih_t], -1)
                w_parts = (wf.astype(jnp.bfloat16), wb.astype(jnp.bfloat16))

            gi_bias, whh_l, bhn_l = [], [], []
            for rd in raw:
                bih, bhh, whh = rd["bih"], rd["bhh"], rd["whh"]
                # Fold b_ih plus the recurrent r/z biases into gi; keep b_hn.
                b = jnp.concatenate([bih[:2 * H] + bhh[:2 * H], bih[2 * H:]])
                gi_bias.append(_pad_gate_cols(b.reshape(1, 3 * H), H, Hp))
                bhn_l.append(jnp.zeros((1, Hp), jnp.float32)
                             .at[0, :H].set(bhh[2 * H:]))
                whh_l.append(jnp.pad(_pad_gate_cols(whh.T, H, Hp),
                                     ((0, Hp - H), (0, 0))).astype(jnp.bfloat16))

            self.layers.append(dict(
                w_parts=w_parts,
                gi_bias=jnp.concatenate(gi_bias, axis=-1),   # [1, 6Hp] f32
                whh2=jnp.stack(whh_l, axis=0),               # [2, Hp, 3Hp] bf16
                bhn2=jnp.stack(bhn_l, axis=0),               # [2, 1, Hp] f32
            ))

    def __call__(self, input_seqs, input_lens, hidden=None, seperate=False,
                 return_emb=False, extra_input=None):
        """input_seqs: [T, B] int32; input_lens: numpy array of lengths."""
        T, B = input_seqs.shape
        H, Hp = self.hidden_size, self.Hp
        B_pad = max(8, _round_up(B, 8))
        TC = min(self.time_chunk, max(8, _round_up(T, 8)))
        T_pad = _round_up(T, TC)
        fuse = self.fuse_dirs if self.fuse_dirs is not None else (not _has_megacore())
        # TODO(synk): a non-zero initial `hidden` is not plumbed through (the
        # module is always called with hidden=None in practice); zeros are used.

        embedded_origin = jnp.take(self.embedding, input_seqs, axis=0)   # [T,B,E]
        x = embedded_origin
        if extra_input is not None:
            x = jnp.concatenate([x, extra_input], axis=-1)
        x = jnp.pad(x, ((0, T_pad - T), (0, B_pad - B), (0, 0)))
        x_bf = x.astype(jnp.bfloat16)

        lens = jnp.asarray(input_lens, dtype=jnp.int32)
        lens_col = jnp.pad(lens, (0, B_pad - B)).reshape(B_pad, 1)

        hiddens = []
        out_f = out_b = None
        for li, p in enumerate(self.layers):
            if li == 0:
                gi = jnp.einsum("tbd,dk->tbk", x_bf, p["w_parts"][0],
                                preferred_element_type=jnp.float32)
            else:
                gi = (jnp.einsum("tbh,hk->tbk", out_f, p["w_parts"][0],
                                 preferred_element_type=jnp.float32)
                      + jnp.einsum("tbh,hk->tbk", out_b, p["w_parts"][1],
                                   preferred_element_type=jnp.float32))
            gi_all = (gi + p["gi_bias"]).astype(jnp.bfloat16)   # [T_pad,B_pad,6Hp]

            out_f, out_b, hN = _bigru_layer(
                gi_all, lens_col, p["whh2"], p["bhn2"],
                TC=TC, fuse_dirs=fuse, vmem_limit=self.vmem_limit)
            hiddens.append(hN[:, :B, :H])            # (fwd, bwd) for this layer

        of = out_f[:T, :B, :H].astype(jnp.float32)
        ob = out_b[:T, :B, :H].astype(jnp.float32)
        if self.bidir and (not seperate):
            outputs = of + ob                        # [T, B, H]
        else:
            outputs = jnp.concatenate([of, ob], axis=-1)
        hidden_out = jnp.concatenate(hiddens, axis=0)  # [n_layers*2, B, H]

        if not return_emb:
            return outputs, hidden_out
        return outputs, hidden_out, embedded_origin


# ----------------------------------------------------------------------------
# Pure-JAX float32 reference (independent formulation, no padding / folding)
# used only to validate the kernels in __main__.
# ----------------------------------------------------------------------------
def _reference_forward(enc, input_seqs, input_lens, extra_input=None,
                       seperate=False):
    H = enc.hidden_size
    x = jnp.take(enc.embedding, input_seqs, axis=0)            # [T, B, E] f32
    if extra_input is not None:
        x = jnp.concatenate([x, extra_input], axis=-1)
    T, B = input_seqs.shape
    lens = jnp.asarray(input_lens, dtype=jnp.int32)

    def run_dir(xs_in, p, reverse):
        wih, whh, bih, bhh = p["wih"], p["whh"], p["bih"], p["bhh"]

        def cell(h, inputs):
            xt, t = inputs
            gi = xt @ wih.T + bih
            gh = h @ whh.T + bhh
            r = jax.nn.sigmoid(gi[:, :H] + gh[:, :H])
            z = jax.nn.sigmoid(gi[:, H:2 * H] + gh[:, H:2 * H])
            n = jnp.tanh(gi[:, 2 * H:] + r * gh[:, 2 * H:])
            h_new = (1.0 - z) * n + z * h
            upd = (t < lens)[:, None]
            h_next = jnp.where(upd, h_new, h)
            return h_next, jnp.where(upd, h_next, 0.0)

        ts = jnp.arange(T, dtype=jnp.int32)
        h0 = jnp.zeros((B, H), jnp.float32)
        hN, outs = jax.lax.scan(cell, h0, (xs_in, ts), reverse=reverse)
        return outs, hN

    inp = x
    hiddens = []
    of = ob = None
    for raw in enc.layers_raw:
        of, hf = run_dir(inp, raw[0], reverse=False)
        ob, hb = run_dir(inp, raw[1], reverse=True)
        inp = jnp.concatenate([of, ob], axis=-1)
        hiddens.extend([hf[None], hb[None]])
    if enc.bidir and (not seperate):
        outputs = of + ob
    else:
        outputs = jnp.concatenate([of, ob], axis=-1)
    return outputs, jnp.concatenate(hiddens, axis=0)


if __name__ == "__main__":
    # Small shapes consistent with the module: seq T=8, batch B=2,
    # vocab=20, embed=16, hidden=32, 2 layers, bidirectional.
    T, B = 8, 2
    vocab, E, Hd, L = 20, 16, 32, 2

    key = jax.random.PRNGKey(0)
    k_tok, k_model = jax.random.split(key)
    input_seqs = jax.random.randint(k_tok, (T, B), 0, vocab, dtype=jnp.int32)
    input_lens = np.array([8, 5], dtype=np.int32)

    enc = DynamicEncoderPallas(vocab, E, Hd, L, dropout=0.0,
                               bidir=True, key=k_model)

    # Path 1: fused-direction kernel (optimal on single-TC v5e/v6e).
    enc.fuse_dirs = True
    out_fused, hid_fused = enc(input_seqs, input_lens)
    out_fused = jax.block_until_ready(out_fused)
    hid_fused = jax.block_until_ready(hid_fused)

    # Path 2: 2-way parallel direction grid (megacore v7x layout).
    enc.fuse_dirs = False
    out_split, hid_split = enc(input_seqs, input_lens)
    out_split = jax.block_until_ready(out_split)
    hid_split = jax.block_until_ready(hid_split)

    # Pure-JAX f32 reference of the same forward semantics.
    out_ref, hid_ref = _reference_forward(enc, input_seqs, input_lens)
    out_ref = jax.block_until_ready(out_ref)

    assert out_fused.shape == (T, B, Hd)
    assert hid_fused.shape == (L * 2, B, Hd)
    assert bool(jnp.all(jnp.isfinite(out_fused)))
    assert bool(jnp.all(jnp.isfinite(hid_fused)))

    # The two kernel variants implement identical math.
    np.testing.assert_allclose(np.asarray(out_fused), np.asarray(out_split),
                               atol=1e-3, rtol=1e-3)
    np.testing.assert_allclose(np.asarray(hid_fused), np.asarray(hid_split),
                               atol=1e-3, rtol=1e-3)
    # bf16 streaming vs f32 reference: small drift tolerance.
    np.testing.assert_allclose(np.asarray(out_fused), np.asarray(out_ref),
                               atol=3e-2, rtol=0)
    np.testing.assert_allclose(np.asarray(hid_fused), np.asarray(hid_ref),
                               atol=3e-2, rtol=0)
    # pad_packed semantics: outputs beyond a sequence's length are exactly zero.
    np.testing.assert_allclose(
        np.asarray(out_fused[int(input_lens[1]):, 1, :]), 0.0, atol=1e-6)

    print("KERNEL_OK")
</pallas_src>

<mosaic_0001>
module attributes {stable_mosaic.version = 11 : i64} {
  func.func @_bigru_fused_kernel(%arg0: i32, %arg1: memref<8x1xi32, #tpu.memory_space<vmem>>, %arg2: memref<8x8x384xbf16, #tpu.memory_space<vmem>>, %arg3: memref<8x8x384xbf16, #tpu.memory_space<vmem>>, %arg4: memref<2x128x384xbf16, #tpu.memory_space<vmem>>, %arg5: memref<2x1x128xf32, #tpu.memory_space<vmem>>, %arg6: memref<8x8x128xbf16, #tpu.memory_space<vmem>>, %arg7: memref<8x8x128xbf16, #tpu.memory_space<vmem>>, %arg8: memref<2x8x128xf32, #tpu.memory_space<vmem>>, %arg9: memref<8x128xf32, #tpu.memory_space<vmem>>, %arg10: memref<8x128xf32, #tpu.memory_space<vmem>>) attributes {dimension_semantics = [#tpu.dimension_semantics<arbitrary>], iteration_bounds = array<i64: 1>, scalar_prefetch = 0 : i64, scratch_operands = 2 : i64, tpu.core_type = #tpu.core_type<tc>, window_params = [{pipeline_mode = #tpu.pipeline_mode<synchronous>, transform_indices = @transform_0, window_bounds = array<i64: 8, 1>}, {transform_indices = @transform_1, window_bounds = array<i64: 8, 8, 384>}, {transform_indices = @transform_2, window_bounds = array<i64: 8, 8, 384>}, {pipeline_mode = #tpu.pipeline_mode<synchronous>, transform_indices = @transform_3, window_bounds = array<i64: 2, 128, 384>}, {pipeline_mode = #tpu.pipeline_mode<synchronous>, transform_indices = @transform_4, window_bounds = array<i64: 2, 1, 128>}, {transform_indices = @transform_5, window_bounds = array<i64: 8, 8, 128>}, {transform_indices = @transform_6, window_bounds = array<i64: 8, 8, 128>}, {pipeline_mode = #tpu.pipeline_mode<synchronous>, transform_indices = @transform_7, window_bounds = array<i64: 2, 8, 128>}]} {
    %c0_i32 = arith.constant 0 : i32
    %0 = arith.cmpi eq, %arg0, %c0_i32 : i32
    %1 = arith.extui %0 : i1 to i32
    %c0_i32_0 = arith.constant 0 : i32
    %2 = arith.cmpi ne, %1, %c0_i32_0 : i32
    scf.if %2 {
      %cst_178 = arith.constant 0.000000e+00 : f32
      %814 = vector.broadcast %cst_178 : f32 to vector<8x128xf32>
      %c0_179 = arith.constant 0 : index
      %c0_180 = arith.constant 0 : index
      %815 = vector.load %arg9[%c0_179, %c0_180] : memref<8x128xf32, #tpu.memory_space<vmem>>, vector<8x128xf32>
      tpu.vector_store %arg9[%c0_179, %c0_180], %814 {strides = array<i32>} : memref<8x128xf32, #tpu.memory_space<vmem>>, vector<8x128xf32>,
      %cst_181 = arith.constant 0.000000e+00 : f32
      %816 = vector.broadcast %cst_181 : f32 to vector<8x128xf32>
      %c0_182 = arith.constant 0 : index
      %c0_183 = arith.constant 0 : index
      %817 = vector.load %arg10[%c0_182, %c0_183] : memref<8x128xf32, #tpu.memory_space<vmem>>, vector<8x128xf32>
      tpu.vector_store %arg10[%c0_182, %c0_183], %816 {strides = array<i32>} : memref<8x128xf32, #tpu.memory_space<vmem>>, vector<8x128xf32>,
    } else {
    }
    %c0 = arith.constant 0 : index
    %c0_1 = arith.constant 0 : index
    %c0_2 = arith.constant 0 : index
    %3 = vector.load %arg4[%c0, %c0_1, %c0_2] : memref<2x128x384xbf16, #tpu.memory_space<vmem>>, vector<1x128x384xbf16>
    %4 = vector.shape_cast %3 : vector<1x128x384xbf16> to vector<128x384xbf16>
    %c1 = arith.constant 1 : index
    %c0_3 = arith.constant 0 : index
    %c0_4 = arith.constant 0 : index
    %5 = vector.load %arg4[%c1, %c0_3, %c0_4] : memref<2x128x384xbf16, #tpu.memory_space<vmem>>, vector<1x128x384xbf16>
    %6 = vector.shape_cast %5 : vector<1x128x384xbf16> to vector<128x384xbf16>
    %c0_5 = arith.constant 0 : index
    %c0_6 = arith.constant 0 : index
    %c0_7 = arith.constant 0 : index
    %7 = vector.load %arg5[%c0_5, %c0_6, %c0_7] : memref<2x1x128xf32, #tpu.memory_space<vmem>>, vector<1x1x128xf32>
    %8 = vector.shape_cast %7 : vector<1x1x128xf32> to vector<1x128xf32>
    %c1_8 = arith.constant 1 : index
    %c0_9 = arith.constant 0 : index
    %c0_10 = arith.constant 0 : index
    %9 = vector.load %arg5[%c1_8, %c0_9, %c0_10] : memref<2x1x128xf32, #tpu.memory_space<vmem>>, vector<1x1x128xf32>
    %10 = vector.shape_cast %9 : vector<1x1x128xf32> to vector<1x128xf32>
    %c0_11 = arith.constant 0 : index
    %c0_12 = arith.constant 0 : index
    %11 = vector.load %arg1[%c0_11, %c0_12] : memref<8x1xi32, #tpu.memory_space<vmem>>, vector<8x1xi32>
    %c8_i32 = arith.constant 8 : i32
    %12 = arith.muli %arg0, %c8_i32 : i32
    %c0_i32_13 = arith.constant 0 : i32
    %13 = arith.subi %c0_i32_13, %arg0 : i32
    %c8_i32_14 = arith.constant 8 : i32
    %14 = arith.muli %13, %c8_i32_14 : i32
    %c0_15 = arith.constant 0 : index
    %c0_16 = arith.constant 0 : index
    %15 = vector.load %arg9[%c0_15, %c0_16] : memref<8x128xf32, #tpu.memory_space<vmem>>, vector<8x128xf32>
    %c0_17 = arith.constant 0 : index
    %c0_18 = arith.constant 0 : index
    %16 = vector.load %arg10[%c0_17, %c0_18] : memref<8x128xf32, #tpu.memory_space<vmem>>, vector<8x128xf32>
    %c0_i32_19 = arith.constant 0 : i32
    %c7_i32 = arith.constant 7 : i32
    %17 = arith.subi %c7_i32, %c0_i32_19 : i32
    %18 = arith.index_cast %c0_i32_19 : i32 to index
    %c0_20 = arith.constant 0 : index
    %c0_21 = arith.constant 0 : index
    %19 = vector.load %arg2[%18, %c0_20, %c0_21] : memref<8x8x384xbf16, #tpu.memory_space<vmem>>, vector<1x8x384xbf16>
    %20 = vector.shape_cast %19 : vector<1x8x384xbf16> to vector<8x384xbf16>
    %21 = arith.extf %20 : vector<8x384xbf16> to vector<8x384xf32>
    %22 = arith.index_cast %17 : i32 to index
    %c0_22 = arith.constant 0 : index
    %c0_23 = arith.constant 0 : index
    %23 = vector.load %arg3[%22, %c0_22, %c0_23] : memref<8x8x384xbf16, #tpu.memory_space<vmem>>, vector<1x8x384xbf16>
    %24 = vector.shape_cast %23 : vector<1x8x384xbf16> to vector<8x384xbf16>
    %25 = arith.extf %24 : vector<8x384xbf16> to vector<8x384xf32>
    %26 = arith.truncf %15 : vector<8x128xf32> to vector<8x128xbf16>
    %cst = arith.constant dense<0.000000e+00> : vector<8x384xf32>
    %27 = tpu.matmul %26, %4, %cst {dimension_numbers = #tpu.dot_dimension_numbers<[1], [0], [0], [1], [0, 0, 1, 1], [], []>} : vector<8x128xbf16>, vector<128x384xbf16>, vector<8x384xf32> -> vector<8x384xf32>
    %28 = arith.truncf %16 : vector<8x128xf32> to vector<8x128xbf16>
    %cst_24 = arith.constant dense<0.000000e+00> : vector<8x384xf32>
    %29 = tpu.matmul %28, %6, %cst_24 {dimension_numbers = #tpu.dot_dimension_numbers<[1], [0], [0], [1], [0, 0, 1, 1], [], []>} : vector<8x128xbf16>, vector<128x384xbf16>, vector<8x384xf32> -> vector<8x384xf32>
    %30 = arith.addi %12, %c0_i32_19 : i32
    %31 = vector.extract_strided_slice %21 {offsets = [0, 0], sizes = [8, 128], strides = [1, 1]} : vector<8x384xf32> to vector<8x128xf32>
    %32 = vector.extract_strided_slice %27 {offsets = [0, 0], sizes = [8, 128], strides = [1, 1]} : vector<8x384xf32> to vector<8x128xf32>
    %33 = arith.addf %31, %32 : vector<8x128xf32>
    %34 = arith.negf %33 : vector<8x128xf32>
    %35 = math.exp %34 : vector<8x128xf32>
    %cst_25 = arith.constant 1.000000e+00 : f32
    %36 = vector.broadcast %cst_25 : f32 to vector<8x128xf32>
    %37 = arith.addf %36, %35 : vector<8x128xf32>
    %38 = arith.divf %36, %37 : vector<8x128xf32>
    %39 = vector.extract_strided_slice %21 {offsets = [0, 128], sizes = [8, 128], strides = [1, 1]} : vector<8x384xf32> to vector<8x128xf32>
    %40 = vector.extract_strided_slice %27 {offsets = [0, 128], sizes = [8, 128], strides = [1, 1]} : vector<8x384xf32> to vector<8x128xf32>
    %41 = arith.addf %39, %40 : vector<8x128xf32>
    %42 = arith.negf %41 : vector<8x128xf32>
    %43 = math.exp %42 : vector<8x128xf32>
    %cst_26 = arith.constant 1.000000e+00 : f32
    %44 = vector.broadcast %cst_26 : f32 to vector<8x128xf32>
    %45 = arith.addf %44, %43 : vector<8x128xf32>
    %46 = arith.divf %44, %45 : vector<8x128xf32>
    %47 = vector.extract_strided_slice %21 {offsets = [0, 256], sizes = [8, 128], strides = [1, 1]} : vector<8x384xf32> to vector<8x128xf32>
    %48 = vector.extract_strided_slice %27 {offsets = [0, 256], sizes = [8, 128], strides = [1, 1]} : vector<8x384xf32> to vector<8x128xf32>
    %49 = vector.broadcast %8 : vector<1x128xf32> to vector<8x128xf32>
    %50 = arith.addf %48, %49 : vector<8x128xf32>
    %51 = arith.mulf %38, %50 : vector<8x128xf32>
    %52 = arith.addf %47, %51 : vector<8x128xf32>
    %53 = math.tanh %52 : vector<8x128xf32>
    %cst_27 = arith.constant 1.000000e+00 : f32
    %54 = vector.broadcast %cst_27 : f32 to vector<8x128xf32>
    %55 = arith.subf %54, %46 : vector<8x128xf32>
    %56 = arith.mulf %55, %53 : vector<8x128xf32>
    %57 = arith.mulf %46, %15 : vector<8x128xf32>
    %58 = arith.addf %56, %57 : vector<8x128xf32>
    %59 = vector.broadcast %30 : i32 to vector<8x1xi32>
    %60 = arith.cmpi slt, %59, %11 : vector<8x1xi32>
    %61 = vector.shape_cast %60 : vector<8x1xi1> to vector<8x1xi1>
    %62 = vector.broadcast %61 : vector<8x1xi1> to vector<8x128xi1>
    %63 = arith.select %62, %58, %15 : vector<8x128xi1>, vector<8x128xf32>
    %cst_28 = arith.constant 0.000000e+00 : f32
    %64 = vector.shape_cast %60 : vector<8x1xi1> to vector<8x1xi1>
    %65 = vector.broadcast %64 : vector<8x1xi1> to vector<8x128xi1>
    %66 = vector.broadcast %cst_28 : f32 to vector<8x128xf32>
    %67 = arith.select %65, %63, %66 : vector<8x128xi1>, vector<8x128xf32>
    %68 = arith.addi %14, %17 : i32
    %69 = vector.extract_strided_slice %25 {offsets = [0, 0], sizes = [8, 128], strides = [1, 1]} : vector<8x384xf32> to vector<8x128xf32>
    %70 = vector.extract_strided_slice %29 {offsets = [0, 0], sizes = [8, 128], strides = [1, 1]} : vector<8x384xf32> to vector<8x128xf32>
    %71 = arith.addf %69, %70 : vector<8x128xf32>
    %72 = arith.negf %71 : vector<8x128xf32>
    %73 = math.exp %72 : vector<8x128xf32>
    %cst_29 = arith.constant 1.000000e+00 : f32
    %74 = vector.broadcast %cst_29 : f32 to vector<8x128xf32>
    %75 = arith.addf %74, %73 : vector<8x128xf32>
    %76 = arith.divf %74, %75 : vector<8x128xf32>
    %77 = vector.extract_strided_slice %25 {offsets = [0, 128], sizes = [8, 128], strides = [1, 1]} : vector<8x384xf32> to vector<8x128xf32>
    %78 = vector.extract_strided_slice %29 {offsets = [0, 128], sizes = [8, 128], strides = [1, 1]} : vector<8x384xf32> to vector<8x128xf32>
    %79 = arith.addf %77, %78 : vector<8x128xf32>
    %80 = arith.negf %79 : vector<8x128xf32>
    %81 = math.exp %80 : vector<8x128xf32>
    %cst_30 = arith.constant 1.000000e+00 : f32
    %82 = vector.broadcast %cst_30 : f32 to vector<8x128xf32>
    %83 = arith.addf %82, %81 : vector<8x128xf32>
    %84 = arith.divf %82, %83 : vector<8x128xf32>
    %85 = vector.extract_strided_slice %25 {offsets = [0, 256], sizes = [8, 128], strides = [1, 1]} : vector<8x384xf32> to vector<8x128xf32>
    %86 = vector.extract_strided_slice %29 {offsets = [0, 256], sizes = [8, 128], strides = [1, 1]} : vector<8x384xf32> to vector<8x128xf32>
    %87 = vector.broadcast %10 : vector<1x128xf32> to vector<8x128xf32>
    %88 = arith.addf %86, %87 : vector<8x128xf32>
    %89 = arith.mulf %76, %88 : vector<8x128xf32>
    %90 = arith.addf %85, %89 : vector<8x128xf32>
    %91 = math.tanh %90 : vector<8x128xf32>
    %cst_31 = arith.constant 1.000000e+00 : f32
    %92 = vector.broadcast %cst_31 : f32 to vector<8x128xf32>
    %93 = arith.subf %92, %84 : vector<8x128xf32>
    %94 = arith.mulf %93, %91 : vector<8x128xf32>
    %95 = arith.mulf %84, %16 : vector<8x128xf32>
    %96 = arith.addf %94, %95 : vector<8x128xf32>
    %97 = vector.broadcast %68 : i32 to vector<8x1xi32>
    %98 = arith.cmpi slt, %97, %11 : vector<8x1xi32>
    %99 = vector.shape_cast %98 : vector<8x1xi1> to vector<8x1xi1>
    %100 = vector.broadcast %99 : vector<8x1xi1> to vector<8x128xi1>
    %101 = arith.select %100, %96, %16 : vector<8x128xi1>, vector<8x128xf32>
    %cst_32 = arith.constant 0.000000e+00 : f32
    %102 = vector.shape_cast %98 : vector<8x1xi1> to vector<8x1xi1>
    %103 = vector.broadcast %102 : vector<8x1xi1> to vector<8x128xi1>
    %104 = vector.broadcast %cst_32 : f32 to vector<8x128xf32>
    %105 = arith.select %103, %101, %104 : vector<8x128xi1>, vector<8x128xf32>
    %106 = arith.truncf %67 : vector<8x128xf32> to vector<8x128xbf16>
    %107 = arith.index_cast %c0_i32_19 : i32 to index
    %c0_33 = arith.constant 0 : index
    %c0_34 = arith.constant 0 : index
    %108 = vector.load %arg6[%107, %c0_33, %c0_34] : memref<8x8x128xbf16, #tpu.memory_space<vmem>>, vector<1x8x128xbf16>
    %109 = vector.shape_cast %108 : vector<1x8x128xbf16> to vector<8x128xbf16>
    %110 = vector.shape_cast %106 : vector<8x128xbf16> to vector<1x8x128xbf16>
    tpu.vector_store %arg6[%107, %c0_33, %c0_34], %110 {strides = array<i32>} : memref<8x8x128xbf16, #tpu.memory_space<vmem>>, vector<1x8x128xbf16>,
    %111 = arith.truncf %105 : vector<8x128xf32> to vector<8x128xbf16>
    %112 = arith.index_cast %17 : i32 to index
    %c0_35 = arith.constant 0 : index
    %c0_36 = arith.constant 0 : index
    %113 = vector.load %arg7[%112, %c0_35, %c0_36] : memref<8x8x128xbf16, #tpu.memory_space<vmem>>, vector<1x8x128xbf16>
    %114 = vector.shape_cast %113 : vector<1x8x128xbf16> to vector<8x128xbf16>
    %115 = vector.shape_cast %111 : vector<8x128xbf16> to vector<1x8x128xbf16>
    tpu.vector_store %arg7[%112, %c0_35, %c0_36], %115 {strides = array<i32>} : memref<8x8x128xbf16, #tpu.memory_space<vmem>>, vector<1x8x128xbf16>,
    %c1_i32 = arith.constant 1 : i32
    %c7_i32_37 = arith.constant 7 : i32
    %116 = arith.subi %c7_i32_37, %c1_i32 : i32
    %117 = arith.index_cast %c1_i32 : i32 to index
    %c0_38 = arith.constant 0 : index
    %c0_39 = arith.constant 0 : index
    %118 = vector.load %arg2[%117, %c0_38, %c0_39] : memref<8x8x384xbf16, #tpu.memory_space<vmem>>, vector<1x8x384xbf16>
    %119 = vector.shape_cast %118 : vector<1x8x384xbf16> to vector<8x384xbf16>
    %120 = arith.extf %119 : vector<8x384xbf16> to vector<8x384xf32>
    %121 = arith.index_cast %116 : i32 to index
    %c0_40 = arith.constant 0 : index
    %c0_41 = arith.constant 0 : index
    %122 = vector.load %arg3[%121, %c0_40, %c0_41] : memref<8x8x384xbf16, #tpu.memory_space<vmem>>, vector<1x8x384xbf16>
    %123 = vector.shape_cast %122 : vector<1x8x384xbf16> to vector<8x384xbf16>
    %124 = arith.extf %123 : vector<8x384xbf16> to vector<8x384xf32>
    %125 = arith.truncf %63 : vector<8x128xf32> to vector<8x128xbf16>
    %cst_42 = arith.constant dense<0.000000e+00> : vector<8x384xf32>
    %126 = tpu.matmul %125, %4, %cst_42 {dimension_numbers = #tpu.dot_dimension_numbers<[1], [0], [0], [1], [0, 0, 1, 1], [], []>} : vector<8x128xbf16>, vector<128x384xbf16>, vector<8x384xf32> -> vector<8x384xf32>
    %127 = arith.truncf %101 : vector<8x128xf32> to vector<8x128xbf16>
    %cst_43 = arith.constant dense<0.000000e+00> : vector<8x384xf32>
    %128 = tpu.matmul %127, %6, %cst_43 {dimension_numbers = #tpu.dot_dimension_numbers<[1], [0], [0], [1], [0, 0, 1, 1], [], []>} : vector<8x128xbf16>, vector<128x384xbf16>, vector<8x384xf32> -> vector<8x384xf32>
    %129 = arith.addi %12, %c1_i32 : i32
    %130 = vector.extract_strided_slice %120 {offsets = [0, 0], sizes = [8, 128], strides = [1, 1]} : vector<8x384xf32> to vector<8x128xf32>
    %131 = vector.extract_strided_slice %126 {offsets = [0, 0], sizes = [8, 128], strides = [1, 1]} : vector<8x384xf32> to vector<8x128xf32>
    %132 = arith.addf %130, %131 : vector<8x128xf32>
    %133 = arith.negf %132 : vector<8x128xf32>
    %134 = math.exp %133 : vector<8x128xf32>
    %cst_44 = arith.constant 1.000000e+00 : f32
    %135 = vector.broadcast %cst_44 : f32 to vector<8x128xf32>
    %136 = arith.addf %135, %134 : vector<8x128xf32>
    %137 = arith.divf %135, %136 : vector<8x128xf32>
    %138 = vector.extract_strided_slice %120 {offsets = [0, 128], sizes = [8, 128], strides = [1, 1]} : vector<8x384xf32> to vector<8x128xf32>
    %139 = vector.extract_strided_slice %126 {offsets = [0, 128], sizes = [8, 128], strides = [1, 1]} : vector<8x384xf32> to vector<8x128xf32>
    %140 = arith.addf %138, %139 : vector<8x128xf32>
    %141 = arith.negf %140 : vector<8x128xf32>
    %142 = math.exp %141 : vector<8x128xf32>
    %cst_45 = arith.constant 1.000000e+00 : f32
    %143 = vector.broadcast %cst_45 : f32 to vector<8x128xf32>
    %144 = arith.addf %143, %142 : vector<8x128xf32>
    %145 = arith.divf %143, %144 : vector<8x128xf32>
    %146 = vector.extract_strided_slice %120 {offsets = [0, 256], sizes = [8, 128], strides = [1, 1]} : vector<8x384xf32> to vector<8x128xf32>
    %147 = vector.extract_strided_slice %126 {offsets = [0, 256], sizes = [8, 128], strides = [1, 1]} : vector<8x384xf32> to vector<8x128xf32>
    %148 = vector.broadcast %8 : vector<1x128xf32> to vector<8x128xf32>
    %149 = arith.addf %147, %148 : vector<8x128xf32>
    %150 = arith.mulf %137, %149 : vector<8x128xf32>
    %151 = arith.addf %146, %150 : vector<8x128xf32>
    %152 = math.tanh %151 : vector<8x128xf32>
    %cst_46 = arith.constant 1.000000e+00 : f32
    %153 = vector.broadcast %cst_46 : f32 to vector<8x128xf32>
    %154 = arith.subf %153, %145 : vector<8x128xf32>
    %155 = arith.mulf %154, %152 : vector<8x128xf32>
    %156 = arith.mulf %145, %63 : vector<8x128xf32>
    %157 = arith.addf %155, %156 : vector<8x128xf32>
    %158 = vector.broadcast %129 : i32 to vector<8x1xi32>
    %159 = arith.cmpi slt, %158, %11 : vector<8x1xi32>
    %160 = vector.shape_cast %159 : vector<8x1xi1> to vector<8x1xi1>
    %161 = vector.broadcast %160 : vector<8x1xi1> to vector<8x128xi1>
    %162 = arith.select %161, %157, %63 : vector<8x128xi1>, vector<8x128xf32>
    %cst_47 = arith.constant 0.000000e+00 : f32
    %163 = vector.shape_cast %159 : vector<8x1xi1> to vector<8x1xi1>
    %164 = vector.broadcast %163 : vector<8x1xi1> to vector<8x128xi1>
    %165 = vector.broadcast %cst_47 : f32 to vector<8x128xf32>
    %166 = arith.select %164, %162, %165 : vector<8x128xi1>, vector<8x128xf32>
    %167 = arith.addi %14, %116 : i32
    %168 = vector.extract_strided_slice %124 {offsets = [0, 0], sizes = [8, 128], strides = [1, 1]} : vector<8x384xf32> to vector<8x128xf32>
    %169 = vector.extract_strided_slice %128 {offsets = [0, 0], sizes = [8, 128], strides = [1, 1]} : vector<8x384xf32> to vector<8x128xf32>
    %170 = arith.addf %168, %169 : vector<8x128xf32>
    %171 = arith.negf %170 : vector<8x128xf32>
    %172 = math.exp %171 : vector<8x128xf32>
    %cst_48 = arith.constant 1.000000e+00 : f32
    %173 = vector.broadcast %cst_48 : f32 to vector<8x128xf32>
    %174 = arith.addf %173, %172 : vector<8x128xf32>
    %175 = arith.divf %173, %174 : vector<8x128xf32>
    %176 = vector.extract_strided_slice %124 {offsets = [0, 128], sizes = [8, 128], strides = [1, 1]} : vector<8x384xf32> to vector<8x128xf32>
    %177 = vector.extract_strided_slice %128 {offsets = [0, 128], sizes = [8, 128], strides = [1, 1]} : vector<8x384xf32> to vector<8x128xf32>
    %178 = arith.addf %176, %177 : vector<8x128xf32>
    %179 = arith.negf %178 : vector<8x128xf32>
    %180 = math.exp %179 : vector<8x128xf32>
    %cst_49 = arith.constant 1.000000e+00 : f32
    %181 = vector.broadcast %cst_49 : f32 to vector<8x128xf32>
    %182 = arith.addf %181, %180 : vector<8x128xf32>
    %183 = arith.divf %181, %182 : vector<8x128xf32>
    %184 = vector.extract_strided_slice %124 {offsets = [0, 256], sizes = [8, 128], strides = [1, 1]} : vector<8x384xf32> to vector<8x128xf32>
    %185 = vector.extract_strided_slice %128 {offsets = [0, 256], sizes = [8, 128], strides = [1, 1]} : vector<8x384xf32> to vector<8x128xf32>
    %186 = vector.broadcast %10 : vector<1x128xf32> to vector<8x128xf32>
    %187 = arith.addf %185, %186 : vector<8x128xf32>
    %188 = arith.mulf %175, %187 : vector<8x128xf32>
    %189 = arith.addf %184, %188 : vector<8x128xf32>
    %190 = math.tanh %189 : vector<8x128xf32>
    %cst_50 = arith.constant 1.000000e+00 : f32
    %191 = vector.broadcast %cst_50 : f32 to vector<8x128xf32>
    %192 = arith.subf %191, %183 : vector<8x128xf32>
    %193 = arith.mulf %192, %190 : vector<8x128xf32>
    %194 = arith.mulf %183, %101 : vector<8x128xf32>
    %195 = arith.addf %193, %194 : vector<8x128xf32>
    %196 = vector.broadcast %167 : i32 to vector<8x1xi32>
    %197 = arith.cmpi slt, %196, %11 : vector<8x1xi32>
    %198 = vector.shape_cast %197 : vector<8x1xi1> to vector<8x1xi1>
    %199 = vector.broadcast %198 : vector<8x1xi1> to vector<8x128xi1>
    %200 = arith.select %199, %195, %101 : vector<8x128xi1>, vector<8x128xf32>
    %cst_51 = arith.constant 0.000000e+00 : f32
    %201 = vector.shape_cast %197 : vector<8x1xi1> to vector<8x1xi1>
    %202 = vector.broadcast %201 : vector<8x1xi1> to vector<8x128xi1>
    %203 = vector.broadcast %cst_51 : f32 to vector<8x128xf32>
    %204 = arith.select %202, %200, %203 : vector<8x128xi1>, vector<8x128xf32>
    %205 = arith.truncf %166 : vector<8x128xf32> to vector<8x128xbf16>
    %206 = arith.index_cast %c1_i32 : i32 to index
    %c0_52 = arith.constant 0 : index
    %c0_53 = arith.constant 0 : index
    %207 = vector.load %arg6[%206, %c0_52, %c0_53] : memref<8x8x128xbf16, #tpu.memory_space<vmem>>, vector<1x8x128xbf16>
    %208 = vector.shape_cast %207 : vector<1x8x128xbf16> to vector<8x128xbf16>
    %209 = vector.shape_cast %205 : vector<8x128xbf16> to vector<1x8x128xbf16>
    tpu.vector_store %arg6[%206, %c0_52, %c0_53], %209 {strides = array<i32>} : memref<8x8x128xbf16, #tpu.memory_space<vmem>>, vector<1x8x128xbf16>,
    %210 = arith.truncf %204 : vector<8x128xf32> to vector<8x128xbf16>
    %211 = arith.index_cast %116 : i32 to index
    %c0_54 = arith.constant 0 : index
    %c0_55 = arith.constant 0 : index
    %212 = vector.load %arg7[%211, %c0_54, %c0_55] : memref<8x8x128xbf16, #tpu.memory_space<vmem>>, vector<1x8x128xbf16>
    %213 = vector.shape_cast %212 : vector<1x8x128xbf16> to vector<8x128xbf16>
    %214 = vector.shape_cast %210 : vector<8x128xbf16> to vector<1x8x128xbf16>
    tpu.vector_store %arg7[%211, %c0_54, %c0_55], %214 {strides = array<i32>} : memref<8x8x128xbf16, #tpu.memory_space<vmem>>, vector<1x8x128xbf16>,
    %c2_i32 = arith.constant 2 : i32
    %c7_i32_56 = arith.constant 7 : i32
    %215 = arith.subi %c7_i32_56, %c2_i32 : i32
    %216 = arith.index_cast %c2_i32 : i32 to index
    %c0_57 = arith.constant 0 : index
    %c0_58 = arith.constant 0 : index
    %217 = vector.load %arg2[%216, %c0_57, %c0_58] : memref<8x8x384xbf16, #tpu.memory_space<vmem>>, vector<1x8x384xbf16>
    %218 = vector.shape_cast %217 : vector<1x8x384xbf16> to vector<8x384xbf16>
    %219 = arith.extf %218 : vector<8x384xbf16> to vector<8x384xf32>
    %220 = arith.index_cast %215 : i32 to index
    %c0_59 = arith.constant 0 : index
    %c0_60 = arith.constant 0 : index
    %221 = vector.load %arg3[%220, %c0_59, %c0_60] : memref<8x8x384xbf16, #tpu.memory_space<vmem>>, vector<1x8x384xbf16>
    %222 = vector.shape_cast %221 : vector<1x8x384xbf16> to vector<8x384xbf16>
    %223 = arith.extf %222 : vector<8x384xbf16> to vector<8x384xf32>
    %224 = arith.truncf %162 : vector<8x128xf32> to vector<8x128xbf16>
    %cst_61 = arith.constant dense<0.000000e+00> : vector<8x384xf32>
    %225 = tpu.matmul %224, %4, %cst_61 {dimension_numbers = #tpu.dot_dimension_numbers<[1], [0], [0], [1], [0, 0, 1, 1], [], []>} : vector<8x128xbf16>, vector<128x384xbf16>, vector<8x384xf32> -> vector<8x384xf32>
    %226 = arith.truncf %200 : vector<8x128xf32> to vector<8x128xbf16>
    %cst_62 = arith.constant dense<0.000000e+00> : vector<8x384xf32>
    %227 = tpu.matmul %226, %6, %cst_62 {dimension_numbers = #tpu.dot_dimension_numbers<[1], [0], [0], [1], [0, 0, 1, 1], [], []>} : vector<8x128xbf16>, vector<128x384xbf16>, vector<8x384xf32> -> vector<8x384xf32>
    %228 = arith.addi %12, %c2_i32 : i32
    %229 = vector.extract_strided_slice %219 {offsets = [0, 0], sizes = [8, 128], strides = [1, 1]} : vector<8x384xf32> to vector<8x128xf32>
    %230 = vector.extract_strided_slice %225 {offsets = [0, 0], sizes = [8, 128], strides = [1, 1]} : vector<8x384xf32> to vector<8x128xf32>
    %231 = arith.addf %229, %230 : vector<8x128xf32>
    %232 = arith.negf %231 : vector<8x128xf32>
    %233 = math.exp %232 : vector<8x128xf32>
    %cst_63 = arith.constant 1.000000e+00 : f32
    %234 = vector.broadcast %cst_63 : f32 to vector<8x128xf32>
    %235 = arith.addf %234, %233 : vector<8x128xf32>
    %236 = arith.divf %234, %235 : vector<8x128xf32>
    %237 = vector.extract_strided_slice %219 {offsets = [0, 128], sizes = [8, 128], strides = [1, 1]} : vector<8x384xf32> to vector<8x128xf32>
    %238 = vector.extract_strided_slice %225 {offsets = [0, 128], sizes = [8, 128], strides = [1, 1]} : vector<8x384xf32> to vector<8x128xf32>
    %239 = arith.addf %237, %238 : vector<8x128xf32>
    %240 = arith.negf %239 : vector<8x128xf32>
    %241 = math.exp %240 : vector<8x128xf32>
    %cst_64 = arith.constant 1.000000e+00 : f32
    %242 = vector.broadcast %cst_64 : f32 to vector<8x128xf32>
    %243 = arith.addf %242, %241 : vector<8x128xf32>
    %244 = arith.divf %242, %243 : vector<8x128xf32>
    %245 = vector.extract_strided_slice %219 {offsets = [0, 256], sizes = [8, 128], strides = [1, 1]} : vector<8x384xf32> to vector<8x128xf32>
    %246 = vector.extract_strided_slice %225 {offsets = [0, 256], sizes = [8, 128], strides = [1, 1]} : vector<8x384xf32> to vector<8x128xf32>
    %247 = vector.broadcast %8 : vector<1x128xf32> to vector<8x128xf32>
    %248 = arith.addf %246, %247 : vector<8x128xf32>
    %249 = arith.mulf %236, %248 : vector<8x128xf32>
    %250 = arith.addf %245, %249 : vector<8x128xf32>
    %251 = math.tanh %250 : vector<8x128xf32>
    %cst_65 = arith.constant 1.000000e+00 : f32
    %252 = vector.broadcast %cst_65 : f32 to vector<8x128xf32>
    %253 = arith.subf %252, %244 : vector<8x128xf32>
    %254 = arith.mulf %253, %251 : vector<8x128xf32>
    %255 = arith.mulf %244, %162 : vector<8x128xf32>
    %256 = arith.addf %254, %255 : vector<8x128xf32>
    %257 = vector.broadcast %228 : i32 to vector<8x1xi32>
    %258 = arith.cmpi slt, %257, %11 : vector<8x1xi32>
    %259 = vector.shape_cast %258 : vector<8x1xi1> to vector<8x1xi1>
    %260 = vector.broadcast %259 : vector<8x1xi1> to vector<8x128xi1>
    %261 = arith.select %260, %256, %162 : vector<8x128xi1>, vector<8x128xf32>
    %cst_66 = arith.constant 0.000000e+00 : f32
    %262 = vector.shape_cast %258 : vector<8x1xi1> to vector<8x1xi1>
    %263 = vector.broadcast %262 : vector<8x1xi1> to vector<8x128xi1>
    %264 = vector.broadcast %cst_66 : f32 to vector<8x128xf32>
    %265 = arith.select %263, %261, %264 : vector<8x128xi1>, vector<8x128xf32>
    %266 = arith.addi %14, %215 : i32
    %267 = vector.extract_strided_slice %223 {offsets = [0, 0], sizes = [8, 128], strides = [1, 1]} : vector<8x384xf32> to vector<8x128xf32>
    %268 = vector.extract_strided_slice %227 {offsets = [0, 0], sizes = [8, 128], strides = [1, 1]} : vector<8x384xf32> to vector<8x128xf32>
    %269 = arith.addf %267, %268 : vector<8x128xf32>
    %270 = arith.negf %269 : vector<8x128xf32>
    %271 = math.exp %270 : vector<8x128xf32>
    %cst_67 = arith.constant 1.000000e+00 : f32
    %272 = vector.broadcast %cst_67 : f32 to vector<8x128xf32>
    %273 = arith.addf %272, %271 : vector<8x128xf32>
    %274 = arith.divf %272, %273 : vector<8x128xf32>
    %275 = vector.extract_strided_slice %223 {offsets = [0, 128], sizes = [8, 128], strides = [1, 1]} : vector<8x384xf32> to vector<8x128xf32>
    %276 = vector.extract_strided_slice %227 {offsets = [0, 128], sizes = [8, 128], strides = [1, 1]} : vector<8x384xf32> to vector<8x128xf32>
    %277 = arith.addf %275, %276 : vector<8x128xf32>
    %278 = arith.negf %277 : vector<8x128xf32>
    %279 = math.exp %278 : vector<8x128xf32>
    %cst_68 = arith.constant 1.000000e+00 : f32
    %280 = vector.broadcast %cst_68 : f32 to vector<8x128xf32>
    %281 = arith.addf %280, %279 : vector<8x128xf32>
    %282 = arith.divf %280, %281 : vector<8x128xf32>
    %283 = vector.extract_strided_slice %223 {offsets = [0, 256], sizes = [8, 128], strides = [1, 1]} : vector<8x384xf32> to vector<8x128xf32>
    %284 = vector.extract_strided_slice %227 {offsets = [0, 256], sizes = [8, 128], strides = [1, 1]} : vector<8x384xf32> to vector<8x128xf32>
    %285 = vector.broadcast %10 : vector<1x128xf32> to vector<8x128xf32>
    %286 = arith.addf %284, %285 : vector<8x128xf32>
    %287 = arith.mulf %274, %286 : vector<8x128xf32>
    %288 = arith.addf %283, %287 : vector<8x128xf32>
    %289 = math.tanh %288 : vector<8x128xf32>
    %cst_69 = arith.constant 1.000000e+00 : f32
    %290 = vector.broadcast %cst_69 : f32 to vector<8x128xf32>
    %291 = arith.subf %290, %282 : vector<8x128xf32>
    %292 = arith.mulf %291, %289 : vector<8x128xf32>
    %293 = arith.mulf %282, %200 : vector<8x128xf32>
    %294 = arith.addf %292, %293 : vector<8x128xf32>
    %295 = vector.broadcast %266 : i32 to vector<8x1xi32>
    %296 = arith.cmpi slt, %295, %11 : vector<8x1xi32>
    %297 = vector.shape_cast %296 : vector<8x1xi1> to vector<8x1xi1>
    %298 = vector.broadcast %297 : vector<8x1xi1> to vector<8x128xi1>
    %299 = arith.select %298, %294, %200 : vector<8x128xi1>, vector<8x128xf32>
    %cst_70 = arith.constant 0.000000e+00 : f32
    %300 = vector.shape_cast %296 : vector<8x1xi1> to vector<8x1xi1>
    %301 = vector.broadcast %300 : vector<8x1xi1> to vector<8x128xi1>
    %302 = vector.broadcast %cst_70 : f32 to vector<8x128xf32>
    %303 = arith.select %301, %299, %302 : vector<8x128xi1>, vector<8x128xf32>
    %304 = arith.truncf %265 : vector<8x128xf32> to vector<8x128xbf16>
    %305 = arith.index_cast %c2_i32 : i32 to index
    %c0_71 = arith.constant 0 : index
    %c0_72 = arith.constant 0 : index
    %306 = vector.load %arg6[%305, %c0_71, %c0_72] : memref<8x8x128xbf16, #tpu.memory_space<vmem>>, vector<1x8x128xbf16>
    %307 = vector.shape_cast %306 : vector<1x8x128xbf16> to vector<8x128xbf16>
    %308 = vector.shape_cast %304 : vector<8x128xbf16> to vector<1x8x128xbf16>
    tpu.vector_store %arg6[%305, %c0_71, %c0_72], %308 {strides = array<i32>} : memref<8x8x128xbf16, #tpu.memory_space<vmem>>, vector<1x8x128xbf16>,
    %309 = arith.truncf %303 : vector<8x128xf32> to vector<8x128xbf16>
    %310 = arith.index_cast %215 : i32 to index
    %c0_73 = arith.constant 0 : index
    %c0_74 = arith.constant 0 : index
    %311 = vector.load %arg7[%310, %c0_73, %c0_74] : memref<8x8x128xbf16, #tpu.memory_space<vmem>>, vector<1x8x128xbf16>
    %312 = vector.shape_cast %311 : vector<1x8x128xbf16> to vector<8x128xbf16>
    %313 = vector.shape_cast %309 : vector<8x128xbf16> to vector<1x8x128xbf16>
    tpu.vector_store %arg7[%310, %c0_73, %c0_74], %313 {strides = array<i32>} : memref<8x8x128xbf16, #tpu.memory_space<vmem>>, vector<1x8x128xbf16>,
    %c3_i32 = arith.constant 3 : i32
    %c7_i32_75 = arith.constant 7 : i32
    %314 = arith.subi %c7_i32_75, %c3_i32 : i32
    %315 = arith.index_cast %c3_i32 : i32 to index
    %c0_76 = arith.constant 0 : index
    %c0_77 = arith.constant 0 : index
    %316 = vector.load %arg2[%315, %c0_76, %c0_77] : memref<8x8x384xbf16, #tpu.memory_space<vmem>>, vector<1x8x384xbf16>
    %317 = vector.shape_cast %316 : vector<1x8x384xbf16> to vector<8x384xbf16>
    %318 = arith.extf %317 : vector<8x384xbf16> to vector<8x384xf32>
    %319 = arith.index_cast %314 : i32 to index
    %c0_78 = arith.constant 0 : index
    %c0_79 = arith.constant 0 : index
    %320 = vector.load %arg3[%319, %c0_78, %c0_79] : memref<8x8x384xbf16, #tpu.memory_space<vmem>>, vector<1x8x384xbf16>
    %321 = vector.shape_cast %320 : vector<1x8x384xbf16> to vector<8x384xbf16>
    %322 = arith.extf %321 : vector<8x384xbf16> to vector<8x384xf32>
    %323 = arith.truncf %261 : vector<8x128xf32> to vector<8x128xbf16>
    %cst_80 = arith.constant dense<0.000000e+00> : vector<8x384xf32>
    %324 = tpu.matmul %323, %4, %cst_80 {dimension_numbers = #tpu.dot_dimension_numbers<[1], [0], [0], [1], [0, 0, 1, 1], [], []>} : vector<8x128xbf16>, vector<128x384xbf16>, vector<8x384xf32> -> vector<8x384xf32>
    %325 = arith.truncf %299 : vector<8x128xf32> to vector<8x128xbf16>
    %cst_81 = arith.constant dense<0.000000e+00> : vector<8x384xf32>
    %326 = tpu.matmul %325, %6, %cst_81 {dimension_numbers = #tpu.dot_dimension_numbers<[1], [0], [0], [1], [0, 0, 1, 1], [], []>} : vector<8x128xbf16>, vector<128x384xbf16>, vector<8x384xf32> -> vector<8x384xf32>
    %327 = arith.addi %12, %c3_i32 : i32
    %328 = vector.extract_strided_slice %318 {offsets = [0, 0], sizes = [8, 128], strides = [1, 1]} : vector<8x384xf32> to vector<8x128xf32>
    %329 = vector.extract_strided_slice %324 {offsets = [0, 0], sizes = [8, 128], strides = [1, 1]} : vector<8x384xf32> to vector<8x128xf32>
    %330 = arith.addf %328, %329 : vector<8x128xf32>
    %331 = arith.negf %330 : vector<8x128xf32>
    %332 = math.exp %331 : vector<8x128xf32>
    %cst_82 = arith.constant 1.000000e+00 : f32
    %333 = vector.broadcast %cst_82 : f32 to vector<8x128xf32>
    %334 = arith.addf %333, %332 : vector<8x128xf32>
    %335 = arith.divf %333, %334 : vector<8x128xf32>
    %336 = vector.extract_strided_slice %318 {offsets = [0, 128], sizes = [8, 128], strides = [1, 1]} : vector<8x384xf32> to vector<8x128xf32>
    %337 = vector.extract_strided_slice %324 {offsets = [0, 128], sizes = [8, 128], strides = [1, 1]} : vector<8x384xf32> to vector<8x128xf32>
    %338 = arith.addf %336, %337 : vector<8x128xf32>
    %339 = arith.negf %338 : vector<8x128xf32>
    %340 = math.exp %339 : vector<8x128xf32>
    %cst_83 = arith.constant 1.000000e+00 : f32
    %341 = vector.broadcast %cst_83 : f32 to vector<8x128xf32>
    %342 = arith.addf %341, %340 : vector<8x128xf32>
    %343 = arith.divf %341, %342 : vector<8x128xf32>
    %344 = vector.extract_strided_slice %318 {offsets = [0, 256], sizes = [8, 128], strides = [1, 1]} : vector<8x384xf32> to vector<8x128xf32>
    %345 = vector.extract_strided_slice %324 {offsets = [0, 256], sizes = [8, 128], strides = [1, 1]} : vector<8x384xf32> to vector<8x128xf32>
    %346 = vector.broadcast %8 : vector<1x128xf32> to vector<8x128xf32>
    %347 = arith.addf %345, %346 : vector<8x128xf32>
    %348 = arith.mulf %335, %347 : vector<8x128xf32>
    %349 = arith.addf %344, %348 : vector<8x128xf32>
    %350 = math.tanh %349 : vector<8x128xf32>
    %cst_84 = arith.constant 1.000000e+00 : f32
    %351 = vector.broadcast %cst_84 : f32 to vector<8x128xf32>
    %352 = arith.subf %351, %343 : vector<8x128xf32>
    %353 = arith.mulf %352, %350 : vector<8x128xf32>
    %354 = arith.mulf %343, %261 : vector<8x128xf32>
    %355 = arith.addf %353, %354 : vector<8x128xf32>
    %356 = vector.broadcast %327 : i32 to vector<8x1xi32>
    %357 = arith.cmpi slt, %356, %11 : vector<8x1xi32>
    %358 = vector.shape_cast %357 : vector<8x1xi1> to vector<8x1xi1>
    %359 = vector.broadcast %358 : vector<8x1xi1> to vector<8x128xi1>
    %360 = arith.select %359, %355, %261 : vector<8x128xi1>, vector<8x128xf32>
    %cst_85 = arith.constant 0.000000e+00 : f32
    %361 = vector.shape_cast %357 : vector<8x1xi1> to vector<8x1xi1>
    %362 = vector.broadcast %361 : vector<8x1xi1> to vector<8x128xi1>
    %363 = vector.broadcast %cst_85 : f32 to vector<8x128xf32>
    %364 = arith.select %362, %360, %363 : vector<8x128xi1>, vector<8x128xf32>
    %365 = arith.addi %14, %314 : i32
    %366 = vector.extract_strided_slice %322 {offsets = [0, 0], sizes = [8, 128], strides = [1, 1]} : vector<8x384xf32> to vector<8x128xf32>
    %367 = vector.extract_strided_slice %326 {offsets = [0, 0], sizes = [8, 128], strides = [1, 1]} : vector<8x384xf32> to vector<8x128xf32>
    %368 = arith.addf %366, %367 : vector<8x128xf32>
    %369 = arith.negf %368 : vector<8x128xf32>
    %370 = math.exp %369 : vector<8x128xf32>
    %cst_86 = arith.constant 1.000000e+00 : f32
    %371 = vector.broadcast %cst_86 : f32 to vector<8x128xf32>
    %372 = arith.addf %371, %370 : vector<8x128xf32>
    %373 = arith.divf %371, %372 : vector<8x128xf32>
    %374 = vector.extract_strided_slice %322 {offsets = [0, 128], sizes = [8, 128], strides = [1, 1]} : vector<8x384xf32> to vector<8x128xf32>
    %375 = vector.extract_strided_slice %326 {offsets = [0, 128], sizes = [8, 128], strides = [1, 1]} : vector<8x384xf32> to vector<8x128xf32>
    %376 = arith.addf %374, %375 : vector<8x128xf32>
    %377 = arith.negf %376 : vector<8x128xf32>
    %378 = math.exp %377 : vector<8x128xf32>
    %cst_87 = arith.constant 1.000000e+00 : f32
    %379 = vector.broadcast %cst_87 : f32 to vector<8x128xf32>
    %380 = arith.addf %379, %378 : vector<8x128xf32>
    %381 = arith.divf %379, %380 : vector<8x128xf32>
    %382 = vector.extract_strided_slice %322 {offsets = [0, 256], sizes = [8, 128], strides = [1, 1]} : vector<8x384xf32> to vector<8x128xf32>
    %383 = vector.extract_strided_slice %326 {offsets = [0, 256], sizes = [8, 128], strides = [1, 1]} : vector<8x384xf32> to vector<8x128xf32>
    %384 = vector.broadcast %10 : vector<1x128xf32> to vector<8x128xf32>
    %385 = arith.addf %383, %384 : vector<8x128xf32>
    %386 = arith.mulf %373, %385 : vector<8x128xf32>
    %387 = arith.addf %382, %386 : vector<8x128xf32>
    %388 = math.tanh %387 : vector<8x128xf32>
    %cst_88 = arith.constant 1.000000e+00 : f32
    %389 = vector.broadcast %cst_88 : f32 to vector<8x128xf32>
    %390 = arith.subf %389, %381 : vector<8x128xf32>
    %391 = arith.mulf %390, %388 : vector<8x128xf32>
    %392 = arith.mulf %381, %299 : vector<8x128xf32>
    %393 = arith.addf %391, %392 : vector<8x128xf32>
    %394 = vector.broadcast %365 : i32 to vector<8x1xi32>
    %395 = arith.cmpi slt, %394, %11 : vector<8x1xi32>
    %396 = vector.shape_cast %395 : vector<8x1xi1> to vector<8x1xi1>
    %397 = vector.broadcast %396 : vector<8x1xi1> to vector<8x128xi1>
    %398 = arith.select %397, %393, %299 : vector<8x128xi1>, vector<8x128xf32>
    %cst_89 = arith.constant 0.000000e+00 : f32
    %399 = vector.shape_cast %395 : vector<8x1xi1> to vector<8x1xi1>
    %400 = vector.broadcast %399 : vector<8x1xi1> to vector<8x128xi1>
    %401 = vector.broadcast %cst_89 : f32 to vector<8x128xf32>
    %402 = arith.select %400, %398, %401 : vector<8x128xi1>, vector<8x128xf32>
    %403 = arith.truncf %364 : vector<8x128xf32> to vector<8x128xbf16>
    %404 = arith.index_cast %c3_i32 : i32 to index
    %c0_90 = arith.constant 0 : index
    %c0_91 = arith.constant 0 : index
    %405 = vector.load %arg6[%404, %c0_90, %c0_91] : memref<8x8x128xbf16, #tpu.memory_space<vmem>>, vector<1x8x128xbf16>
    %406 = vector.shape_cast %405 : vector<1x8x128xbf16> to vector<8x128xbf16>
    %407 = vector.shape_cast %403 : vector<8x128xbf16> to vector<1x8x128xbf16>
    tpu.vector_store %arg6[%404, %c0_90, %c0_91], %407 {strides = array<i32>} : memref<8x8x128xbf16, #tpu.memory_space<vmem>>, vector<1x8x128xbf16>,
    %408 = arith.truncf %402 : vector<8x128xf32> to vector<8x128xbf16>
    %409 = arith.index_cast %314 : i32 to index
    %c0_92 = arith.constant 0 : index
    %c0_93 = arith.constant 0 : index
    %410 = vector.load %arg7[%409, %c0_92, %c0_93] : memref<8x8x128xbf16, #tpu.memory_space<vmem>>, vector<1x8x128xbf16>
    %411 = vector.shape_cast %410 : vector<1x8x128xbf16> to vector<8x128xbf16>
    %412 = vector.shape_cast %408 : vector<8x128xbf16> to vector<1x8x128xbf16>
    tpu.vector_store %arg7[%409, %c0_92, %c0_93], %412 {strides = array<i32>} : memref<8x8x128xbf16, #tpu.memory_space<vmem>>, vector<1x8x128xbf16>,
    %c4_i32 = arith.constant 4 : i32
    %c7_i32_94 = arith.constant 7 : i32
    %413 = arith.subi %c7_i32_94, %c4_i32 : i32
    %414 = arith.index_cast %c4_i32 : i32 to index
    %c0_95 = arith.constant 0 : index
    %c0_96 = arith.constant 0 : index
    %415 = vector.load %arg2[%414, %c0_95, %c0_96] : memref<8x8x384xbf16, #tpu.memory_space<vmem>>, vector<1x8x384xbf16>
    %416 = vector.shape_cast %415 : vector<1x8x384xbf16> to vector<8x384xbf16>
    %417 = arith.extf %416 : vector<8x384xbf16> to vector<8x384xf32>
    %418 = arith.index_cast %413 : i32 to index
    %c0_97 = arith.constant 0 : index
    %c0_98 = arith.constant 0 : index
    %419 = vector.load %arg3[%418, %c0_97, %c0_98] : memref<8x8x384xbf16, #tpu.memory_space<vmem>>, vector<1x8x384xbf16>
    %420 = vector.shape_cast %419 : vector<1x8x384xbf16> to vector<8x384xbf16>
    %421 = arith.extf %420 : vector<8x384xbf16> to vector<8x384xf32>
    %422 = arith.truncf %360 : vector<8x128xf32> to vector<8x128xbf16>
    %cst_99 = arith.constant dense<0.000000e+00> : vector<8x384xf32>
    %423 = tpu.matmul %422, %4, %cst_99 {dimension_numbers = #tpu.dot_dimension_numbers<[1], [0], [0], [1], [0, 0, 1, 1], [], []>} : vector<8x128xbf16>, vector<128x384xbf16>, vector<8x384xf32> -> vector<8x384xf32>
    %424 = arith.truncf %398 : vector<8x128xf32> to vector<8x128xbf16>
    %cst_100 = arith.constant dense<0.000000e+00> : vector<8x384xf32>
    %425 = tpu.matmul %424, %6, %cst_100 {dimension_numbers = #tpu.dot_dimension_numbers<[1], [0], [0], [1], [0, 0, 1, 1], [], []>} : vector<8x128xbf16>, vector<128x384xbf16>, vector<8x384xf32> -> vector<8x384xf32>
    %426 = arith.addi %12, %c4_i32 : i32
    %427 = vector.extract_strided_slice %417 {offsets = [0, 0], sizes = [8, 128], strides = [1, 1]} : vector<8x384xf32> to vector<8x128xf32>
    %428 = vector.extract_strided_slice %423 {offsets = [0, 0], sizes = [8, 128], strides = [1, 1]} : vector<8x384xf32> to vector<8x128xf32>
    %429 = arith.addf %427, %428 : vector<8x128xf32>
    %430 = arith.negf %429 : vector<8x128xf32>
    %431 = math.exp %430 : vector<8x128xf32>
    %cst_101 = arith.constant 1.000000e+00 : f32
    %432 = vector.broadcast %cst_101 : f32 to vector<8x128xf32>
    %433 = arith.addf %432, %431 : vector<8x128xf32>
    %434 = arith.divf %432, %433 : vector<8x128xf32>
    %435 = vector.extract_strided_slice %417 {offsets = [0, 128], sizes = [8, 128], strides = [1, 1]} : vector<8x384xf32> to vector<8x128xf32>
    %436 = vector.extract_strided_slice %423 {offsets = [0, 128], sizes = [8, 128], strides = [1, 1]} : vector<8x384xf32> to vector<8x128xf32>
    %437 = arith.addf %435, %436 : vector<8x128xf32>
    %438 = arith.negf %437 : vector<8x128xf32>
    %439 = math.exp %438 : vector<8x128xf32>
    %cst_102 = arith.constant 1.000000e+00 : f32
    %440 = vector.broadcast %cst_102 : f32 to vector<8x128xf32>
    %441 = arith.addf %440, %439 : vector<8x128xf32>
    %442 = arith.divf %440, %441 : vector<8x128xf32>
    %443 = vector.extract_strided_slice %417 {offsets = [0, 256], sizes = [8, 128], strides = [1, 1]} : vector<8x384xf32> to vector<8x128xf32>
    %444 = vector.extract_strided_slice %423 {offsets = [0, 256], sizes = [8, 128], strides = [1, 1]} : vector<8x384xf32> to vector<8x128xf32>
    %445 = vector.broadcast %8 : vector<1x128xf32> to vector<8x128xf32>
    %446 = arith.addf %444, %445 : vector<8x128xf32>
    %447 = arith.mulf %434, %446 : vector<8x128xf32>
    %448 = arith.addf %443, %447 : vector<8x128xf32>
    %449 = math.tanh %448 : vector<8x128xf32>
    %cst_103 = arith.constant 1.000000e+00 : f32
    %450 = vector.broadcast %cst_103 : f32 to vector<8x128xf32>
    %451 = arith.subf %450, %442 : vector<8x128xf32>
    %452 = arith.mulf %451, %449 : vector<8x128xf32>
    %453 = arith.mulf %442, %360 : vector<8x128xf32>
    %454 = arith.addf %452, %453 : vector<8x128xf32>
    %455 = vector.broadcast %426 : i32 to vector<8x1xi32>
    %456 = arith.cmpi slt, %455, %11 : vector<8x1xi32>
    %457 = vector.shape_cast %456 : vector<8x1xi1> to vector<8x1xi1>
    %458 = vector.broadcast %457 : vector<8x1xi1> to vector<8x128xi1>
    %459 = arith.select %458, %454, %360 : vector<8x128xi1>, vector<8x128xf32>
    %cst_104 = arith.constant 0.000000e+00 : f32
    %460 = vector.shape_cast %456 : vector<8x1xi1> to vector<8x1xi1>
    %461 = vector.broadcast %460 : vector<8x1xi1> to vector<8x128xi1>
    %462 = vector.broadcast %cst_104 : f32 to vector<8x128xf32>
    %463 = arith.select %461, %459, %462 : vector<8x128xi1>, vector<8x128xf32>
    %464 = arith.addi %14, %413 : i32
    %465 = vector.extract_strided_slice %421 {offsets = [0, 0], sizes = [8, 128], strides = [1, 1]} : vector<8x384xf32> to vector<8x128xf32>
    %466 = vector.extract_strided_slice %425 {offsets = [0, 0], sizes = [8, 128], strides = [1, 1]} : vector<8x384xf32> to vector<8x128xf32>
    %467 = arith.addf %465, %466 : vector<8x128xf32>
    %468 = arith.negf %467 : vector<8x128xf32>
    %469 = math.exp %468 : vector<8x128xf32>
    %cst_105 = arith.constant 1.000000e+00 : f32
    %470 = vector.broadcast %cst_105 : f32 to vector<8x128xf32>
    %471 = arith.addf %470, %469 : vector<8x128xf32>
    %472 = arith.divf %470, %471 : vector<8x128xf32>
    %473 = vector.extract_strided_slice %421 {offsets = [0, 128], sizes = [8, 128], strides = [1, 1]} : vector<8x384xf32> to vector<8x128xf32>
    %474 = vector.extract_strided_slice %425 {offsets = [0, 128], sizes = [8, 128], strides = [1, 1]} : vector<8x384xf32> to vector<8x128xf32>
    %475 = arith.addf %473, %474 : vector<8x128xf32>
    %476 = arith.negf %475 : vector<8x128xf32>
    %477 = math.exp %476 : vector<8x128xf32>
    %cst_106 = arith.constant 1.000000e+00 : f32
    %478 = vector.broadcast %cst_106 : f32 to vector<8x128xf32>
    %479 = arith.addf %478, %477 : vector<8x128xf32>
    %480 = arith.divf %478, %479 : vector<8x128xf32>
    %481 = vector.extract_strided_slice %421 {offsets = [0, 256], sizes = [8, 128], strides = [1, 1]} : vector<8x384xf32> to vector<8x128xf32>
    %482 = vector.extract_strided_slice %425 {offsets = [0, 256], sizes = [8, 128], strides = [1, 1]} : vector<8x384xf32> to vector<8x128xf32>
    %483 = vector.broadcast %10 : vector<1x128xf32> to vector<8x128xf32>
    %484 = arith.addf %482, %483 : vector<8x128xf32>
    %485 = arith.mulf %472, %484 : vector<8x128xf32>
    %486 = arith.addf %481, %485 : vector<8x128xf32>
    %487 = math.tanh %486 : vector<8x128xf32>
    %cst_107 = arith.constant 1.000000e+00 : f32
    %488 = vector.broadcast %cst_107 : f32 to vector<8x128xf32>
    %489 = arith.subf %488, %480 : vector<8x128xf32>
    %490 = arith.mulf %489, %487 : vector<8x128xf32>
    %491 = arith.mulf %480, %398 : vector<8x128xf32>
    %492 = arith.addf %490, %491 : vector<8x128xf32>
    %493 = vector.broadcast %464 : i32 to vector<8x1xi32>
    %494 = arith.cmpi slt, %493, %11 : vector<8x1xi32>
    %495 = vector.shape_cast %494 : vector<8x1xi1> to vector<8x1xi1>
    %496 = vector.broadcast %495 : vector<8x1xi1> to vector<8x128xi1>
    %497 = arith.select %496, %492, %398 : vector<8x128xi1>, vector<8x128xf32>
    %cst_108 = arith.constant 0.000000e+00 : f32
    %498 = vector.shape_cast %494 : vector<8x1xi1> to vector<8x1xi1>
    %499 = vector.broadcast %498 : vector<8x1xi1> to vector<8x128xi1>
    %500 = vector.broadcast %cst_108 : f32 to vector<8x128xf32>
    %501 = arith.select %499, %497, %500 : vector<8x128xi1>, vector<8x128xf32>
    %502 = arith.truncf %463 : vector<8x128xf32> to vector<8x128xbf16>
    %503 = arith.index_cast %c4_i32 : i32 to index
    %c0_109 = arith.constant 0 : index
    %c0_110 = arith.constant 0 : index
    %504 = vector.load %arg6[%503, %c0_109, %c0_110] : memref<8x8x128xbf16, #tpu.memory_space<vmem>>, vector<1x8x128xbf16>
    %505 = vector.shape_cast %504 : vector<1x8x128xbf16> to vector<8x128xbf16>
    %506 = vector.shape_cast %502 : vector<8x128xbf16> to vector<1x8x128xbf16>
    tpu.vector_store %arg6[%503, %c0_109, %c0_110], %506 {strides = array<i32>} : memref<8x8x128xbf16, #tpu.memory_space<vmem>>, vector<1x8x128xbf16>,
    %507 = arith.truncf %501 : vector<8x128xf32> to vector<8x128xbf16>
    %508 = arith.index_cast %413 : i32 to index
    %c0_111 = arith.constant 0 : index
    %c0_112 = arith.constant 0 : index
    %509 = vector.load %arg7[%508, %c0_111, %c0_112] : memref<8x8x128xbf16, #tpu.memory_space<vmem>>, vector<1x8x128xbf16>
    %510 = vector.shape_cast %509 : vector<1x8x128xbf16> to vector<8x128xbf16>
    %511 = vector.shape_cast %507 : vector<8x128xbf16> to vector<1x8x128xbf16>
    tpu.vector_store %arg7[%508, %c0_111, %c0_112], %511 {strides = array<i32>} : memref<8x8x128xbf16, #tpu.memory_space<vmem>>, vector<1x8x128xbf16>,
    %c5_i32 = arith.constant 5 : i32
    %c7_i32_113 = arith.constant 7 : i32
    %512 = arith.subi %c7_i32_113, %c5_i32 : i32
    %513 = arith.index_cast %c5_i32 : i32 to index
    %c0_114 = arith.constant 0 : index
    %c0_115 = arith.constant 0 : index
    %514 = vector.load %arg2[%513, %c0_114, %c0_115] : memref<8x8x384xbf16, #tpu.memory_space<vmem>>, vector<1x8x384xbf16>
    %515 = vector.shape_cast %514 : vector<1x8x384xbf16> to vector<8x384xbf16>
    %516 = arith.extf %515 : vector<8x384xbf16> to vector<8x384xf32>
    %517 = arith.index_cast %512 : i32 to index
    %c0_116 = arith.constant 0 : index
    %c0_117 = arith.constant 0 : index
    %518 = vector.load %arg3[%517, %c0_116, %c0_117] : memref<8x8x384xbf16, #tpu.memory_space<vmem>>, vector<1x8x384xbf16>
    %519 = vector.shape_cast %518 : vector<1x8x384xbf16> to vector<8x384xbf16>
    %520 = arith.extf %519 : vector<8x384xbf16> to vector<8x384xf32>
    %521 = arith.truncf %459 : vector<8x128xf32> to vector<8x128xbf16>
    %cst_118 = arith.constant dense<0.000000e+00> : vector<8x384xf32>
    %522 = tpu.matmul %521, %4, %cst_118 {dimension_numbers = #tpu.dot_dimension_numbers<[1], [0], [0], [1], [0, 0, 1, 1], [], []>} : vector<8x128xbf16>, vector<128x384xbf16>, vector<8x384xf32> -> vector<8x384xf32>
    %523 = arith.truncf %497 : vector<8x128xf32> to vector<8x128xbf16>
    %cst_119 = arith.constant dense<0.000000e+00> : vector<8x384xf32>
    %524 = tpu.matmul %523, %6, %cst_119 {dimension_numbers = #tpu.dot_dimension_numbers<[1], [0], [0], [1], [0, 0, 1, 1], [], []>} : vector<8x128xbf16>, vector<128x384xbf16>, vector<8x384xf32> -> vector<8x384xf32>
    %525 = arith.addi %12, %c5_i32 : i32
    %526 = vector.extract_strided_slice %516 {offsets = [0, 0], sizes = [8, 128], strides = [1, 1]} : vector<8x384xf32> to vector<8x128xf32>
    %527 = vector.extract_strided_slice %522 {offsets = [0, 0], sizes = [8, 128], strides = [1, 1]} : vector<8x384xf32> to vector<8x128xf32>
    %528 = arith.addf %526, %527 : vector<8x128xf32>
    %529 = arith.negf %528 : vector<8x128xf32>
    %530 = math.exp %529 : vector<8x128xf32>
    %cst_120 = arith.constant 1.000000e+00 : f32
    %531 = vector.broadcast %cst_120 : f32 to vector<8x128xf32>
    %532 = arith.addf %531, %530 : vector<8x128xf32>
    %533 = arith.divf %531, %532 : vector<8x128xf32>
    %534 = vector.extract_strided_slice %516 {offsets = [0, 128], sizes = [8, 128], strides = [1, 1]} : vector<8x384xf32> to vector<8x128xf32>
    %535 = vector.extract_strided_slice %522 {offsets = [0, 128], sizes = [8, 128], strides = [1, 1]} : vector<8x384xf32> to vector<8x128xf32>
    %536 = arith.addf %534, %535 : vector<8x128xf32>
    %537 = arith.negf %536 : vector<8x128xf32>
    %538 = math.exp %537 : vector<8x128xf32>
    %cst_121 = arith.constant 1.000000e+00 : f32
    %539 = vector.broadcast %cst_121 : f32 to vector<8x128xf32>
    %540 = arith.addf %539, %538 : vector<8x128xf32>
    %541 = arith.divf %539, %540 : vector<8x128xf32>
    %542 = vector.extract_strided_slice %516 {offsets = [0, 256], sizes = [8, 128], strides = [1, 1]} : vector<8x384xf32> to vector<8x128xf32>
    %543 = vector.extract_strided_slice %522 {offsets = [0, 256], sizes = [8, 128], strides = [1, 1]} : vector<8x384xf32> to vector<8x128xf32>
    %544 = vector.broadcast %8 : vector<1x128xf32> to vector<8x128xf32>
    %545 = arith.addf %543, %544 : vector<8x128xf32>
    %546 = arith.mulf %533, %545 : vector<8x128xf32>
    %547 = arith.addf %542, %546 : vector<8x128xf32>
    %548 = math.tanh %547 : vector<8x128xf32>
    %cst_122 = arith.constant 1.000000e+00 : f32
    %549 = vector.broadcast %cst_122 : f32 to vector<8x128xf32>
    %550 = arith.subf %549, %541 : vector<8x128xf32>
    %551 = arith.mulf %550, %548 : vector<8x128xf32>
    %552 = arith.mulf %541, %459 : vector<8x128xf32>
    %553 = arith.addf %551, %552 : vector<8x128xf32>
    %554 = vector.broadcast %525 : i32 to vector<8x1xi32>
    %555 = arith.cmpi slt, %554, %11 : vector<8x1xi32>
    %556 = vector.shape_cast %555 : vector<8x1xi1> to vector<8x1xi1>
    %557 = vector.broadcast %556 : vector<8x1xi1> to vector<8x128xi1>
    %558 = arith.select %557, %553, %459 : vector<8x128xi1>, vector<8x128xf32>
    %cst_123 = arith.constant 0.000000e+00 : f32
    %559 = vector.shape_cast %555 : vector<8x1xi1> to vector<8x1xi1>
    %560 = vector.broadcast %559 : vector<8x1xi1> to vector<8x128xi1>
    %561 = vector.broadcast %cst_123 : f32 to vector<8x128xf32>
    %562 = arith.select %560, %558, %561 : vector<8x128xi1>, vector<8x128xf32>
    %563 = arith.addi %14, %512 : i32
    %564 = vector.extract_strided_slice %520 {offsets = [0, 0], sizes = [8, 128], strides = [1, 1]} : vector<8x384xf32> to vector<8x128xf32>
    %565 = vector.extract_strided_slice %524 {offsets = [0, 0], sizes = [8, 128], strides = [1, 1]} : vector<8x384xf32> to vector<8x128xf32>
    %566 = arith.addf %564, %565 : vector<8x128xf32>
    %567 = arith.negf %566 : vector<8x128xf32>
    %568 = math.exp %567 : vector<8x128xf32>
    %cst_124 = arith.constant 1.000000e+00 : f32
    %569 = vector.broadcast %cst_124 : f32 to vector<8x128xf32>
    %570 = arith.addf %569, %568 : vector<8x128xf32>
    %571 = arith.divf %569, %570 : vector<8x128xf32>
    %572 = vector.extract_strided_slice %520 {offsets = [0, 128], sizes = [8, 128], strides = [1, 1]} : vector<8x384xf32> to vector<8x128xf32>
    %573 = vector.extract_strided_slice %524 {offsets = [0, 128], sizes = [8, 128], strides = [1, 1]} : vector<8x384xf32> to vector<8x128xf32>
    %574 = arith.addf %572, %573 : vector<8x128xf32>
    %575 = arith.negf %574 : vector<8x128xf32>
    %576 = math.exp %575 : vector<8x128xf32>
    %cst_125 = arith.constant 1.000000e+00 : f32
    %577 = vector.broadcast %cst_125 : f32 to vector<8x128xf32>
    %578 = arith.addf %577, %576 : vector<8x128xf32>
    %579 = arith.divf %577, %578 : vector<8x128xf32>
    %580 = vector.extract_strided_slice %520 {offsets = [0, 256], sizes = [8, 128], strides = [1, 1]} : vector<8x384xf32> to vector<8x128xf32>
    %581 = vector.extract_strided_slice %524 {offsets = [0, 256], sizes = [8, 128], strides = [1, 1]} : vector<8x384xf32> to vector<8x128xf32>
    %582 = vector.broadcast %10 : vector<1x128xf32> to vector<8x128xf32>
    %583 = arith.addf %581, %582 : vector<8x128xf32>
    %584 = arith.mulf %571, %583 : vector<8x128xf32>
    %585 = arith.addf %580, %584 : vector<8x128xf32>
    %586 = math.tanh %585 : vector<8x128xf32>
    %cst_126 = arith.constant 1.000000e+00 : f32
    %587 = vector.broadcast %cst_126 : f32 to vector<8x128xf32>
    %588 = arith.subf %587, %579 : vector<8x128xf32>
    %589 = arith.mulf %588, %586 : vector<8x128xf32>
    %590 = arith.mulf %579, %497 : vector<8x128xf32>
    %591 = arith.addf %589, %590 : vector<8x128xf32>
    %592 = vector.broadcast %563 : i32 to vector<8x1xi32>
    %593 = arith.cmpi slt, %592, %11 : vector<8x1xi32>
    %594 = vector.shape_cast %593 : vector<8x1xi1> to vector<8x1xi1>
    %595 = vector.broadcast %594 : vector<8x1xi1> to vector<8x128xi1>
    %596 = arith.select %595, %591, %497 : vector<8x128xi1>, vector<8x128xf32>
    %cst_127 = arith.constant 0.000000e+00 : f32
    %597 = vector.shape_cast %593 : vector<8x1xi1> to vector<8x1xi1>
    %598 = vector.broadcast %597 : vector<8x1xi1> to vector<8x128xi1>
    %599 = vector.broadcast %cst_127 : f32 to vector<8x128xf32>
    %600 = arith.select %598, %596, %599 : vector<8x128xi1>, vector<8x128xf32>
    %601 = arith.truncf %562 : vector<8x128xf32> to vector<8x128xbf16>
    %602 = arith.index_cast %c5_i32 : i32 to index
    %c0_128 = arith.constant 0 : index
    %c0_129 = arith.constant 0 : index
    %603 = vector.load %arg6[%602, %c0_128, %c0_129] : memref<8x8x128xbf16, #tpu.memory_space<vmem>>, vector<1x8x128xbf16>
    %604 = vector.shape_cast %603 : vector<1x8x128xbf16> to vector<8x128xbf16>
    %605 = vector.shape_cast %601 : vector<8x128xbf16> to vector<1x8x128xbf16>
    tpu.vector_store %arg6[%602, %c0_128, %c0_129], %605 {strides = array<i32>} : memref<8x8x128xbf16, #tpu.memory_space<vmem>>, vector<1x8x128xbf16>,
    %606 = arith.truncf %600 : vector<8x128xf32> to vector<8x128xbf16>
    %607 = arith.index_cast %512 : i32 to index
    %c0_130 = arith.constant 0 : index
    %c0_131 = arith.constant 0 : index
    %608 = vector.load %arg7[%607, %c0_130, %c0_131] : memref<8x8x128xbf16, #tpu.memory_space<vmem>>, vector<1x8x128xbf16>
    %609 = vector.shape_cast %608 : vector<1x8x128xbf16> to vector<8x128xbf16>
    %610 = vector.shape_cast %606 : vector<8x128xbf16> to vector<1x8x128xbf16>
    tpu.vector_store %arg7[%607, %c0_130, %c0_131], %610 {strides = array<i32>} : memref<8x8x128xbf16, #tpu.memory_space<vmem>>, vector<1x8x128xbf16>,
    %c6_i32 = arith.constant 6 : i32
    %c7_i32_132 = arith.constant 7 : i32
    %611 = arith.subi %c7_i32_132, %c6_i32 : i32
    %612 = arith.index_cast %c6_i32 : i32 to index
    %c0_133 = arith.constant 0 : index
    %c0_134 = arith.constant 0 : index
    %613 = vector.load %arg2[%612, %c0_133, %c0_134] : memref<8x8x384xbf16, #tpu.memory_space<vmem>>, vector<1x8x384xbf16>
    %614 = vector.shape_cast %613 : vector<1x8x384xbf16> to vector<8x384xbf16>
    %615 = arith.extf %614 : vector<8x384xbf16> to vector<8x384xf32>
    %616 = arith.index_cast %611 : i32 to index
    %c0_135 = arith.constant 0 : index
    %c0_136 = arith.constant 0 : index
    %617 = vector.load %arg3[%616, %c0_135, %c0_136] : memref<8x8x384xbf16, #tpu.memory_space<vmem>>, vector<1x8x384xbf16>
    %618 = vector.shape_cast %617 : vector<1x8x384xbf16> to vector<8x384xbf16>
    %619 = arith.extf %618 : vector<8x384xbf16> to vector<8x384xf32>
    %620 = arith.truncf %558 : vector<8x128xf32> to vector<8x128xbf16>
    %cst_137 = arith.constant dense<0.000000e+00> : vector<8x384xf32>
    %621 = tpu.matmul %620, %4, %cst_137 {dimension_numbers = #tpu.dot_dimension_numbers<[1], [0], [0], [1], [0, 0, 1, 1], [], []>} : vector<8x128xbf16>, vector<128x384xbf16>, vector<8x384xf32> -> vector<8x384xf32>
    %622 = arith.truncf %596 : vector<8x128xf32> to vector<8x128xbf16>
    %cst_138 = arith.constant dense<0.000000e+00> : vector<8x384xf32>
    %623 = tpu.matmul %622, %6, %cst_138 {dimension_numbers = #tpu.dot_dimension_numbers<[1], [0], [0], [1], [0, 0, 1, 1], [], []>} : vector<8x128xbf16>, vector<128x384xbf16>, vector<8x384xf32> -> vector<8x384xf32>
    %624 = arith.addi %12, %c6_i32 : i32
    %625 = vector.extract_strided_slice %615 {offsets = [0, 0], sizes = [8, 128], strides = [1, 1]} : vector<8x384xf32> to vector<8x128xf32>
    %626 = vector.extract_strided_slice %621 {offsets = [0, 0], sizes = [8, 128], strides = [1, 1]} : vector<8x384xf32> to vector<8x128xf32>
    %627 = arith.addf %625, %626 : vector<8x128xf32>
    %628 = arith.negf %627 : vector<8x128xf32>
    %629 = math.exp %628 : vector<8x128xf32>
    %cst_139 = arith.constant 1.000000e+00 : f32
    %630 = vector.broadcast %cst_139 : f32 to vector<8x128xf32>
    %631 = arith.addf %630, %629 : vector<8x128xf32>
    %632 = arith.divf %630, %631 : vector<8x128xf32>
    %633 = vector.extract_strided_slice %615 {offsets = [0, 128], sizes = [8, 128], strides = [1, 1]} : vector<8x384xf32> to vector<8x128xf32>
    %634 = vector.extract_strided_slice %621 {offsets = [0, 128], sizes = [8, 128], strides = [1, 1]} : vector<8x384xf32> to vector<8x128xf32>
    %635 = arith.addf %633, %634 : vector<8x128xf32>
    %636 = arith.negf %635 : vector<8x128xf32>
    %637 = math.exp %636 : vector<8x128xf32>
    %cst_140 = arith.constant 1.000000e+00 : f32
    %638 = vector.broadcast %cst_140 : f32 to vector<8x128xf32>
    %639 = arith.addf %638, %637 : vector<8x128xf32>
    %640 = arith.divf %638, %639 : vector<8x128xf32>
    %641 = vector.extract_strided_slice %615 {offsets = [0, 256], sizes = [8, 128], strides = [1, 1]} : vector<8x384xf32> to vector<8x128xf32>
    %642 = vector.extract_strided_slice %621 {offsets = [0, 256], sizes = [8, 128], strides = [1, 1]} : vector<8x384xf32> to vector<8x128xf32>
    %643 = vector.broadcast %8 : vector<1x128xf32> to vector<8x128xf32>
    %644 = arith.addf %642, %643 : vector<8x128xf32>
    %645 = arith.mulf %632, %644 : vector<8x128xf32>
    %646 = arith.addf %641, %645 : vector<8x128xf32>
    %647 = math.tanh %646 : vector<8x128xf32>
    %cst_141 = arith.constant 1.000000e+00 : f32
    %648 = vector.broadcast %cst_141 : f32 to vector<8x128xf32>
    %649 = arith.subf %648, %640 : vector<8x128xf32>
    %650 = arith.mulf %649, %647 : vector<8x128xf32>
    %651 = arith.mulf %640, %558 : vector<8x128xf32>
    %652 = arith.addf %650, %651 : vector<8x128xf32>
    %653 = vector.broadcast %624 : i32 to vector<8x1xi32>
    %654 = arith.cmpi slt, %653, %11 : vector<8x1xi32>
    %655 = vector.shape_cast %654 : vector<8x1xi1> to vector<8x1xi1>
    %656 = vector.broadcast %655 : vector<8x1xi1> to vector<8x128xi1>
    %657 = arith.select %656, %652, %558 : vector<8x128xi1>, vector<8x128xf32>
    %cst_142 = arith.constant 0.000000e+00 : f32
    %658 = vector.shape_cast %654 : vector<8x1xi1> to vector<8x1xi1>
    %659 = vector.broadcast %658 : vector<8x1xi1> to vector<8x128xi1>
    %660 = vector.broadcast %cst_142 : f32 to vector<8x128xf32>
    %661 = arith.select %659, %657, %660 : vector<8x128xi1>, vector<8x128xf32>
    %662 = arith.addi %14, %611 : i32
    %663 = vector.extract_strided_slice %619 {offsets = [0, 0], sizes = [8, 128], strides = [1, 1]} : vector<8x384xf32> to vector<8x128xf32>
    %664 = vector.extract_strided_slice %623 {offsets = [0, 0], sizes = [8, 128], strides = [1, 1]} : vector<8x384xf32> to vector<8x128xf32>
    %665 = arith.addf %663, %664 : vector<8x128xf32>
    %666 = arith.negf %665 : vector<8x128xf32>
    %667 = math.exp %666 : vector<8x128xf32>
    %cst_143 = arith.constant 1.000000e+00 : f32
    %668 = vector.broadcast %cst_143 : f32 to vector<8x128xf32>
    %669 = arith.addf %668, %667 : vector<8x128xf32>
    %670 = arith.divf %668, %669 : vector<8x128xf32>
    %671 = vector.extract_strided_slice %619 {offsets = [0, 128], sizes = [8, 128], strides = [1, 1]} : vector<8x384xf32> to vector<8x128xf32>
    %672 = vector.extract_strided_slice %623 {offsets = [0, 128], sizes = [8, 128], strides = [1, 1]} : vector<8x384xf32> to vector<8x128xf32>
    %673 = arith.addf %671, %672 : vector<8x128xf32>
    %674 = arith.negf %673 : vector<8x128xf32>
    %675 = math.exp %674 : vector<8x128xf32>
    %cst_144 = arith.constant 1.000000e+00 : f32
    %676 = vector.broadcast %cst_144 : f32 to vector<8x128xf32>
    %677 = arith.addf %676, %675 : vector<8x128xf32>
    %678 = arith.divf %676, %677 : vector<8x128xf32>
    %679 = vector.extract_strided_slice %619 {offsets = [0, 256], sizes = [8, 128], strides = [1, 1]} : vector<8x384xf32> to vector<8x128xf32>
    %680 = vector.extract_strided_slice %623 {offsets = [0, 256], sizes = [8, 128], strides = [1, 1]} : vector<8x384xf32> to vector<8x128xf32>
    %681 = vector.broadcast %10 : vector<1x128xf32> to vector<8x128xf32>
    %682 = arith.addf %680, %681 : vector<8x128xf32>
    %683 = arith.mulf %670, %682 : vector<8x128xf32>
    %684 = arith.addf %679, %683 : vector<8x128xf32>
    %685 = math.tanh %684 : vector<8x128xf32>
    %cst_145 = arith.constant 1.000000e+00 : f32
    %686 = vector.broadcast %cst_145 : f32 to vector<8x128xf32>
    %687 = arith.subf %686, %678 : vector<8x128xf32>
    %688 = arith.mulf %687, %685 : vector<8x128xf32>
    %689 = arith.mulf %678, %596 : vector<8x128xf32>
    %690 = arith.addf %688, %689 : vector<8x128xf32>
    %691 = vector.broadcast %662 : i32 to vector<8x1xi32>
    %692 = arith.cmpi slt, %691, %11 : vector<8x1xi32>
    %693 = vector.shape_cast %692 : vector<8x1xi1> to vector<8x1xi1>
    %694 = vector.broadcast %693 : vector<8x1xi1> to vector<8x128xi1>
    %695 = arith.select %694, %690, %596 : vector<8x128xi1>, vector<8x128xf32>
    %cst_146 = arith.constant 0.000000e+00 : f32
    %696 = vector.shape_cast %692 : vector<8x1xi1> to vector<8x1xi1>
    %697 = vector.broadcast %696 : vector<8x1xi1> to vector<8x128xi1>
    %698 = vector.broadcast %cst_146 : f32 to vector<8x128xf32>
    %699 = arith.select %697, %695, %698 : vector<8x128xi1>, vector<8x128xf32>
    %700 = arith.truncf %661 : vector<8x128xf32> to vector<8x128xbf16>
    %701 = arith.index_cast %c6_i32 : i32 to index
    %c0_147 = arith.constant 0 : index
    %c0_148 = arith.constant 0 : index
    %702 = vector.load %arg6[%701, %c0_147, %c0_148] : memref<8x8x128xbf16, #tpu.memory_space<vmem>>, vector<1x8x128xbf16>
    %703 = vector.shape_cast %702 : vector<1x8x128xbf16> to vector<8x128xbf16>
    %704 = vector.shape_cast %700 : vector<8x128xbf16> to vector<1x8x128xbf16>
    tpu.vector_store %arg6[%701, %c0_147, %c0_148], %704 {strides = array<i32>} : memref<8x8x128xbf16, #tpu.memory_space<vmem>>, vector<1x8x128xbf16>,
    %705 = arith.truncf %699 : vector<8x128xf32> to vector<8x128xbf16>
    %706 = arith.index_cast %611 : i32 to index
    %c0_149 = arith.constant 0 : index
    %c0_150 = arith.constant 0 : index
    %707 = vector.load %arg7[%706, %c0_149, %c0_150] : memref<8x8x128xbf16, #tpu.memory_space<vmem>>, vector<1x8x128xbf16>
    %708 = vector.shape_cast %707 : vector<1x8x128xbf16> to vector<8x128xbf16>
    %709 = vector.shape_cast %705 : vector<8x128xbf16> to vector<1x8x128xbf16>
    tpu.vector_store %arg7[%706, %c0_149, %c0_150], %709 {strides = array<i32>} : memref<8x8x128xbf16, #tpu.memory_space<vmem>>, vector<1x8x128xbf16>,
    %c7_i32_151 = arith.constant 7 : i32
    %c7_i32_152 = arith.constant 7 : i32
    %710 = arith.subi %c7_i32_152, %c7_i32_151 : i32
    %711 = arith.index_cast %c7_i32_151 : i32 to index
    %c0_153 = arith.constant 0 : index
    %c0_154 = arith.constant 0 : index
    %712 = vector.load %arg2[%711, %c0_153, %c0_154] : memref<8x8x384xbf16, #tpu.memory_space<vmem>>, vector<1x8x384xbf16>
    %713 = vector.shape_cast %712 : vector<1x8x384xbf16> to vector<8x384xbf16>
    %714 = arith.extf %713 : vector<8x384xbf16> to vector<8x384xf32>
    %715 = arith.index_cast %710 : i32 to index
    %c0_155 = arith.constant 0 : index
    %c0_156 = arith.constant 0 : index
    %716 = vector.load %arg3[%715, %c0_155, %c0_156] : memref<8x8x384xbf16, #tpu.memory_space<vmem>>, vector<1x8x384xbf16>
    %717 = vector.shape_cast %716 : vector<1x8x384xbf16> to vector<8x384xbf16>
    %718 = arith.extf %717 : vector<8x384xbf16> to vector<8x384xf32>
    %719 = arith.truncf %657 : vector<8x128xf32> to vector<8x128xbf16>
    %cst_157 = arith.constant dense<0.000000e+00> : vector<8x384xf32>
    %720 = tpu.matmul %719, %4, %cst_157 {dimension_numbers = #tpu.dot_dimension_numbers<[1], [0], [0], [1], [0, 0, 1, 1], [], []>} : vector<8x128xbf16>, vector<128x384xbf16>, vector<8x384xf32> -> vector<8x384xf32>
    %721 = arith.truncf %695 : vector<8x128xf32> to vector<8x128xbf16>
    %cst_158 = arith.constant dense<0.000000e+00> : vector<8x384xf32>
    %722 = tpu.matmul %721, %6, %cst_158 {dimension_numbers = #tpu.dot_dimension_numbers<[1], [0], [0], [1], [0, 0, 1, 1], [], []>} : vector<8x128xbf16>, vector<128x384xbf16>, vector<8x384xf32> -> vector<8x384xf32>
    %723 = arith.addi %12, %c7_i32_151 : i32
    %724 = vector.extract_strided_slice %714 {offsets = [0, 0], sizes = [8, 128], strides = [1, 1]} : vector<8x384xf32> to vector<8x128xf32>
    %725 = vector.extract_strided_slice %720 {offsets = [0, 0], sizes = [8, 128], strides = [1, 1]} : vector<8x384xf32> to vector<8x128xf32>
    %726 = arith.addf %724, %725 : vector<8x128xf32>
    %727 = arith.negf %726 : vector<8x128xf32>
    %728 = math.exp %727 : vector<8x128xf32>
    %cst_159 = arith.constant 1.000000e+00 : f32
    %729 = vector.broadcast %cst_159 : f32 to vector<8x128xf32>
    %730 = arith.addf %729, %728 : vector<8x128xf32>
    %731 = arith.divf %729, %730 : vector<8x128xf32>
    %732 = vector.extract_strided_slice %714 {offsets = [0, 128], sizes = [8, 128], strides = [1, 1]} : vector<8x384xf32> to vector<8x128xf32>
    %733 = vector.extract_strided_slice %720 {offsets = [0, 128], sizes = [8, 128], strides = [1, 1]} : vector<8x384xf32> to vector<8x128xf32>
    %734 = arith.addf %732, %733 : vector<8x128xf32>
    %735 = arith.negf %734 : vector<8x128xf32>
    %736 = math.exp %735 : vector<8x128xf32>
    %cst_160 = arith.constant 1.000000e+00 : f32
    %737 = vector.broadcast %cst_160 : f32 to vector<8x128xf32>
    %738 = arith.addf %737, %736 : vector<8x128xf32>
    %739 = arith.divf %737, %738 : vector<8x128xf32>
    %740 = vector.extract_strided_slice %714 {offsets = [0, 256], sizes = [8, 128], strides = [1, 1]} : vector<8x384xf32> to vector<8x128xf32>
    %741 = vector.extract_strided_slice %720 {offsets = [0, 256], sizes = [8, 128], strides = [1, 1]} : vector<8x384xf32> to vector<8x128xf32>
    %742 = vector.broadcast %8 : vector<1x128xf32> to vector<8x128xf32>
    %743 = arith.addf %741, %742 : vector<8x128xf32>
    %744 = arith.mulf %731, %743 : vector<8x128xf32>
    %745 = arith.addf %740, %744 : vector<8x128xf32>
    %746 = math.tanh %745 : vector<8x128xf32>
    %cst_161 = arith.constant 1.000000e+00 : f32
    %747 = vector.broadcast %cst_161 : f32 to vector<8x128xf32>
    %748 = arith.subf %747, %739 : vector<8x128xf32>
    %749 = arith.mulf %748, %746 : vector<8x128xf32>
    %750 = arith.mulf %739, %657 : vector<8x128xf32>
    %751 = arith.addf %749, %750 : vector<8x128xf32>
    %752 = vector.broadcast %723 : i32 to vector<8x1xi32>
    %753 = arith.cmpi slt, %752, %11 : vector<8x1xi32>
    %754 = vector.shape_cast %753 : vector<8x1xi1> to vector<8x1xi1>
    %755 = vector.broadcast %754 : vector<8x1xi1> to vector<8x128xi1>
    %756 = arith.select %755, %751, %657 : vector<8x128xi1>, vector<8x128xf32>
    %cst_162 = arith.constant 0.000000e+00 : f32
    %757 = vector.shape_cast %753 : vector<8x1xi1> to vector<8x1xi1>
    %758 = vector.broadcast %757 : vector<8x1xi1> to vector<8x128xi1>
    %759 = vector.broadcast %cst_162 : f32 to vector<8x128xf32>
    %760 = arith.select %758, %756, %759 : vector<8x128xi1>, vector<8x128xf32>
    %761 = arith.addi %14, %710 : i32
    %762 = vector.extract_strided_slice %718 {offsets = [0, 0], sizes = [8, 128], strides = [1, 1]} : vector<8x384xf32> to vector<8x128xf32>
    %763 = vector.extract_strided_slice %722 {offsets = [0, 0], sizes = [8, 128], strides = [1, 1]} : vector<8x384xf32> to vector<8x128xf32>
    %764 = arith.addf %762, %763 : vector<8x128xf32>
    %765 = arith.negf %764 : vector<8x128xf32>
    %766 = math.exp %765 : vector<8x128xf32>
    %cst_163 = arith.constant 1.000000e+00 : f32
    %767 = vector.broadcast %cst_163 : f32 to vector<8x128xf32>
    %768 = arith.addf %767, %766 : vector<8x128xf32>
    %769 = arith.divf %767, %768 : vector<8x128xf32>
    %770 = vector.extract_strided_slice %718 {offsets = [0, 128], sizes = [8, 128], strides = [1, 1]} : vector<8x384xf32> to vector<8x128xf32>
    %771 = vector.extract_strided_slice %722 {offsets = [0, 128], sizes = [8, 128], strides = [1, 1]} : vector<8x384xf32> to vector<8x128xf32>
    %772 = arith.addf %770, %771 : vector<8x128xf32>
    %773 = arith.negf %772 : vector<8x128xf32>
    %774 = math.exp %773 : vector<8x128xf32>
    %cst_164 = arith.constant 1.000000e+00 : f32
    %775 = vector.broadcast %cst_164 : f32 to vector<8x128xf32>
    %776 = arith.addf %775, %774 : vector<8x128xf32>
    %777 = arith.divf %775, %776 : vector<8x128xf32>
    %778 = vector.extract_strided_slice %718 {offsets = [0, 256], sizes = [8, 128], strides = [1, 1]} : vector<8x384xf32> to vector<8x128xf32>
    %779 = vector.extract_strided_slice %722 {offsets = [0, 256], sizes = [8, 128], strides = [1, 1]} : vector<8x384xf32> to vector<8x128xf32>
    %780 = vector.broadcast %10 : vector<1x128xf32> to vector<8x128xf32>
    %781 = arith.addf %779, %780 : vector<8x128xf32>
    %782 = arith.mulf %769, %781 : vector<8x128xf32>
    %783 = arith.addf %778, %782 : vector<8x128xf32>
    %784 = math.tanh %783 : vector<8x128xf32>
    %cst_165 = arith.constant 1.000000e+00 : f32
    %785 = vector.broadcast %cst_165 : f32 to vector<8x128xf32>
    %786 = arith.subf %785, %777 : vector<8x128xf32>
    %787 = arith.mulf %786, %784 : vector<8x128xf32>
    %788 = arith.mulf %777, %695 : vector<8x128xf32>
    %789 = arith.addf %787, %788 : vector<8x128xf32>
    %790 = vector.broadcast %761 : i32 to vector<8x1xi32>
    %791 = arith.cmpi slt, %790, %11 : vector<8x1xi32>
    %792 = vector.shape_cast %791 : vector<8x1xi1> to vector<8x1xi1>
    %793 = vector.broadcast %792 : vector<8x1xi1> to vector<8x128xi1>
    %794 = arith.select %793, %789, %695 : vector<8x128xi1>, vector<8x128xf32>
    %cst_166 = arith.constant 0.000000e+00 : f32
    %795 = vector.shape_cast %791 : vector<8x1xi1> to vector<8x1xi1>
    %796 = vector.broadcast %795 : vector<8x1xi1> to vector<8x128xi1>
    %797 = vector.broadcast %cst_166 : f32 to vector<8x128xf32>
    %798 = arith.select %796, %794, %797 : vector<8x128xi1>, vector<8x128xf32>
    %799 = arith.truncf %760 : vector<8x128xf32> to vector<8x128xbf16>
    %800 = arith.index_cast %c7_i32_151 : i32 to index
    %c0_167 = arith.constant 0 : index
    %c0_168 = arith.constant 0 : index
    %801 = vector.load %arg6[%800, %c0_167, %c0_168] : memref<8x8x128xbf16, #tpu.memory_space<vmem>>, vector<1x8x128xbf16>
    %802 = vector.shape_cast %801 : vector<1x8x128xbf16> to vector<8x128xbf16>
    %803 = vector.shape_cast %799 : vector<8x128xbf16> to vector<1x8x128xbf16>
    tpu.vector_store %arg6[%800, %c0_167, %c0_168], %803 {strides = array<i32>} : memref<8x8x128xbf16, #tpu.memory_space<vmem>>, vector<1x8x128xbf16>,
    %804 = arith.truncf %798 : vector<8x128xf32> to vector<8x128xbf16>
    %805 = arith.index_cast %710 : i32 to index
    %c0_169 = arith.constant 0 : index
    %c0_170 = arith.constant 0 : index
    %806 = vector.load %arg7[%805, %c0_169, %c0_170] : memref<8x8x128xbf16, #tpu.memory_space<vmem>>, vector<1x8x128xbf16>
    %807 = vector.shape_cast %806 : vector<1x8x128xbf16> to vector<8x128xbf16>
    %808 = vector.shape_cast %804 : vector<8x128xbf16> to vector<1x8x128xbf16>
    tpu.vector_store %arg7[%805, %c0_169, %c0_170], %808 {strides = array<i32>} : memref<8x8x128xbf16, #tpu.memory_space<vmem>>, vector<1x8x128xbf16>,
    %c8_i32_171 = arith.constant 8 : i32
    %c0_172 = arith.constant 0 : index
    %c0_173 = arith.constant 0 : index
    %809 = vector.load %arg9[%c0_172, %c0_173] : memref<8x128xf32, #tpu.memory_space<vmem>>, vector<8x128xf32>
    tpu.vector_store %arg9[%c0_172, %c0_173], %756 {strides = array<i32>} : memref<8x128xf32, #tpu.memory_space<vmem>>, vector<8x128xf32>,
    %c0_174 = arith.constant 0 : index
    %c0_175 = arith.constant 0 : index
    %810 = vector.load %arg10[%c0_174, %c0_175] : memref<8x128xf32, #tpu.memory_space<vmem>>, vector<8x128xf32>
    tpu.vector_store %arg10[%c0_174, %c0_175], %794 {strides = array<i32>} : memref<8x128xf32, #tpu.memory_space<vmem>>, vector<8x128xf32>,
    %c0_i32_176 = arith.constant 0 : i32
    %811 = arith.cmpi eq, %arg0, %c0_i32_176 : i32
    %812 = arith.extui %811 : i1 to i32
    %c0_i32_177 = arith.constant 0 : i32
    %813 = arith.cmpi ne, %812, %c0_i32_177 : i32
    scf.if %813 {
      %c0_178 = arith.constant 0 : index
      %c0_179 = arith.constant 0 : index
      %c0_180 = arith.constant 0 : index
      %814 = vector.load %arg8[%c0_178, %c0_179, %c0_180] : memref<2x8x128xf32, #tpu.memory_space<vmem>>, vector<1x8x128xf32>
      %815 = vector.shape_cast %814 : vector<1x8x128xf32> to vector<8x128xf32>
      %816 = vector.shape_cast %756 : vector<8x128xf32> to vector<1x8x128xf32>
      tpu.vector_store %arg8[%c0_178, %c0_179, %c0_180], %816 {strides = array<i32>} : memref<2x8x128xf32, #tpu.memory_space<vmem>>, vector<1x8x128xf32>,
      %c1_181 = arith.constant 1 : index
      %c0_182 = arith.constant 0 : index
      %c0_183 = arith.constant 0 : index
      %817 = vector.load %arg8[%c1_181, %c0_182, %c0_183] : memref<2x8x128xf32, #tpu.memory_space<vmem>>, vector<1x8x128xf32>
      %818 = vector.shape_cast %817 : vector<1x8x128xf32> to vector<8x128xf32>
      %819 = vector.shape_cast %794 : vector<8x128xf32> to vector<1x8x128xf32>
      tpu.vector_store %arg8[%c1_181, %c0_182, %c0_183], %819 {strides = array<i32>} : memref<2x8x128xf32, #tpu.memory_space<vmem>>, vector<1x8x128xf32>,
    } else {
    }
    return
  }
  func.func @transform_0(%arg0: i32) -> (i32, i32) {
    %c0_i32 = arith.constant 0 : i32
    %c0_i32_0 = arith.constant 0 : i32
    %c0_i32_1 = arith.constant 0 : i32
    return %c0_i32, %c0_i32_0 : i32, i32
  }
  func.func @transform_1(%arg0: i32) -> (i32, i32, i32) {
    %c0_i32 = arith.constant 0 : i32
    %c0_i32_0 = arith.constant 0 : i32
    %c0_i32_1 = arith.constant 0 : i32
    return %arg0, %c0_i32, %c0_i32_0 : i32, i32, i32
  }
  func.func @transform_2(%arg0: i32) -> (i32, i32, i32) {
    %c0_i32 = arith.constant 0 : i32
    %0 = arith.subi %c0_i32, %arg0 : i32
    %c0_i32_0 = arith.constant 0 : i32
    %c1_i32 = arith.constant 1 : i32
    %c0_i32_1 = arith.constant 0 : i32
    return %0, %c0_i32_0, %c1_i32 : i32, i32, i32
  }
  func.func @transform_3(%arg0: i32) -> (i32, i32, i32) {
    %c0_i32 = arith.constant 0 : i32
    %c0_i32_0 = arith.constant 0 : i32
    %c0_i32_1 = arith.constant 0 : i32
    %c0_i32_2 = arith.constant 0 : i32
    return %c0_i32, %c0_i32_0, %c0_i32_1 : i32, i32, i32
  }
  func.func @transform_4(%arg0: i32) -> (i32, i32, i32) {
    %c0_i32 = arith.constant 0 : i32
    %c0_i32_0 = arith.constant 0 : i32
    %c0_i32_1 = arith.constant 0 : i32
    %c0_i32_2 = arith.constant 0 : i32
    return %c0_i32, %c0_i32_0, %c0_i32_1 : i32, i32, i32
  }
  func.func @transform_5(%arg0: i32) -> (i32, i32, i32) {
    %c0_i32 = arith.constant 0 : i32
    %c0_i32_0 = arith.constant 0 : i32
    %c0_i32_1 = arith.constant 0 : i32
    return %arg0, %c0_i32, %c0_i32_0 : i32, i32, i32
  }
  func.func @transform_6(%arg0: i32) -> (i32, i32, i32) {
    %c0_i32 = arith.constant 0 : i32
    %0 = arith.subi %c0_i32, %arg0 : i32
    %c0_i32_0 = arith.constant 0 : i32
    %c0_i32_1 = arith.constant 0 : i32
    %c0_i32_2 = arith.constant 0 : i32
    return %0, %c0_i32_0, %c0_i32_1 : i32, i32, i32
  }
  func.func @transform_7(%arg0: i32) -> (i32, i32, i32) {
    %c0_i32 = arith.constant 0 : i32
    %c0_i32_0 = arith.constant 0 : i32
    %c0_i32_1 = arith.constant 0 : i32
    %c0_i32_2 = arith.constant 0 : i32
    return %c0_i32, %c0_i32_0, %c0_i32_1 : i32, i32, i32
  }
}

</mosaic_0001>

<bundles_post_ra>
// kernel: tpu_custom_call.1
= control target key start
LH: loop header
LB: loop body
LE: loop exit
PB: predicated region body
PF: predicated region fallthrough
CT: control target
= control target key end

     0   :  { %13 = vsyncpa [#allocation5], 0  ;;  %s3662_s0 = inlined_call_operand.vmem [shape: s32[8,1], index: 0, kind: input, shape index: {}]   ;;  %s3663_s1 = inlined_call_operand.hbm [shape: bf16[8,8,768], index: 1, kind: input, shape index: {}]   ;;  %s3664_s2 = inlined_call_operand.hbm [shape: bf16[8,8,768], index: 2, kind: input, shape index: {}]   ;;  %s3665_s3 = inlined_call_operand.hbm [shape: bf16[2,128,384], index: 3, kind: input, shape index: {}]   ;;  %s3666_s4 = inlined_call_operand.vmem [shape: f32[2,1,128], index: 4, kind: input, shape index: {}]   ;;  %s3667_s5 = inlined_call_operand.hbm [shape: bf16[8,8,128], index: 5, kind: output, shape index: {0}]   ;;  %s3668_s6 = inlined_call_operand.hbm [shape: bf16[8,8,128], index: 6, kind: output, shape index: {1}]   ;;  %s3669_s7 = inlined_call_operand.hbm [shape: f32[2,8,128], index: 7, kind: output, shape index: {2}]  }
   0x1   :  { %14 = vsyncpa [#allocation8], 0 }
   0x2   :  { %15 = vsyncpa [#allocation6], 0 }
   0x3   :  { %16 = vsyncpa [#allocation12], 0  ;;  %s2200_s26 = scalar_lea.hbm %s3664_s2, 12  ;;  %s2846_s28 = smov [#allocation7]  }
   0x4   :  { %s42_s27 = sshll.u32 %s2200_s26, 4  ;;  %s44_s29 = sshll.u32 %s2846_s28, 4  ;;  %s43_s27 = int_to_ptr.hbm [resolvable:$true] %s42_s27  ;;  %s45_s29 = int_to_ptr.vmem [resolvable:$true] %s44_s29 }
   0x5   :  { %s23_s9 = sshll.u32 %s3663_s1, 4  ;;  %s2847_s10 = smov 384   ;;  %s24_s9 = int_to_ptr.hbm [resolvable:$true] %s23_s9 }
   0x6   :  { %s2848_s11 = smov 192   ;;  %s2849_s12 = smov 12  }
   0x7   :  { %50 = dma.hbm_to_vmem [thread:$0]  %s43_s27, 1536, %s45_s29, [#allocation8], %s2847_s10, %s2848_s11, %s2849_s12  }
   0x8   :  { %s2850_s13 = smov [#allocation4]   ;;  %s55_s2 = sshll.u32 %s3665_s3, 4  ;;  %s56_s2 = int_to_ptr.hbm [resolvable:$true] %s55_s2 }
   0x9   :  { %s25_s14 = sshll.u32 %s2850_s13, 4  ;;  %s2851_s17 = smov [#allocation9]   ;;  %s26_s14 = int_to_ptr.vmem [resolvable:$true] %s25_s14 }
   0xa   :  { %31 = dma.hbm_to_vmem [thread:$0]  %s24_s9, 1536, %s26_s14, [#allocation5], %s2847_s10, %s2848_s11, %s2849_s12  }
   0xb   :  { %s57_s18 = sshll.u32 %s2851_s17, 4  ;;  %s58_s18 = int_to_ptr.vmem [resolvable:$true] %s57_s18 }
   0xc   :  { %63 = dma.hbm_to_vmem [thread:$0]  %s56_s2, 6144, %s58_s18, [#allocation8], %s2848_s11, %s2848_s11, %s2849_s12  }
   0xd   :  { %2838 = dma.done.wait [#allocation5], 1536  }
   0xe   :  { %2839 = vsyncadd [#allocation5], 4294965760 }
   0xf   :  { %2840 = dma.done.wait [#allocation8], 7680  }
  0x10   :  { %2841 = vsyncadd [#allocation8], 4294959616  ;;  %v2290_v0 = vld [vmem:[#allocation9 + $0xa8] sm:$0xf]  ;;  %v2466_v1 = vld [vmem:[#allocation9 + $0xb0] sm:$0xf0] }
  0x11   :  { %v2386_v2 = vld [vmem:[#allocation9 + $0x168] sm:$0xf]  ;;  %v2910_v3 = vor.u32 %v2466_v1, %v2290_v0  ;;  %v2490_v4 = vld [vmem:[#allocation9 + $0x170] sm:$0xf0]  ;;  %v2465_v5 = vld [vmem:[#allocation9 + $0xac] sm:$0xf] }
  0x12   :  { %v2292_v6 = vld [vmem:[#allocation9 + $0xb4] sm:$0xf0]  ;;  %v2912_v7 = vor.u32 %v2490_v4, %v2386_v2  ;;  %v2278_v9 = vld [vmem:[#allocation9 + $0x90] sm:$0xf]  ;;  %v2463_v10 = vld [vmem:[#allocation9 + $0x98] sm:$0xf0] }
  0x13   :  { %v2914_v8 = vor.u32 %v2465_v5, %v2292_v6  ;;  %v2374_v11 = vld [vmem:[#allocation9 + $0x150] sm:$0xf]  ;;  %302 = vmatpush.bf16.msra.mxu0 %v2910_v3  ;;  %v2917_v12 = vor.u32 %v2463_v10, %v2278_v9  ;;  %v2487_v13 = vld [vmem:[#allocation9 + $0x158] sm:$0xf0]  ;;  %v2462_v14 = vld [vmem:[#allocation9 + $0x94] sm:$0xf] }
  0x14   :  { %v2280_v15 = vld [vmem:[#allocation9 + $0x9c] sm:$0xf0]  ;;  %470 = vmatpush.bf16.msra.mxu3 %v2912_v7  ;;  %v2921_v16 = vor.u32 %v2487_v13, %v2374_v11  ;;  %v2266_v18 = vld [vmem:[#allocation9 + $0x78] sm:$0xf]  ;;  %v2460_v19 = vld [vmem:[#allocation9 + $0x80] sm:$0xf0] }
  0x15   :  { %3711 = vst [vmem:[#allocation18_spill] sm:$0xff] %v2917_v12  ;;  %315 = vmatpush.bf16.msra.mxu1 %v2914_v8  ;;  %v2923_v17 = vor.u32 %v2462_v14, %v2280_v15  ;;  %v2362_v20 = vld [vmem:[#allocation9 + $0x138] sm:$0xf]  ;;  %v2484_v21 = vld [vmem:[#allocation9 + $0x140] sm:$0xf0]  ;;  %v2926_v24 = vor.u32 %v2460_v19, %v2266_v18  ;;  %s2144_s10 = sshll.u32 %s3667_s5, 4  ;;  %s2145_s10 = int_to_ptr.hbm [resolvable:$true] %s2144_s10 }
  0x16   :  { %v2459_v22 = vld [vmem:[#allocation9 + $0x7c] sm:$0xf]  ;;  %v2268_v23 = vld [vmem:[#allocation9 + $0x84] sm:$0xf0]  ;;  %v2930_v25 = vor.u32 %v2484_v21, %v2362_v20  ;;  %v2254_v27 = vld [vmem:[#allocation9 + $0x60] sm:$0xf] }
  0x17   :  { %3712 = vst [vmem:[#allocation19_spill] sm:$0xff] %v2923_v17  ;;  %303 = vmatpush.bf16.msra.mxu0 %v2917_v12  ;;  %v2932_v26 = vor.u32 %v2459_v22, %v2268_v23  ;;  %v2457_v28 = vld [vmem:[#allocation9 + $0x68] sm:$0xf0]  ;;  %v2350_v29 = vld [vmem:[#allocation9 + $0x120] sm:$0xf]  ;;  %s2855_s5 = smov 64  }
  0x18   :  { %3713 = vst [vmem:[#allocation20_spill] sm:$0xff] %v2926_v24  ;;  %471 = vmatpush.bf16.msra.mxu3 %v2921_v16  ;;  %v2481_v30 = vld [vmem:[#allocation9 + $0x128] sm:$0xf0]  ;;  %v2456_v31 = vld [vmem:[#allocation9 + $0x64] sm:$0xf]  ;;  %v2935_v34 = vor.u32 %v2457_v28, %v2254_v27  ;;  %s2856_s11 = smov 4  }
  0x19   :  { %316 = vmatpush.bf16.msra.mxu1 %v2923_v17  ;;  %3714 = vst [vmem:[#allocation21_spill] sm:$0xff] %v2932_v26  ;;  %v2256_v32 = vld [vmem:[#allocation9 + $0x6c] sm:$0xf0]  ;;  %v2242_v35 = vld [vmem:[#allocation9 + $0x48] sm:$0xf]  ;;  %v2939_v38 = vor.u32 %v2481_v30, %v2350_v29  ;;  %s2857_s12 = smov [#allocation11]  }
  0x1a   :  { %v2298_v33 = vld [vmem:[#allocation9 + $0xb0] sm:$0xf]  ;;  %3715 = vst [vmem:[#allocation22_spill] sm:$0xff] %v2935_v34  ;;  %v2454_v36 = vld [vmem:[#allocation9 + $0x50] sm:$0xf0]  ;;  %v2941_v39 = vor.u32 %v2456_v31, %v2256_v32  ;;  %s2159_s13 = sshll.u32 %s2857_s12, 4  ;;  %s2160_s13 = int_to_ptr.vmem [resolvable:$true] %s2159_s13 }
  0x1b   :  { %304 = vmatpush.bf16.msra.mxu0 %v2926_v24  ;;  %v2467_v37 = vld [vmem:[#allocation9 + $0xb8] sm:$0xf0]  ;;  %v2338_v40 = vld [vmem:[#allocation9 + $0x108] sm:$0xf]  ;;  %v2478_v41 = vld [vmem:[#allocation9 + $0x110] sm:$0xf0]  ;;  %v2949_v48 = vor.u32 %v2454_v36, %v2242_v35 }
  0x1c   :  { %472 = vmatpush.bf16.msra.mxu3 %v2930_v25  ;;  %3716 = vst [vmem:[#allocation23_spill] sm:$0xff] %v2941_v39  ;;  %v2453_v42 = vld [vmem:[#allocation9 + $0x4c] sm:$0xf]  ;;  %v2943_v43 = vor.u32 %v2467_v37, %v2298_v33  ;;  %v2244_v44 = vld [vmem:[#allocation9 + $0x54] sm:$0xf0]  ;;  %v2953_v51 = vor.u32 %v2478_v41, %v2338_v40  ;;  %s2161_s16 = sshll.u32 %s3668_s6, 4  ;;  %s2162_s16 = int_to_ptr.hbm [resolvable:$true] %s2161_s16 }
  0x1d   :  { %317 = vmatpush.bf16.msra.mxu1 %v2932_v26  ;;  %v2286_v45 = vld [vmem:[#allocation9 + $0x98] sm:$0xf]  ;;  %v2464_v46 = vld [vmem:[#allocation9 + $0xa0] sm:$0xf0]  ;;  %3717 = vst [vmem:[#allocation24_spill] sm:$0xff] %v2949_v48  ;;  %v2955_v52 = vor.u32 %v2453_v42, %v2244_v44  ;;  %s2858_s2 = smov [#allocation13]  }
  0x1e   :  { %328 = vmatpush.bf16.msra.mxu2 %v2943_v43  ;;  %v2946_v47 = vor.u32 %v2464_v46, %v2286_v45  ;;  %v2230_v49 = vld [vmem:[#allocation9 + $0x30] sm:$0xf]  ;;  %v2451_v50 = vld [vmem:[#allocation9 + $0x38] sm:$0xf0]  ;;  %v2274_v54 = vld [vmem:[#allocation9 + $0x80] sm:$0xf] }
  0x1f   :  { %305 = vmatpush.bf16.msra.mxu0 %v2935_v34  ;;  %3718 = vst [vmem:[#allocation25_spill] sm:$0xff] %v2955_v52  ;;  %v2326_v53 = vld [vmem:[#allocation9 + $0xf0] sm:$0xf]  ;;  %v2461_v55 = vld [vmem:[#allocation9 + $0x88] sm:$0xf0]  ;;  %v2961_v60 = vor.u32 %v2451_v50, %v2230_v49  ;;  %v2998_v45 = vld [vmem:[%s3662_s0] sm:$0xff] }
  0x20   :  { %473 = vmatpush.bf16.msra.mxu3 %v2939_v38  ;;  %v2475_v56 = vld [vmem:[#allocation9 + $0xf8] sm:$0xf0]  ;;  %v2450_v57 = vld [vmem:[#allocation9 + $0x34] sm:$0xf]  ;;  %v2232_v58 = vld [vmem:[#allocation9 + $0x3c] sm:$0xf0]  ;;  %v2958_v59 = vor.u32 %v2461_v55, %v2274_v54 }
  0x21   :  { %318 = vmatpush.bf16.msra.mxu1 %v2941_v39  ;;  %3719 = vst [vmem:[#allocation26_spill] sm:$0xff] %v2961_v60  ;;  %v2262_v61 = vld [vmem:[#allocation9 + $0x68] sm:$0xf]  ;;  %v2458_v62 = vld [vmem:[#allocation9 + $0x70] sm:$0xf0]  ;;  %v2965_v63 = vor.u32 %v2475_v56, %v2326_v53  ;;  %v2967_v0 = vor.u32 %v2450_v57, %v2232_v58  ;;  %v3670_v49 = vmov 0  }
  0x22   :  { %329 = vmatpush.bf16.msra.mxu2 %v2946_v47  ;;  %v2218_v1 = vld [vmem:[#allocation9 + $0x18] sm:$0xf]  ;;  %v2448_v2 = vld [vmem:[#allocation9 + $0x20] sm:$0xf0]  ;;  %v2447_v6 = vld [vmem:[#allocation9 + $0x1c] sm:$0xf]  ;;  %v2970_v10 = vor.u32 %v2458_v62, %v2262_v61  ;;  %2525 = vset.pattern.permute.xlu0 %v3670_v49 }
  0x23   :  { %306 = vmatpush.bf16.msra.mxu0 %v2949_v48  ;;  %3720 = vst [vmem:[#allocation27_spill] sm:$0xff] %v2967_v0  ;;  %v2314_v4 = vld [vmem:[#allocation9 + $0xd8] sm:$0xf]  ;;  %v2472_v5 = vld [vmem:[#allocation9 + $0xe0] sm:$0xf0]  ;;  %v2973_v11 = vor.u32 %v2448_v2, %v2218_v1  ;;  %vm2398_vm0 = vcmp.gt.s32.totalorder %v2998_v45, 0  ;;  %2526 = vset.pattern.permute.xlu1 %v3670_v49 }
  0x24   :  { %474 = vmatpush.bf16.msra.mxu3 %v2953_v51  ;;  %v2220_v9 = vld [vmem:[#allocation9 + $0x24] sm:$0xf0]  ;;  %v2250_v13 = vld [vmem:[#allocation9 + $0x50] sm:$0xf]  ;;  %v2455_v14 = vld [vmem:[#allocation9 + $0x58] sm:$0xf0]  ;;  %v2977_v15 = vor.u32 %v2472_v5, %v2314_v4  ;;  %2527 = vset.pattern.permute.xlu2 %v3670_v49 }
  0x25   :  { %319 = vmatpush.bf16.msra.mxu1 %v2955_v52  ;;  %3721 = vst [vmem:[#allocation28_spill] sm:$0xff] %v2973_v11  ;;  %v2979_v18 = vor.u32 %v2447_v6, %v2220_v9  ;;  %v2206_v19 = vld [vmem:[#allocation9] sm:$0xf]  ;;  %v2445_v20 = vld [vmem:[#allocation9 + $0x8] sm:$0xf0]  ;;  %v2982_v30 = vor.u32 %v2455_v14, %v2250_v13  ;;  %v3009_v55 = vsel %vm2398_vm0, 1, %v3670_v49 }
  0x26   :  { %330 = vmatpush.bf16.msra.mxu2 %v2958_v59  ;;  %v2302_v21 = vld [vmem:[#allocation9 + $0xc0] sm:$0xf]  ;;  %v2469_v22 = vld [vmem:[#allocation9 + $0xc8] sm:$0xf0]  ;;  %v2388_v27 = vld [vmem:[#allocation9 + $0x174] sm:$0xf0]  ;;  %v2985_v31 = vor.u32 %v2445_v20, %v2206_v19  ;;  %564 = vperm.xlu0 %2525, %v3009_v55  }
  0x27   :  { %307 = vmatpush.bf16.msra.mxu0 %v2961_v60  ;;  %3722 = vst [vmem:[#allocation29_spill] sm:$0xff] %v2979_v18  ;;  %v2489_v23 = vld [vmem:[#allocation9 + $0x16c] sm:$0xf]  ;;  %v2444_v28 = vld [vmem:[#allocation9 + $0x4] sm:$0xf]  ;;  %v2989_v35 = vor.u32 %v2469_v22, %v2302_v21  ;;  %v2853_v1 = vmov 0.0|0.0  }
  0x28   :  { %475 = vmatpush.bf16.msra.mxu3 %v2965_v63  ;;  %v2208_v29 = vld [vmem:[#allocation9 + $0xc] sm:$0xf0]  ;;  %3723 = vst [vmem:[#allocation30_spill] sm:$0xff] %v2985_v31  ;;  %v2491_v33 = vld [vmem:[#allocation9 + $0x178] sm:$0xf0]  ;;  %v2991_v36 = vor.u32 %v2489_v23, %v2388_v27  ;;  %vm2401_vm1 = vcmp.gt.s32.totalorder %v2998_v45, 7 }
  0x29   :  { %320 = vmatpush.bf16.msra.mxu1 %v2967_v0  ;;  %v2394_v32 = vld [vmem:[#allocation9 + $0x170] sm:$0xf]  ;;  %v2238_v37 = vld [vmem:[#allocation9 + $0x38] sm:$0xf]  ;;  %v2452_v40 = vld [vmem:[#allocation9 + $0x40] sm:$0xf0]  ;;  %v2993_v41 = vor.u32 %v2444_v28, %v2208_v29 }
  0x2a   :  { %331 = vmatpush.bf16.msra.mxu2 %v2970_v10  ;;  %v2486_v42 = vld [vmem:[#allocation9 + $0x154] sm:$0xf]  ;;  %v2376_v44 = vld [vmem:[#allocation9 + $0x15c] sm:$0xf0]  ;;  %v3000_v46 = vor.u32 %v2491_v33, %v2394_v32  ;;  %v2382_v50 = vld [vmem:[#allocation9 + $0x158] sm:$0xf]  ;;  %v3006_v54 = vor.u32 %v2452_v40, %v2238_v37 }
  0x2b   :  { %308 = vmatpush.bf16.msra.mxu0 %v2973_v11  ;;  %3724 = vst [vmem:[#allocation31_spill] sm:$0xff] %v2993_v41  ;;  %v2488_v53 = vld [vmem:[#allocation9 + $0x160] sm:$0xf0]  ;;  %v3014_v56 = vor.u32 %v2486_v42, %v2376_v44  ;;  %v2226_v57 = vld [vmem:[#allocation9 + $0x20] sm:$0xf]  ;;  %v3037_v22 = vsel %vm2401_vm1, 1, %v3670_v49 }
  0x2c   :  { %476 = vmatpush.bf16.msra.mxu3 %v2977_v15  ;;  %3725 = vst [vmem:[#allocation32_spill] sm:$0xff] %v3009_v55  ;;  %v2449_v58 = vld [vmem:[#allocation9 + $0x28] sm:$0xf0]  ;;  %v2483_v61 = vld [vmem:[#allocation9 + $0x13c] sm:$0xf]  ;;  %v3020_v2 = vor.u32 %v2488_v53, %v2382_v50  ;;  %vm2416_vm2 = vcmp.gt.s32.totalorder %v2998_v45, 3 }
  0x2d   :  { %321 = vmatpush.bf16.msra.mxu1 %v2979_v18  ;;  %v2364_v62 = vld [vmem:[#allocation9 + $0x144] sm:$0xf0]  ;;  %v2370_v4 = vld [vmem:[#allocation9 + $0x140] sm:$0xf]  ;;  %v2485_v5 = vld [vmem:[#allocation9 + $0x148] sm:$0xf0]  ;;  %v3024_v6 = vor.u32 %v2449_v58, %v2226_v57 }
  0x2e   :  { %332 = vmatpush.bf16.msra.mxu2 %v2982_v30  ;;  %v3029_v9 = vor.u32 %v2483_v61, %v2364_v62  ;;  %v2214_v13 = vld [vmem:[#allocation9 + $0x8] sm:$0xf]  ;;  %v2446_v14 = vld [vmem:[#allocation9 + $0x10] sm:$0xf0]  ;;  %v2480_v19 = vld [vmem:[#allocation9 + $0x124] sm:$0xf]  ;;  %v3034_v21 = vor.u32 %v2485_v5, %v2370_v4  ;;  %625 = vperm.xlu0 %2525, %v3037_v22  }
  0x2f   :  { %309 = vmatpush.bf16.msra.mxu0 %v2985_v31  ;;  %v2352_v20 = vld [vmem:[#allocation9 + $0x12c] sm:$0xf0]  ;;  %v2358_v23 = vld [vmem:[#allocation9 + $0x128] sm:$0xf]  ;;  %v2482_v27 = vld [vmem:[#allocation9 + $0x130] sm:$0xf0]  ;;  %v3040_v28 = vor.u32 %v2446_v14, %v2214_v13 }
  0x30   :  { %477 = vmatpush.bf16.msra.mxu3 %v2989_v35  ;;  %v3043_v29 = vor.u32 %v2480_v19, %v2352_v20  ;;  %v2477_v32 = vld [vmem:[#allocation9 + $0x10c] sm:$0xf]  ;;  %v2340_v33 = vld [vmem:[#allocation9 + $0x114] sm:$0xf0]  ;;  %v3048_v37 = vor.u32 %v2482_v27, %v2358_v23  ;;  %v2346_v40 = vld [vmem:[#allocation9 + $0x110] sm:$0xf] }
  0x31   :  { %322 = vmatpush.bf16.msra.mxu1 %v2993_v41  ;;  %v2479_v42 = vld [vmem:[#allocation9 + $0x118] sm:$0xf0]  ;;  %v3053_v44 = vor.u32 %v2477_v32, %v2340_v33  ;;  %v2474_v50 = vld [vmem:[#allocation9 + $0xf4] sm:$0xf]  ;;  %v2328_v53 = vld [vmem:[#allocation9 + $0xfc] sm:$0xf0] }
  0x32   :  { %310 = vmatmul.bf16.vlgmr.msra.gmra.mxu0 %v2853_v1  ;;  %333 = vmatpush.bf16.msra.mxu2 %v3006_v54  ;;  %v3058_v57 = vor.u32 %v2479_v42, %v2346_v40  ;;  %v1206_v58 = vsel %vm2416_vm2, 1, %v3670_v49  ;;  %v2334_v61 = vld [vmem:[#allocation9 + $0xf8] sm:$0xf]  ;;  %v2476_v62 = vld [vmem:[#allocation9 + $0x100] sm:$0xf0]  ;;  %v3063_v4 = vor.u32 %v2474_v50, %v2328_v53  ;;  %vm2407_vm3 = vcmp.gt.s32.totalorder %v2998_v45, 6 }
  0x33   :  { %483 = vmatpush.bf16.msrb.mxu0 %v2991_v36  ;;  %478 = vmatmul.bf16.vlgmr.msra.gmra.mxu3 %v2853_v1  ;;  %v2471_v5 = vld [vmem:[#allocation9 + $0xdc] sm:$0xf]  ;;  %v2316_v13 = vld [vmem:[#allocation9 + $0xe4] sm:$0xf0]  ;;  %v3068_v14 = vor.u32 %v2476_v62, %v2334_v61  ;;  %v2322_v19 = vld [vmem:[#allocation9 + $0xe0] sm:$0xf] }
  0x34   :  { %323 = vmatmul.bf16.vlgmr.msra.gmra.mxu1 %v2853_v1  ;;  %661 = vmatpush.bf16.msrb.mxu3 %v2914_v8  ;;  %v2473_v20 = vld [vmem:[#allocation9 + $0xe8] sm:$0xf0]  ;;  %v3071_v23 = vor.u32 %v2471_v5, %v2316_v13  ;;  %v2468_v27 = vld [vmem:[#allocation9 + $0xc4] sm:$0xf]  ;;  %v2304_v32 = vld [vmem:[#allocation9 + $0xcc] sm:$0xf0] }
  0x35   :  { %496 = vmatpush.bf16.msrb.mxu1 %v3000_v46  ;;  %3726 = vst [vmem:[#allocation33_spill] sm:$0xff] %v3068_v14  ;;  %v3076_v33 = vor.u32 %v2473_v20, %v2322_v19  ;;  %v2310_v40 = vld [vmem:[#allocation9 + $0xc8] sm:$0xf]  ;;  %v2470_v42 = vld [vmem:[#allocation9 + $0xd0] sm:$0xf0]  ;;  %v3079_v50 = vor.u32 %v2468_v27, %v2304_v32  ;;  %vm2404_vm14 = vcmp.gt.s32.totalorder %v2998_v45, 1 }
  0x36   :  { %334 = vmatpush.bf16.msra.mxu2 %v3024_v6  ;;  %1208 = vperm.xlu0 %2525, %v1206_v58   ;;  %v3084_v53 = vor.u32 %v2470_v42, %v2310_v40  ;;  %v168_v13 = vld [vmem:[#allocation7 + $0x54] sm:$0xff]  ;;  %s2172_s17 = sshll.u32 %s2858_s2, 4  ;;  %s2174_s3 = sshll.u32 %s3669_s7, 4  ;;  %s2173_s17 = int_to_ptr.vmem [resolvable:$true] %s2172_s17  ;;  %s2175_s3 = int_to_ptr.hbm [resolvable:$true] %s2174_s3 }
  0x37   :  { %484 = vmatpush.bf16.msrb.mxu0 %v3014_v56  ;;  %3727 = vst [vmem:[#allocation34_spill] sm:$0xff] %v3076_v33  ;;  %v170_v32 = vunpack.c.l.bf16 %v168_v13  ;;  %s2859_s6 = smov 128   ;;  %s2860_s0 = smov 8  }
  0x38   :  { %662 = vmatpush.bf16.msrb.mxu3 %v2923_v17  ;;  %3728 = vst [vmem:[#allocation35_spill] sm:$0xff] %v3084_v53 }
  0x39   :  { %497 = vmatpush.bf16.msrb.mxu1 %v3020_v2 }
  0x3a   :  { %335 = vmatpush.bf16.msra.mxu2 %v3040_v28 }
  0x3b   :  { %485 = vmatpush.bf16.msrb.mxu0 %v3029_v9 }
  0x3c   :  { %663 = vmatpush.bf16.msrb.mxu3 %v2932_v26 }
  0x3d   :  { %498 = vmatpush.bf16.msrb.mxu1 %v3034_v21  ;;  %336 = vmatmul.bf16.vlgmr.msra.gmra.mxu2 %v2853_v1 }
  0x3e   :  { %648 = vmatpush.bf16.msrb.mxu2 %v2910_v3  ;;  %1480 = vperm.xlu0 %2525, %v1206_v58   ;;  %v3093_v58 = vsel %vm2407_vm3, 1, %v3670_v49  ;;  %vm2419_vm3 = vcmp.gt.s32.totalorder %v2998_v45, 4 }
  0x3f   :  { %486 = vmatpush.bf16.msrb.mxu0 %v3043_v29 }
  0x40   :  { %664 = vmatpush.bf16.msrb.mxu3 %v2941_v39 }
  0x41   :  { %499 = vmatpush.bf16.msrb.mxu1 %v3048_v37 }
  0x42   :  { %649 = vmatpush.bf16.msrb.mxu2 %v2917_v12 }
  0x43   :  { %487 = vmatpush.bf16.msrb.mxu0 %v3053_v44 }
  0x44   :  { %665 = vmatpush.bf16.msrb.mxu3 %v2955_v52 }
  0x45   :  { %500 = vmatpush.bf16.msrb.mxu1 %v3058_v57 }
  0x46   :  { %650 = vmatpush.bf16.msrb.mxu2 %v2926_v24  ;;  %1850 = vperm.xlu0 %2525, %v3093_v58  }
  0x47   :  { %488 = vmatpush.bf16.msrb.mxu0 %v3063_v4 }
  0x48   :  { %666 = vmatpush.bf16.msrb.mxu3 %v2967_v0 }
  0x49   :  { %501 = vmatpush.bf16.msrb.mxu1 %v3068_v14 }
  0x4a   :  { %651 = vmatpush.bf16.msrb.mxu2 %v2935_v34 }
  0x4b   :  { %489 = vmatpush.bf16.msrb.mxu0 %v3071_v23 }
  0x4c   :  { %667 = vmatpush.bf16.msrb.mxu3 %v2979_v18 }
  0x4d   :  { %502 = vmatpush.bf16.msrb.mxu1 %v3076_v33 }
  0x4e   :  { %652 = vmatpush.bf16.msrb.mxu2 %v2949_v48  ;;  %2063 = vperm.xlu0 %2525, %v3037_v22  }
  0x4f   :  { %490 = vmatpush.bf16.msrb.mxu0 %v3079_v50 }
  0x50   :  { %668 = vmatpush.bf16.msrb.mxu3 %v2993_v41 }
  0x51   :  { %503 = vmatpush.bf16.msrb.mxu1 %v3084_v53 }
  0x52   :  { %491 = vmatmul.bf16.vlgmr.msrb.gmra.mxu0 %v2853_v1  ;;  %653 = vmatpush.bf16.msrb.mxu2 %v2961_v60 }
  0x53   :  { %674 = vmatpush.bf16.msra.mxu0 %v2943_v43 }
  0x54   :  { %504 = vmatmul.bf16.vlgmr.msrb.gmra.mxu1 %v2853_v1  ;;  %714 = vmatpush.bf16.msra.mxu3 %v3000_v46  ;;  %v162_v1 = vld [vmem:[#allocation4] sm:$0xff] }
  0x55   :  { %688 = vmatpush.bf16.msra.mxu1 %v2912_v7  ;;  %v164_v22 = vunpack.c.l.bf16 %v162_v1  ;;  %v165_v61 = vunpack.c.h.bf16 %v162_v1 }
  0x56   :  { %654 = vmatpush.bf16.msrb.mxu2 %v2973_v11 }
  0x57   :  { %675 = vmatpush.bf16.msra.mxu0 %v2946_v47 }
  0x58   :  { %715 = vmatpush.bf16.msra.mxu3 %v3020_v2 }
  0x59   :  { %689 = vmatpush.bf16.msra.mxu1 %v2921_v16 }
  0x5a   :  { %655 = vmatpush.bf16.msrb.mxu2 %v2985_v31 }
  0x5b   :  { %676 = vmatpush.bf16.msra.mxu0 %v2958_v59 }
  0x5c   :  { %716 = vmatpush.bf16.msra.mxu3 %v3034_v21 }
  0x5d   :  { %690 = vmatpush.bf16.msra.mxu1 %v2930_v25 }
  0x5e   :  { %701 = vmatpush.bf16.msra.mxu2 %v2991_v36 }
  0x5f   :  { %677 = vmatpush.bf16.msra.mxu0 %v2970_v10 }
  0x60   :  { %717 = vmatpush.bf16.msra.mxu3 %v3048_v37 }
  0x61   :  { %691 = vmatpush.bf16.msra.mxu1 %v2939_v38 }
  0x62   :  { %702 = vmatpush.bf16.msra.mxu2 %v3014_v56 }
  0x63   :  { %678 = vmatpush.bf16.msra.mxu0 %v2982_v30 }
  0x64   :  { %718 = vmatpush.bf16.msra.mxu3 %v3058_v57 }
  0x65   :  { %692 = vmatpush.bf16.msra.mxu1 %v2953_v51 }
  0x66   :  { %703 = vmatpush.bf16.msra.mxu2 %v3029_v9 }
  0x67   :  { %679 = vmatpush.bf16.msra.mxu0 %v3006_v54 }
  0x68   :  { %719 = vmatpush.bf16.msra.mxu3 %v3068_v14 }
  0x69   :  { %693 = vmatpush.bf16.msra.mxu1 %v2965_v63 }
  0x6a   :  { %704 = vmatpush.bf16.msra.mxu2 %v3043_v29 }
  0x6b   :  { %680 = vmatpush.bf16.msra.mxu0 %v3024_v6 }
  0x6c   :  { %720 = vmatpush.bf16.msra.mxu3 %v3076_v33 }
  0x6d   :  { %694 = vmatpush.bf16.msra.mxu1 %v2977_v15 }
  0x6e   :  { %705 = vmatpush.bf16.msra.mxu2 %v3053_v44 }
  0x6f   :  { %681 = vmatpush.bf16.msra.mxu0 %v3040_v28 }
  0x70   :  { %721 = vmatpush.bf16.msra.mxu3 %v3084_v53 }
  0x71   :  { %695 = vmatpush.bf16.msra.mxu1 %v2989_v35 }
  0x72   :  { %706 = vmatpush.bf16.msra.mxu2 %v3063_v4 }
  0x73   :  { %862 = vmatpush.bf16.msrb.mxu0 %v2910_v3 }
  0x75   :  { %875 = vmatpush.bf16.msrb.mxu1 %v2914_v8 }
  0x76   :  { %707 = vmatpush.bf16.msra.mxu2 %v3071_v23 }
  0x77   :  { %863 = vmatpush.bf16.msrb.mxu0 %v2917_v12 }
  0x79   :  { %876 = vmatpush.bf16.msrb.mxu1 %v2923_v17 }
  0x7a   :  { %708 = vmatpush.bf16.msra.mxu2 %v3079_v50 }
  0x7b   :  { %864 = vmatpush.bf16.msrb.mxu0 %v2926_v24 }
  0x7d   :  { %877 = vmatpush.bf16.msrb.mxu1 %v2932_v26 }
  0x7f   :  { %865 = vmatpush.bf16.msrb.mxu0 %v2935_v34 }
  0x81   :  { %878 = vmatpush.bf16.msrb.mxu1 %v2941_v39 }
  0x83   :  { %866 = vmatpush.bf16.msrb.mxu0 %v2949_v48 }
  0x85   :  { %879 = vmatpush.bf16.msrb.mxu1 %v2955_v52 }
  0x87   :  { %867 = vmatpush.bf16.msrb.mxu0 %v2961_v60 }
  0x89   :  { %880 = vmatpush.bf16.msrb.mxu1 %v2967_v0 }
  0x8b   :  { %868 = vmatpush.bf16.msrb.mxu0 %v2973_v11 }
  0x8d   :  { %881 = vmatpush.bf16.msrb.mxu1 %v2979_v18 }
  0x8f   :  { %869 = vmatpush.bf16.msrb.mxu0 %v2985_v31 }
  0x91   :  { %882 = vmatpush.bf16.msrb.mxu1 %v2993_v41 }
  0xaf   :  { %v311_v62 = vpop.f32.mrf.mxu0 }
  0xb0   :  { %v509_v5 = vadd.f32 %v311_v62, %v164_v22 }
  0xb1   :  { %v324_v19 = vpop.f32.mrf.mxu1 }
  0xb2   :  { %v2396_v20 = vmul.f32 -1.442695, %v509_v5  ;;  %v529_v27 = vadd.f32 %v324_v19, %v165_v61 }
  0xb4   :  { %2530 = vpow2.f32 %v2396_v20  ;;  %v2397_v40 = vmul.f32 -1.442695, %v529_v27 }
  0xb6   :  { %2532 = vpow2.f32 %v2397_v40  ;;  %v479_v42 = vpop.f32.mrf.mxu3 }
  0xb7   :  { %v570_v49 = vadd.f32 %v479_v42, %v170_v32  ;;  %v313_v55 = vpop.f32.mrf.mxu0  ;;  %v171_v42 = vunpack.c.h.bf16 %v168_v13 }
  0xb9   :  { %v2399_v18 = vmul.f32 -1.442695, %v570_v49  ;;  %v326_v31 = vpop.f32.mrf.mxu1 }
  0xba   :  { %v2531_v11 = vpop.eup %2530 }
  0xbb   :  { %v513_v41 = vadd.f32 1.0, %v2531_v11  ;;  %2534 = vpow2.f32 %v2399_v18  ;;  %v3156_v11 = vld [vmem:[%s3666_s4] ss:$0 sm:$0xff]  ;;  %v163_v18 = vld [vmem:[#allocation4 + $0x8] sm:$0xf] }
  0xbc   :  { %v2533_v0 = vpop.eup %2532  ;;  %3729 = vst [vmem:[#allocation36_spill] sm:$0xff] %v3156_v11  ;;  %v166_v53 = vunpack.c.l.bf16 %v163_v18 }
  0xbd   :  { %2536 = vrcp.f32 %v513_v41  ;;  %v533_v1 = vadd.f32 1.0, %v2533_v0  ;;  %vm519_vm4 = vweird.f32 %v513_v41  ;;  %v525_v0 = vand.u32 2147483648, %v513_v41 }
  0xbe   :  { %v481_v22 = vpop.f32.mrf.mxu3  ;;  %v523_v40 = vand.u32 2147483647, %v513_v41 }
  0xbf   :  { %2538 = vrcp.f32 %v533_v1  ;;  %vm539_vm6 = vweird.f32 %v533_v1  ;;  %v526_v48 = vor.u32 1.1754944e-38, %v525_v0  ;;  %v545_v39 = vand.u32 2147483648, %v533_v1 }
  0xc0   :  { %v337_v5 = vpop.f32.mrf.mxu2  ;;  %vm524_vm9 = vcmp.eq.f32.partialorder %v523_v40, 8.507059e+37  ;;  %v543_v34 = vand.u32 2147483647, %v533_v1 }
  0xc1   :  { %v2535_v62 = vpop.eup %2534 }
  0xc2   :  { %v3150_v61 = vadd.f32 1.0, %v2535_v62  ;;  %vm544_vm11 = vcmp.eq.f32.partialorder %v543_v34, 8.507059e+37  ;;  %v3181_v34 = vld [vmem:[%s3666_s4 + $0x1] ss:$0 sm:$0xff] }
  0xc3   :  { %v2537_v19 = vpop.eup %2536 }
  0xc4   :  { %2540 = vrcp.f32 %v3150_v61  ;;  %v515_v20 = vmul.f32 %v2537_v19, %v513_v41  ;;  %vm520_vm5 = vweird.f32 %v2537_v19  ;;  %vm580_vm12 = vweird.f32 %v3150_v61 }
  0xc5   :  { %v2539_v27 = vpop.eup %2538  ;;  %vm521_vm8 = vmor %vm519_vm4, %vm520_vm5 }
  0xc6   :  { %v535_v55 = vmul.f32 %v2539_v27, %v533_v1  ;;  %v516_v49 = vsub.f32 1.0, %v515_v20  ;;  %v552_v20 = vadd.f32 %v3156_v11, %v337_v5  ;;  %vm540_vm7 = vweird.f32 %v2539_v27 }
  0xc7   :  { %vm3161_vm10 = vmor %vm539_vm6, %vm540_vm7  ;;  %v546_v11 = vor.u32 1.1754944e-38, %v545_v39  ;;  %vm2413_vm7 = vcmp.gt.s32.totalorder %v2998_v45, 5 }
  0xc8   :  { %v536_v31 = vsub.f32 1.0, %v535_v55  ;;  %v517_v32 = vmul.f32 %v2537_v19, %v516_v49  ;;  %v339_v22 = vpop.f32.mrf.mxu2 }
  0xca   :  { %v2541_v62 = vpop.eup %2540  ;;  %v537_v60 = vmul.f32 %v2539_v27, %v536_v31  ;;  %v518_v52 = vadd.f32 %v2537_v19, %v517_v32 }
  0xcb   :  { %v576_v33 = vmul.f32 %v2541_v62, %v3150_v61  ;;  %vm581_vm13 = vweird.f32 %v2541_v62 }
  0xcc   :  { %v522_v55 = vsel %vm521_vm8, %v2537_v19, %v518_v52  ;;  %v538_v31 = vadd.f32 %v2539_v27, %v537_v60  ;;  %vm3171_vm15 = vmor %vm580_vm12, %vm581_vm13 }
  0xcd   :  { %v527_v13 = vsel %vm524_vm9, %v526_v48, %v522_v55  ;;  %v577_v14 = vsub.f32 1.0, %v576_v33  ;;  %v586_v48 = vand.u32 2147483648, %v3150_v61  ;;  %v584_v33 = vand.u32 2147483647, %v3150_v61 }
  0xce   :  { %v553_v5 = vmul.f32 %v552_v20, %v527_v13  ;;  %v542_v52 = vsel %vm3161_vm10, %v2539_v27, %v538_v31  ;;  %v169_v31 = vld [vmem:[#allocation7 + $0x5c] sm:$0xf] }
  0xcf   :  { %v492_v49 = vpop.f32.mrf.mxu0  ;;  %v578_v26 = vmul.f32 %v2541_v62, %v577_v14  ;;  %v547_v19 = vsel %vm544_vm11, %v546_v11, %v542_v52  ;;  %v3734_v14 = vmov 0   ;;  %v587_v61 = vor.u32 1.1754944e-38, %v586_v48 }
  0xd0   :  { %v590_v22 = vadd.f32 %v492_v49, %v171_v42  ;;  %v554_v0 = vadd.f32 %v553_v5, %v166_v53  ;;  %v3176_v53 = vsel %vm2404_vm14, 1, %v3734_v14  ;;  %v556_v11 = vsub.f32 1.0, %v547_v19  ;;  %v565_v42 = vpop.permute.xlu0 %564 }
  0xd1   :  { %v505_v32 = vpop.f32.mrf.mxu1  ;;  %v579_v60 = vadd.f32 %v2541_v62, %v578_v26  ;;  %780 = vperm.xlu1 %2526, %v3176_v53   ;;  %vm585_vm0 = vcmp.eq.f32.partialorder %v584_v33, 8.507059e+37  ;;  %vm566_vm1 = vcmp.eq.s32.totalorder %v565_v42, 1  ;;  %v558_v13 = vmul.f32 0.0, %v547_v19 }
  0xd2   :  { %v2400_v41 = vmul.f32 -1.442695, %v590_v22  ;;  %v613_v22 = vadd.f32 %v3181_v34, %v505_v32  ;;  %vm2492_vm2 = vmpackc.low %vm566_vm1, %vm566_vm1  ;;  %v172_v52 = vunpack.c.l.bf16 %v169_v31 }
  0xd3   :  { %v583_v55 = vsel %vm3171_vm15, %v2541_v62, %v579_v60 }
  0xd4   :  { %2542 = vpow2.f32 %v2400_v41  ;;  %v588_v18 = vsel %vm585_vm0, %v587_v61, %v583_v55  ;;  %v3208_v55 = vsel %vm2413_vm7, 1, %v3734_v14 }
  0xd5   :  { %2544 = vtanh.f32 %v554_v0  ;;  %v614_v48 = vmul.f32 %v613_v22, %v588_v18 }
  0xd7   :  { %v494_v1 = vpop.f32.mrf.mxu0  ;;  %v615_v33 = vadd.f32 %v614_v48, %v172_v52  ;;  %v3736_v52 = vld [vmem:[#allocation33_spill] sm:$0xff]  ;;  %v3737_v48 = vld [vmem:[#allocation22_spill] sm:$0xff] }
  0xd8   :  { %v626_v22 = vpop.permute.xlu0 %625 }
  0xd9   :  { %v507_v27 = vpop.f32.mrf.mxu1  ;;  %838 = vperm.xlu1 %2526, %v3093_v58   ;;  %v3197_v58 = vsel %vm2419_vm3, 1, %v3734_v14  ;;  %vm627_vm9 = vcmp.eq.s32.totalorder %v626_v22, 1 }
  0xda   :  { %v2543_v26 = vpop.eup %2542  ;;  %vm2501_vm10 = vmpackc.low %vm627_vm9, %vm627_vm9 }
  0xdb   :  { %v2545_v40 = vpop.eup %2544  ;;  %v594_v20 = vadd.f32 1.0, %v2543_v26 }
  0xdc   :  { %v557_v49 = vmul.f32 %v2545_v40, %v556_v11 }
  0xdd   :  { %2546 = vrcp.f32 %v594_v20  ;;  %v606_v19 = vand.u32 2147483648, %v594_v20  ;;  %v604_v27 = vand.u32 2147483647, %v594_v20  ;;  %vm600_vm5 = vweird.f32 %v594_v20 }
  0xde   :  { %v559_v5 = vadd.f32 %v558_v13, %v557_v49  ;;  %2548 = vtanh.f32 %v615_v33  ;;  %v3741_v33 = vld [vmem:[#allocation25_spill] sm:$0xff] }
  0xdf   :  { %v607_v61 = vor.u32 1.1754944e-38, %v606_v19  ;;  %vm605_vm8 = vcmp.eq.f32.partialorder %v604_v27, 8.507059e+37  ;;  %v3743_v19 = vld [vmem:[#allocation26_spill] sm:$0xff]  ;;  %v3745_v27 = vld [vmem:[#allocation28_spill] sm:$0xff] }
  0xe0   :  { %v2493_v41 = vpack.c.bf16 %v559_v5, %v559_v5  ;;  %v3187_v0 = vsel %vm566_vm1, %v559_v5, 0.0 }
  0xe1   :  { %v630_v62 = vpack.c.bf16 %v3187_v0, %v3187_v0  ;;  %1266 = vperm.xlu1 %2526, %v3197_v58  }
  0xe2   :  { %2494 = vmatmul.msk.bf16.vlgmr.msrb.gmra.mxu2 %vm2492_vm2, %v2493_v41  ;;  %2497 = vmatmul.msk.bf16.vlgmr.msrb.gmra.mxu3 %vm2492_vm2, %v2493_v41 }
  0xe3   :  { %v2547_v60 = vpop.eup %2546  ;;  %2500 = vmatmul.msk.bf16.vlgmr.msra.gmra.mxu0 %vm2492_vm2, %v2493_v41  ;;  %631 = vst [vmem:[#allocation10] sm:$0xf] %v630_v62  ;;  %888 = vmatpush.bf16.msrb.mxu2 %v2943_v43  ;;  %v3738_v62 = vld [vmem:[#allocation23_spill] sm:$0xff]  ;;  %vm2410_vm2 = vcmp.gt.s32.totalorder %v2998_v45, 2 }
  0xe4   :  { %v596_v32 = vmul.f32 %v2547_v60, %v594_v20  ;;  %902 = vmatpush.bf16.msrb.mxu3 %v2912_v7  ;;  %915 = vmatpush.bf16.msra.mxu0 %v2991_v36  ;;  %vm601_vm4 = vweird.f32 %v2547_v60  ;;  %v2549_v49 = vpop.eup %2548 }
  0xe5   :  { %vm602_vm6 = vmor %vm600_vm5, %vm601_vm4 }
  0xe6   :  { %v597_v1 = vsub.f32 1.0, %v596_v32  ;;  %v3740_v32 = vld [vmem:[#allocation24_spill] sm:$0xff] }
  0xe7   :  { %889 = vmatpush.bf16.msrb.mxu2 %v2946_v47 }
  0xe8   :  { %v598_v39 = vmul.f32 %v2547_v60, %v597_v1  ;;  %903 = vmatpush.bf16.msrb.mxu3 %v2921_v16  ;;  %916 = vmatpush.bf16.msra.mxu0 %v3014_v56  ;;  %v3742_v1 = vld [vmem:[#allocation35_spill] sm:$0xff] }
  0xe9   :  { %1636 = vperm.xlu1 %2526, %v3208_v55  }
  0xea   :  { %v599_v26 = vadd.f32 %v2547_v60, %v598_v39  ;;  %v3744_v39 = vld [vmem:[#allocation27_spill] sm:$0xff] }
  0xeb   :  { %890 = vmatpush.bf16.msrb.mxu2 %v2958_v59 }
  0xec   :  { %v603_v11 = vsel %vm602_vm6, %v2547_v60, %v599_v26  ;;  %904 = vmatpush.bf16.msrb.mxu3 %v2930_v25  ;;  %917 = vmatpush.bf16.msra.mxu0 %v3029_v9  ;;  %v3739_v60 = vld [vmem:[#allocation34_spill] sm:$0xff]  ;;  %v3746_v26 = vld [vmem:[#allocation29_spill] sm:$0xff] }
  0xed   :  { %v608_v40 = vsel %vm605_vm8, %v607_v61, %v603_v11  ;;  %v3747_v61 = vld [vmem:[#allocation30_spill] sm:$0xff]  ;;  %v3748_v11 = vld [vmem:[#allocation31_spill] sm:$0xff] }
  0xee   :  { %v617_v42 = vsub.f32 1.0, %v608_v40  ;;  %v619_v13 = vmul.f32 0.0, %v608_v40  ;;  %v636_v40 = vld [vmem:[#allocation4 + $0xc] sm:$0xff] }
  0xef   :  { %891 = vmatpush.bf16.msrb.mxu2 %v2970_v10 }
  0xf0   :  { %v618_v20 = vmul.f32 %v2549_v49, %v617_v42  ;;  %905 = vmatpush.bf16.msrb.mxu3 %v2939_v38  ;;  %918 = vmatpush.bf16.msra.mxu0 %v3043_v29  ;;  %v638_v49 = vunpack.c.l.bf16 %v636_v40 }
  0xf1   :  { %1908 = vperm.xlu1 %2526, %v3176_v53   ;;  %v3735_v53 = vld [vmem:[#allocation21_spill] sm:$0xff] }
  0xf2   :  { %v620_v31 = vadd.f32 %v619_v13, %v618_v20  ;;  %v639_v20 = vunpack.c.h.bf16 %v636_v40 }
  0xf3   :  { %892 = vmatpush.bf16.msrb.mxu2 %v2982_v30 }
  0xf4   :  { %v2502_v18 = vpack.c.bf16 %v620_v31, %v620_v31  ;;  %v3215_v5 = vsel %vm627_vm9, %v620_v31, 0.0  ;;  %906 = vmatpush.bf16.msrb.mxu3 %v2953_v51  ;;  %919 = vmatpush.bf16.msra.mxu0 %v3053_v44 }
  0xf5   :  { %v632_v41 = vpack.c.bf16 %v3215_v5, %v3215_v5 }
  0xf6   :  { %2503 = vmatmul.msk.bf16.vlgmr.msra.gmra.mxu1 %vm2501_vm10, %v2502_v18  ;;  %2506 = vmatmul.msk.bf16.vlgmr.msra.gmra.mxu2 %vm2501_vm10, %v2502_v18 }
  0xf7   :  { %2509 = vmatmul.msk.bf16.vlgmr.msra.gmra.mxu3 %vm2501_vm10, %v2502_v18  ;;  %634 = vst [vmem:[#allocation11 + $0x1c] sm:$0xf] %v632_v41  ;;  %928 = vmatpush.bf16.msra.mxu1 %v3000_v46 }
  0xf8   :  { %893 = vmatpush.bf16.msrb.mxu2 %v3006_v54  ;;  %907 = vmatpush.bf16.msrb.mxu3 %v2965_v63 }
  0xf9   :  { %920 = vmatpush.bf16.msra.mxu0 %v3063_v4 }
  0xfb   :  { %929 = vmatpush.bf16.msra.mxu1 %v3020_v2 }
  0xfc   :  { %894 = vmatpush.bf16.msrb.mxu2 %v3024_v6  ;;  %908 = vmatpush.bf16.msrb.mxu3 %v2977_v15 }
  0xfd   :  { %921 = vmatpush.bf16.msra.mxu0 %v3071_v23 }
  0xff   :  { %930 = vmatpush.bf16.msra.mxu1 %v3034_v21 }
 0x100   :  { %895 = vmatpush.bf16.msrb.mxu2 %v3040_v28  ;;  %909 = vmatpush.bf16.msrb.mxu3 %v2989_v35 }
 0x101   :  { %922 = vmatpush.bf16.msra.mxu0 %v3079_v50 }
 0x103   :  { %931 = vmatpush.bf16.msra.mxu1 %v3048_v37 }
 0x104   :  { %1076 = vmatpush.bf16.msra.mxu2 %v2910_v3  ;;  %1089 = vmatpush.bf16.msra.mxu3 %v2914_v8 }
 0x107   :  { %932 = vmatpush.bf16.msra.mxu1 %v3058_v57 }
 0x108   :  { %1077 = vmatpush.bf16.msra.mxu2 %v2917_v12  ;;  %1090 = vmatpush.bf16.msra.mxu3 %v2923_v17  ;;  %v3749_v17 = vld [vmem:[#allocation36_spill] sm:$0xff] }
 0x10b   :  { %933 = vmatpush.bf16.msra.mxu1 %v3736_v52 }
 0x10c   :  { %1078 = vmatpush.bf16.msra.mxu2 %v2926_v24  ;;  %1091 = vmatpush.bf16.msra.mxu3 %v3735_v53 }
 0x10f   :  { %934 = vmatpush.bf16.msra.mxu1 %v3739_v60 }
 0x110   :  { %1079 = vmatpush.bf16.msra.mxu2 %v3737_v48  ;;  %1092 = vmatpush.bf16.msra.mxu3 %v3738_v62 }
 0x113   :  { %935 = vmatpush.bf16.msra.mxu1 %v3742_v1 }
 0x114   :  { %1080 = vmatpush.bf16.msra.mxu2 %v3740_v32  ;;  %1093 = vmatpush.bf16.msra.mxu3 %v3741_v33 }
 0x118   :  { %1081 = vmatpush.bf16.msra.mxu2 %v3743_v19  ;;  %1094 = vmatpush.bf16.msra.mxu3 %v3744_v39 }
 0x11c   :  { %1082 = vmatpush.bf16.msra.mxu2 %v3745_v27  ;;  %1095 = vmatpush.bf16.msra.mxu3 %v3746_v26  ;;  %v642_v26 = vld [vmem:[#allocation7 + $0x48] sm:$0xff] }
 0x120   :  { %1083 = vmatpush.bf16.msra.mxu2 %v3747_v61  ;;  %1096 = vmatpush.bf16.msra.mxu3 %v3748_v11  ;;  %v644_v61 = vunpack.c.l.bf16 %v642_v26 }
 0x160   :  { %v683_v42 = vpop.f32.mrf.mxu0 }
 0x165   :  { %v657_v13 = vpop.f32.mrf.mxu2  ;;  %v670_v22 = vpop.f32.mrf.mxu3 }
 0x166   :  { %v728_v31 = vadd.f32 %v657_v13, %v638_v49  ;;  %v748_v18 = vadd.f32 %v670_v22, %v639_v20  ;;  %v645_v49 = vunpack.c.h.bf16 %v642_v26 }
 0x168   :  { %v2402_v41 = vmul.f32 -1.442695, %v728_v31  ;;  %v2403_v19 = vmul.f32 -1.442695, %v748_v18  ;;  %v685_v33 = vpop.f32.mrf.mxu0 }
 0x16a   :  { %2550 = vpow2.f32 %v2402_v41 }
 0x16b   :  { %2552 = vpow2.f32 %v2403_v19 }
 0x16d   :  { %v659_v27 = vpop.f32.mrf.mxu2  ;;  %v672_v39 = vpop.f32.mrf.mxu3 }
 0x170   :  { %v2551_v32 = vpop.eup %2550 }
 0x171   :  { %v2553_v62 = vpop.eup %2552  ;;  %v732_v11 = vadd.f32 1.0, %v2551_v32 }
 0x172   :  { %v752_v1 = vadd.f32 1.0, %v2553_v62 }
 0x173   :  { %2554 = vrcp.f32 %v732_v11  ;;  %v697_v48 = vpop.f32.mrf.mxu1  ;;  %v744_v32 = vand.u32 2147483648, %v732_v11  ;;  %vm738_vm12 = vweird.f32 %v732_v11 }
 0x174   :  { %2556 = vrcp.f32 %v752_v1  ;;  %v786_v40 = vadd.f32 %v697_v48, %v644_v61  ;;  %v742_v48 = vand.u32 2147483647, %v732_v11  ;;  %vm758_vm0 = vweird.f32 %v752_v1 }
 0x176   :  { %v2405_v53 = vmul.f32 -1.442695, %v786_v40  ;;  %vm743_vm14 = vcmp.eq.f32.partialorder %v742_v48, 8.507059e+37  ;;  %v3260_v48 = vsel %vm2410_vm2, 1, %v3734_v14 }
 0x177   :  { %994 = vperm.xlu2 %2527, %v3260_v48  }
 0x178   :  { %2558 = vpow2.f32 %v2405_v53  ;;  %v637_v53 = vld [vmem:[#allocation4 + $0x14] sm:$0xf] }
 0x179   :  { %v2555_v20 = vpop.eup %2554  ;;  %v710_v13 = vpop.f32.mrf.mxu2 }
 0x17a   :  { %v2557_v33 = vpop.eup %2556  ;;  %v734_v22 = vmul.f32 %v2555_v20, %v732_v11  ;;  %v806_v19 = vadd.f32 %v710_v13, %v645_v49  ;;  %v3255_v27 = vpop.f32.mrf.mxu3  ;;  %vm739_vm11 = vweird.f32 %v2555_v20  ;;  %v745_v49 = vor.u32 1.1754944e-38, %v744_v32 }
 0x17b   :  { %v754_v39 = vmul.f32 %v2557_v33, %v752_v1  ;;  %v699_v31 = vpop.f32.mrf.mxu1  ;;  %vm740_vm13 = vmor %vm738_vm12, %vm739_vm11  ;;  %vm759_vm15 = vweird.f32 %v2557_v33 }
 0x17c   :  { %v735_v18 = vsub.f32 1.0, %v734_v22  ;;  %v2406_v41 = vmul.f32 -1.442695, %v806_v19  ;;  %v768_v31 = vadd.f32 %v3749_v17, %v683_v42  ;;  %v640_v22 = vunpack.c.l.bf16 %v637_v53  ;;  %vm760_vm1 = vmor %vm758_vm0, %vm759_vm15 }
 0x17d   :  { %v755_v62 = vsub.f32 1.0, %v754_v39 }
 0x17e   :  { %v2559_v60 = vpop.eup %2558  ;;  %v736_v24 = vmul.f32 %v2555_v20, %v735_v18  ;;  %2560 = vpow2.f32 %v2406_v41  ;;  %v764_v41 = vand.u32 2147483648, %v752_v1 }
 0x17f   :  { %v790_v26 = vadd.f32 1.0, %v2559_v60  ;;  %v756_v61 = vmul.f32 %v2557_v33, %v755_v62  ;;  %v762_v62 = vand.u32 2147483647, %v752_v1  ;;  %1052 = vperm.xlu2 %2527, %v3208_v55  }
 0x180   :  { %v737_v40 = vadd.f32 %v2555_v20, %v736_v24  ;;  %v765_v42 = vor.u32 1.1754944e-38, %v764_v41 }
 0x181   :  { %2562 = vrcp.f32 %v790_v26  ;;  %v712_v13 = vpop.f32.mrf.mxu2  ;;  %v757_v18 = vadd.f32 %v2557_v33, %v756_v61  ;;  %vm763_vm3 = vcmp.eq.f32.partialorder %v762_v62, 8.507059e+37  ;;  %v802_v1 = vand.u32 2147483648, %v790_v26 }
 0x182   :  { %v741_v19 = vsel %vm740_vm13, %v2555_v20, %v737_v40  ;;  %v725_v39 = vpop.f32.mrf.mxu3  ;;  %v800_v40 = vand.u32 2147483647, %v790_v26  ;;  %vm796_vm6 = vweird.f32 %v790_v26 }
 0x183   :  { %v746_v52 = vsel %vm743_vm14, %v745_v49, %v741_v19  ;;  %v761_v13 = vsel %vm760_vm1, %v2557_v33, %v757_v18  ;;  %v781_v49 = vpop.permute.xlu1 %780  ;;  %v803_v41 = vor.u32 1.1754944e-38, %v802_v1 }
 0x184   :  { %v2561_v12 = vpop.eup %2560  ;;  %v769_v60 = vmul.f32 %v768_v31, %v746_v52  ;;  %v766_v52 = vsel %vm763_vm3, %v765_v42, %v761_v13  ;;  %vm782_vm5 = vcmp.eq.s32.totalorder %v781_v49, 1  ;;  %vm801_vm8 = vcmp.eq.f32.partialorder %v800_v40, 8.507059e+37 }
 0x185   :  { %v810_v24 = vadd.f32 1.0, %v2561_v12  ;;  %v643_v12 = vld [vmem:[#allocation7 + $0x50] sm:$0xf]  ;;  %v772_v33 = vsub.f32 1.0, %v766_v52  ;;  %v774_v39 = vmul.f32 %v766_v52, %v3187_v0 }
 0x186   :  { %v770_v11 = vadd.f32 %v769_v60, %v640_v22  ;;  %v646_v18 = vunpack.c.l.bf16 %v643_v12 }
 0x187   :  { %v2563_v32 = vpop.eup %2562  ;;  %2564 = vrcp.f32 %v810_v24  ;;  %vm816_vm10 = vweird.f32 %v810_v24  ;;  %1422 = vperm.xlu2 %2527, %v3197_v58  }
 0x188   :  { %2566 = vtanh.f32 %v770_v11  ;;  %v792_v20 = vmul.f32 %v2563_v32, %v790_v26  ;;  %vm797_vm4 = vweird.f32 %v2563_v32  ;;  %v826_v11 = vadd.f32 %v3181_v34, %v3255_v27 }
 0x189   :  { %vm798_vm7 = vmor %vm796_vm6, %vm797_vm4  ;;  %v822_v26 = vand.u32 2147483648, %v810_v24 }
 0x18a   :  { %v793_v53 = vsub.f32 1.0, %v792_v20 }
 0x18c   :  { %v794_v61 = vmul.f32 %v2563_v32, %v793_v53 }
 0x18d   :  { %v2565_v45 = vpop.eup %2564 }
 0x18e   :  { %v2567_v31 = vpop.eup %2566  ;;  %v812_v22 = vmul.f32 %v2565_v45, %v810_v24  ;;  %v795_v19 = vadd.f32 %v2563_v32, %v794_v61  ;;  %vm817_vm9 = vweird.f32 %v2565_v45 }
 0x18f   :  { %v773_v14 = vmul.f32 %v2567_v31, %v772_v33  ;;  %vm818_vm11 = vmor %vm816_vm10, %vm817_vm9  ;;  %v823_v33 = vor.u32 1.1754944e-38, %v822_v26  ;;  %1694 = vperm.xlu2 %2527, %v3260_v48   ;;  %v3751_v48 = vld [vmem:[#allocation18_spill] sm:$0xff]  ;;  %v3760_v26 = vld [vmem:[#allocation24_spill] sm:$0xff] }
 0x190   :  { %v813_v60 = vsub.f32 1.0, %v812_v22  ;;  %v799_v62 = vsel %vm798_vm7, %v2563_v32, %v795_v19  ;;  %v820_v32 = vand.u32 2147483647, %v810_v24  ;;  %v839_v22 = vpop.permute.xlu1 %838 }
 0x191   :  { %v775_v13 = vadd.f32 %v774_v39, %v773_v14  ;;  %v804_v42 = vsel %vm801_vm8, %v803_v41, %v799_v62  ;;  %vm840_vm13 = vcmp.eq.s32.totalorder %v839_v22, 1  ;;  %v3752_v41 = vld [vmem:[#allocation33_spill] sm:$0xff]  ;;  %v3754_v62 = vld [vmem:[#allocation20_spill] sm:$0xff] }
 0x192   :  { %v827_v20 = vmul.f32 %v826_v11, %v804_v42  ;;  %v814_v53 = vmul.f32 %v2565_v45, %v813_v60  ;;  %vm821_vm12 = vcmp.eq.f32.partialorder %v820_v32, 8.507059e+37  ;;  %v3753_v60 = vld [vmem:[#allocation19_spill] sm:$0xff]  ;;  %v3755_v11 = vld [vmem:[#allocation34_spill] sm:$0xff] }
 0x193   :  { %v3269_v52 = vsel %vm782_vm5, %v775_v13, %v3187_v0  ;;  %v784_v1 = vsel %vm782_vm5, %v775_v13, 0.0  ;;  %v3756_v13 = vld [vmem:[#allocation21_spill] sm:$0xff]  ;;  %v3757_v42 = vld [vmem:[#allocation22_spill] sm:$0xff] }
 0x194   :  { %v843_v12 = vpack.c.bf16 %v784_v1, %v784_v1  ;;  %v861_v27 = vpack.c.bf16 %v3269_v52, %v3269_v52  ;;  %v828_v61 = vadd.f32 %v827_v20, %v646_v18  ;;  %v815_v40 = vadd.f32 %v2565_v45, %v814_v53  ;;  %v3758_v20 = vld [vmem:[#allocation35_spill] sm:$0xff]  ;;  %v3761_v1 = vld [vmem:[#allocation25_spill] sm:$0xff]  ;;  %v3762_v32 = vld [vmem:[#allocation26_spill] sm:$0xff] }
 0x195   :  { %v3759_v53 = vld [vmem:[#allocation23_spill] sm:$0xff] }
 0x196   :  { %845 = vst [vmem:[#allocation10 + $0x4] sm:$0xf] %v843_v12  ;;  %2568 = vtanh.f32 %v828_v61  ;;  %v819_v55 = vsel %vm818_vm11, %v2565_v45, %v815_v40  ;;  %870 = vmatmul.bf16.vlgmr.msrb.gmra.mxu0 %v861_v27  ;;  %883 = vmatmul.bf16.vlgmr.msrb.gmra.mxu1 %v861_v27  ;;  %v3763_v12 = vld [vmem:[#allocation27_spill] sm:$0xff]  ;;  %v3765_v61 = vld [vmem:[#allocation29_spill] sm:$0xff]  ;;  %v3766_v40 = vld [vmem:[#allocation30_spill] sm:$0xff] }
 0x197   :  { %896 = vmatmul.bf16.vlgmr.msrb.gmra.mxu2 %v861_v27  ;;  %1102 = vmatpush.bf16.msrb.mxu0 %v2943_v43  ;;  %v824_v0 = vsel %vm821_vm12, %v823_v33, %v819_v55  ;;  %v3764_v27 = vld [vmem:[#allocation28_spill] sm:$0xff]  ;;  %v3767_v55 = vld [vmem:[#allocation31_spill] sm:$0xff] }
 0x198   :  { %1116 = vmatpush.bf16.msrb.mxu1 %v2912_v7  ;;  %1129 = vmatpush.bf16.msrb.mxu2 %v2991_v36  ;;  %v830_v24 = vsub.f32 1.0, %v824_v0  ;;  %v832_v31 = vmul.f32 %v824_v0, %v3215_v5  ;;  %v850_v33 = vld [vmem:[#allocation4 + $0x18] sm:$0xff] }
 0x199   :  { %v852_v0 = vunpack.c.l.bf16 %v850_v33 }
 0x19b   :  { %1103 = vmatpush.bf16.msrb.mxu0 %v2946_v47 }
 0x19c   :  { %v2569_v49 = vpop.eup %2568  ;;  %1117 = vmatpush.bf16.msrb.mxu1 %v2921_v16  ;;  %1130 = vmatpush.bf16.msrb.mxu2 %v3014_v56 }
 0x19d   :  { %v831_v45 = vmul.f32 %v2569_v49, %v830_v24  ;;  %v853_v24 = vunpack.c.h.bf16 %v850_v33 }
 0x19f   :  { %v833_v19 = vadd.f32 %v832_v31, %v831_v45  ;;  %1104 = vmatpush.bf16.msrb.mxu0 %v2958_v59 }
 0x1a0   :  { %1118 = vmatpush.bf16.msrb.mxu1 %v2930_v25  ;;  %1131 = vmatpush.bf16.msrb.mxu2 %v3029_v9 }
 0x1a1   :  { %v3286_v58 = vsel %vm840_vm13, %v833_v19, %v3215_v5  ;;  %v842_v14 = vsel %vm840_vm13, %v833_v19, 0.0  ;;  %v3750_v5 = vld [vmem:[#allocation32_spill] sm:$0xff] }
 0x1a2   :  { %v846_v39 = vpack.c.bf16 %v842_v14, %v842_v14  ;;  %v901_v18 = vpack.c.bf16 %v3286_v58, %v3286_v58  ;;  %2120 = vperm.xlu2 %2527, %v3750_v5  }
 0x1a3   :  { %1105 = vmatpush.bf16.msrb.mxu0 %v2970_v10 }
 0x1a4   :  { %848 = vst [vmem:[#allocation11 + $0x18] sm:$0xf] %v846_v39  ;;  %910 = vmatmul.bf16.vlgmr.msrb.gmra.mxu3 %v901_v18  ;;  %1119 = vmatpush.bf16.msrb.mxu1 %v2939_v38 }
 0x1a5   :  { %1142 = vmatpush.bf16.msrb.mxu3 %v3000_v46  ;;  %1132 = vmatpush.bf16.msrb.mxu2 %v3043_v29 }
 0x1a6   :  { %923 = vmatmul.bf16.vlgmr.msra.gmra.mxu0 %v901_v18  ;;  %936 = vmatmul.bf16.vlgmr.msra.gmra.mxu1 %v901_v18 }
 0x1a7   :  { %1106 = vmatpush.bf16.msrb.mxu0 %v2982_v30 }
 0x1a8   :  { %1120 = vmatpush.bf16.msrb.mxu1 %v2953_v51 }
 0x1a9   :  { %1143 = vmatpush.bf16.msrb.mxu3 %v3020_v2  ;;  %1133 = vmatpush.bf16.msrb.mxu2 %v3053_v44 }
 0x1ab   :  { %1107 = vmatpush.bf16.msrb.mxu0 %v3006_v54 }
 0x1ac   :  { %1121 = vmatpush.bf16.msrb.mxu1 %v2965_v63 }
 0x1ad   :  { %1144 = vmatpush.bf16.msrb.mxu3 %v3034_v21  ;;  %1134 = vmatpush.bf16.msrb.mxu2 %v3063_v4 }
 0x1af   :  { %1108 = vmatpush.bf16.msrb.mxu0 %v3024_v6 }
 0x1b0   :  { %1122 = vmatpush.bf16.msrb.mxu1 %v2977_v15 }
 0x1b1   :  { %1145 = vmatpush.bf16.msrb.mxu3 %v3048_v37  ;;  %1135 = vmatpush.bf16.msrb.mxu2 %v3071_v23 }
 0x1b3   :  { %1109 = vmatpush.bf16.msrb.mxu0 %v3040_v28 }
 0x1b4   :  { %1123 = vmatpush.bf16.msrb.mxu1 %v2989_v35 }
 0x1b5   :  { %1146 = vmatpush.bf16.msrb.mxu3 %v3058_v57  ;;  %1136 = vmatpush.bf16.msrb.mxu2 %v3079_v50 }
 0x1b7   :  { %1290 = vmatpush.bf16.msra.mxu0 %v2910_v3 }
 0x1b8   :  { %1303 = vmatpush.bf16.msra.mxu1 %v2914_v8 }
 0x1b9   :  { %1147 = vmatpush.bf16.msrb.mxu3 %v3752_v41 }
 0x1bb   :  { %1291 = vmatpush.bf16.msra.mxu0 %v3751_v48 }
 0x1bc   :  { %1304 = vmatpush.bf16.msra.mxu1 %v3753_v60 }
 0x1bd   :  { %1148 = vmatpush.bf16.msrb.mxu3 %v3755_v11 }
 0x1bf   :  { %1292 = vmatpush.bf16.msra.mxu0 %v3754_v62 }
 0x1c0   :  { %1305 = vmatpush.bf16.msra.mxu1 %v3756_v13 }
 0x1c1   :  { %1149 = vmatpush.bf16.msrb.mxu3 %v3758_v20 }
 0x1c3   :  { %1293 = vmatpush.bf16.msra.mxu0 %v3757_v42 }
 0x1c4   :  { %1306 = vmatpush.bf16.msra.mxu1 %v3759_v53 }
 0x1c7   :  { %1294 = vmatpush.bf16.msra.mxu0 %v3760_v26 }
 0x1c8   :  { %1307 = vmatpush.bf16.msra.mxu1 %v3761_v1 }
 0x1cb   :  { %1295 = vmatpush.bf16.msra.mxu0 %v3762_v32 }
 0x1cc   :  { %1308 = vmatpush.bf16.msra.mxu1 %v3763_v12 }
 0x1cf   :  { %1296 = vmatpush.bf16.msra.mxu0 %v3764_v27  ;;  %v856_v27 = vld [vmem:[#allocation7 + $0x3c] sm:$0xff] }
 0x1d0   :  { %1309 = vmatpush.bf16.msra.mxu1 %v3765_v61 }
 0x1d3   :  { %1297 = vmatpush.bf16.msra.mxu0 %v3766_v40 }
 0x1d4   :  { %1310 = vmatpush.bf16.msra.mxu1 %v3767_v55  ;;  %v859_v55 = vunpack.c.h.bf16 %v856_v27 }
 0x213   :  { %v871_v49 = vpop.f32.mrf.mxu0  ;;  %v884_v45 = vpop.f32.mrf.mxu1 }
 0x214   :  { %v942_v31 = vadd.f32 %v871_v49, %v852_v0  ;;  %v962_v22 = vadd.f32 %v884_v45, %v853_v24  ;;  %v858_v24 = vunpack.c.l.bf16 %v856_v27 }
 0x216   :  { %v2408_v19 = vmul.f32 -1.442695, %v942_v31  ;;  %v2409_v14 = vmul.f32 -1.442695, %v962_v22 }
 0x218   :  { %2570 = vpow2.f32 %v2408_v19 }
 0x219   :  { %2572 = vpow2.f32 %v2409_v14 }
 0x21a   :  { %v897_v39 = vpop.f32.mrf.mxu2 }
 0x21b   :  { %v873_v18 = vpop.f32.mrf.mxu0  ;;  %v886_v5 = vpop.f32.mrf.mxu1 }
 0x21e   :  { %v2571_v61 = vpop.eup %2570 }
 0x21f   :  { %v2573_v12 = vpop.eup %2572  ;;  %v946_v40 = vadd.f32 1.0, %v2571_v61 }
 0x220   :  { %v966_v32 = vadd.f32 1.0, %v2573_v12 }
 0x221   :  { %2574 = vrcp.f32 %v946_v40  ;;  %v958_v26 = vand.u32 2147483648, %v946_v40  ;;  %v956_v42 = vand.u32 2147483647, %v946_v40  ;;  %vm952_vm15 = vweird.f32 %v946_v40 }
 0x222   :  { %2576 = vrcp.f32 %v966_v32  ;;  %v899_v33 = vpop.f32.mrf.mxu2  ;;  %vm972_vm3 = vweird.f32 %v966_v32 }
 0x223   :  { %v924_v20 = vpop.f32.mrf.mxu0  ;;  %v3331_v1 = vpop.f32.mrf.mxu1  ;;  %v959_v41 = vor.u32 1.1754944e-38, %v958_v26  ;;  %vm957_vm1 = vcmp.eq.f32.partialorder %v956_v42, 8.507059e+37 }
 0x224   :  { %v1020_v0 = vadd.f32 %v924_v20, %v859_v55  ;;  %v851_v20 = vld [vmem:[#allocation4 + $0x20] sm:$0xf] }
 0x226   :  { %v2412_v49 = vmul.f32 -1.442695, %v1020_v0 }
 0x227   :  { %v2575_v45 = vpop.eup %2574  ;;  %v911_v31 = vpop.f32.mrf.mxu3 }
 0x228   :  { %v2577_v22 = vpop.eup %2576  ;;  %v948_v19 = vmul.f32 %v2575_v45, %v946_v40  ;;  %2578 = vpow2.f32 %v2412_v49  ;;  %v1000_v14 = vadd.f32 %v911_v31, %v858_v24  ;;  %vm953_vm14 = vweird.f32 %v2575_v45 }
 0x229   :  { %v968_v18 = vmul.f32 %v2577_v22, %v966_v32  ;;  %vm954_vm0 = vmor %vm952_vm15, %vm953_vm14  ;;  %v854_v31 = vunpack.c.l.bf16 %v851_v20  ;;  %vm973_vm2 = vweird.f32 %v2577_v22  ;;  %v976_v40 = vand.u32 2147483647, %v966_v32 }
 0x22a   :  { %v949_v5 = vsub.f32 1.0, %v948_v19  ;;  %v2411_v61 = vmul.f32 -1.442695, %v1000_v14  ;;  %vm974_vm4 = vmor %vm972_vm3, %vm973_vm2 }
 0x22b   :  { %v969_v12 = vsub.f32 1.0, %v968_v18  ;;  %v926_v11 = vpop.f32.mrf.mxu0  ;;  %v939_v53 = vpop.f32.mrf.mxu1  ;;  %vm977_vm5 = vcmp.eq.f32.partialorder %v976_v40, 8.507059e+37 }
 0x22c   :  { %v950_v33 = vmul.f32 %v2575_v45, %v949_v5  ;;  %2580 = vpow2.f32 %v2411_v61  ;;  %v982_v11 = vadd.f32 %v3749_v17, %v897_v39  ;;  %v978_v61 = vand.u32 2147483648, %v966_v32 }
 0x22d   :  { %v970_v27 = vmul.f32 %v2577_v22, %v969_v12 }
 0x22e   :  { %v2579_v55 = vpop.eup %2578  ;;  %v951_v0 = vadd.f32 %v2575_v45, %v950_v33 }
 0x22f   :  { %v3333_v49 = vadd.f32 1.0, %v2579_v55  ;;  %v913_v24 = vpop.f32.mrf.mxu3  ;;  %v971_v14 = vadd.f32 %v2577_v22, %v970_v27 }
 0x230   :  { %v955_v19 = vsel %vm954_vm0, %v2575_v45, %v951_v0  ;;  %v979_v45 = vor.u32 1.1754944e-38, %v978_v61  ;;  %v995_v24 = vpop.permute.xlu2 %994  ;;  %v857_v61 = vld [vmem:[#allocation7 + $0x44] sm:$0xf] }
 0x231   :  { %v960_v53 = vsel %vm957_vm1, %v959_v41, %v955_v19  ;;  %2582 = vrcp.f32 %v3333_v49  ;;  %v975_v33 = vsel %vm974_vm4, %v2577_v22, %v971_v14  ;;  %vm996_vm6 = vcmp.eq.s32.totalorder %v995_v24, 1 }
 0x232   :  { %v2581_v18 = vpop.eup %2580  ;;  %v983_v5 = vmul.f32 %v982_v11, %v960_v53  ;;  %v980_v17 = vsel %vm977_vm5, %v979_v45, %v975_v33  ;;  %vm1030_vm12 = vweird.f32 %v3333_v49 }
 0x233   :  { %v1004_v12 = vadd.f32 1.0, %v2581_v18  ;;  %v986_v20 = vsub.f32 1.0, %v980_v17  ;;  %v988_v32 = vmul.f32 %v980_v17, %v3269_v52 }
 0x234   :  { %v984_v26 = vadd.f32 %v983_v5, %v854_v31 }
 0x235   :  { %2584 = vrcp.f32 %v1004_v12  ;;  %v1016_v11 = vand.u32 2147483648, %v1004_v12  ;;  %v1014_v14 = vand.u32 2147483647, %v1004_v12  ;;  %vm1010_vm8 = vweird.f32 %v1004_v12 }
 0x236   :  { %2586 = vtanh.f32 %v984_v26 }
 0x237   :  { %v2583_v42 = vpop.eup %2582  ;;  %v1017_v17 = vor.u32 1.1754944e-38, %v1016_v11  ;;  %vm1015_vm10 = vcmp.eq.f32.partialorder %v1014_v14, 8.507059e+37 }
 0x238   :  { %v1026_v41 = vmul.f32 %v2583_v42, %v3333_v49  ;;  %vm1031_vm11 = vweird.f32 %v2583_v42 }
 0x239   :  { %vm1032_vm13 = vmor %vm1030_vm12, %vm1031_vm11 }
 0x23a   :  { %v1027_v0 = vsub.f32 1.0, %v1026_v41  ;;  %v1040_v41 = vadd.f32 %v3181_v34, %v3331_v1  ;;  %v1034_v34 = vand.u32 2147483647, %v3333_v49 }
 0x23b   :  { %v2585_v39 = vpop.eup %2584 }
 0x23c   :  { %v2587_v27 = vpop.eup %2586  ;;  %v1006_v55 = vmul.f32 %v2585_v39, %v1004_v12  ;;  %vm1011_vm7 = vweird.f32 %v2585_v39  ;;  %v1028_v40 = vmul.f32 %v2583_v42, %v1027_v0  ;;  %v1036_v0 = vand.u32 2147483648, %v3333_v49 }
 0x23d   :  { %v987_v19 = vmul.f32 %v2587_v27, %v986_v20  ;;  %vm1012_vm9 = vmor %vm1010_vm8, %vm1011_vm7  ;;  %v860_v20 = vunpack.c.l.bf16 %v857_v61  ;;  %vm1035_vm14 = vcmp.eq.f32.partialorder %v1034_v34, 8.507059e+37  ;;  %v1064_v34 = vld [vmem:[#allocation4 + $0x24] sm:$0xff] }
 0x23e   :  { %v1007_v31 = vsub.f32 1.0, %v1006_v55  ;;  %v1029_v55 = vadd.f32 %v2583_v42, %v1028_v40  ;;  %v1037_v24 = vor.u32 1.1754944e-38, %v1036_v0  ;;  %v3769_v40 = vld [vmem:[#allocation22_spill] sm:$0xff] }
 0x23f   :  { %v989_v22 = vadd.f32 %v988_v32, %v987_v19  ;;  %v3779_v0 = vld [vmem:[#allocation30_spill] sm:$0xff] }
 0x240   :  { %v1008_v53 = vmul.f32 %v2585_v39, %v1007_v31 }
 0x241   :  { %v3340_v18 = vsel %vm996_vm6, %v989_v22, %v3269_v52  ;;  %v998_v5 = vsel %vm996_vm6, %v989_v22, 0.0  ;;  %v1053_v22 = vpop.permute.xlu2 %1052 }
 0x242   :  { %v1057_v26 = vpack.c.bf16 %v998_v5, %v998_v5  ;;  %v1075_v33 = vpack.c.bf16 %v3340_v18, %v3340_v18  ;;  %v1009_v45 = vadd.f32 %v2585_v39, %v1008_v53  ;;  %vm1054_vm15 = vcmp.eq.s32.totalorder %v1053_v22, 1 }
 0x244   :  { %1059 = vst [vmem:[#allocation10 + $0x8] sm:$0xf] %v1057_v26  ;;  %v1013_v27 = vsel %vm1012_vm9, %v2585_v39, %v1009_v45  ;;  %1084 = vmatmul.bf16.vlgmr.msra.gmra.mxu2 %v1075_v33  ;;  %1097 = vmatmul.bf16.vlgmr.msra.gmra.mxu3 %v1075_v33  ;;  %v1033_v39 = vsel %vm1032_vm13, %v2583_v42, %v1029_v55  ;;  %v3770_v26 = vld [vmem:[#allocation23_spill] sm:$0xff]  ;;  %v3772_v45 = vld [vmem:[#allocation24_spill] sm:$0xff]  ;;  %v3778_v55 = vld [vmem:[#allocation29_spill] sm:$0xff] }
 0x245   :  { %v1018_v52 = vsel %vm1015_vm10, %v1017_v17, %v1013_v27  ;;  %1110 = vmatmul.bf16.vlgmr.msrb.gmra.mxu0 %v1075_v33  ;;  %1316 = vmatpush.bf16.msra.mxu2 %v2943_v43  ;;  %v1038_v19 = vsel %vm1035_vm14, %v1037_v24, %v1033_v39  ;;  %v3771_v33 = vld [vmem:[#allocation34_spill] sm:$0xff]  ;;  %v3773_v17 = vld [vmem:[#allocation25_spill] sm:$0xff]  ;;  %v3776_v27 = vld [vmem:[#allocation27_spill] sm:$0xff]  ;;  %v1066_v39 = vunpack.c.l.bf16 %v1064_v34  ;;  %v1067_v24 = vunpack.c.h.bf16 %v1064_v34 }
 0x246   :  { %v1041_v12 = vmul.f32 %v1040_v41, %v1018_v52  ;;  %1330 = vmatpush.bf16.msra.mxu3 %v2912_v7  ;;  %1343 = vmatpush.bf16.msrb.mxu0 %v2991_v36  ;;  %v1044_v49 = vsub.f32 1.0, %v1038_v19  ;;  %v1046_v42 = vmul.f32 %v1038_v19, %v3286_v58  ;;  %v3774_v41 = vld [vmem:[#allocation35_spill] sm:$0xff]  ;;  %v3777_v52 = vld [vmem:[#allocation28_spill] sm:$0xff] }
 0x248   :  { %v1042_v1 = vadd.f32 %v1041_v12, %v860_v20  ;;  %v3775_v20 = vld [vmem:[#allocation26_spill] sm:$0xff]  ;;  %v3780_v12 = vld [vmem:[#allocation31_spill] sm:$0xff] }
 0x249   :  { %1317 = vmatpush.bf16.msra.mxu2 %v2946_v47 }
 0x24a   :  { %2588 = vtanh.f32 %v1042_v1  ;;  %1331 = vmatpush.bf16.msra.mxu3 %v2921_v16  ;;  %1344 = vmatpush.bf16.msrb.mxu0 %v3014_v56 }
 0x24d   :  { %1318 = vmatpush.bf16.msra.mxu2 %v2958_v59 }
 0x24e   :  { %1332 = vmatpush.bf16.msra.mxu3 %v2930_v25  ;;  %1345 = vmatpush.bf16.msrb.mxu0 %v3029_v9 }
 0x250   :  { %v2589_v32 = vpop.eup %2588 }
 0x251   :  { %v1045_v31 = vmul.f32 %v2589_v32, %v1044_v49  ;;  %1319 = vmatpush.bf16.msra.mxu2 %v2970_v10 }
 0x252   :  { %1333 = vmatpush.bf16.msra.mxu3 %v2939_v38  ;;  %1346 = vmatpush.bf16.msrb.mxu0 %v3043_v29 }
 0x253   :  { %v1047_v11 = vadd.f32 %v1046_v42, %v1045_v31 }
 0x255   :  { %v3363_v53 = vsel %vm1054_vm15, %v1047_v11, %v3286_v58  ;;  %v1056_v14 = vsel %vm1054_vm15, %v1047_v11, 0.0  ;;  %1320 = vmatpush.bf16.msra.mxu2 %v2982_v30  ;;  %v3768_v58 = vld [vmem:[#allocation33_spill] sm:$0xff] }
 0x256   :  { %v1060_v5 = vpack.c.bf16 %v1056_v14, %v1056_v14  ;;  %v1115_v61 = vpack.c.bf16 %v3363_v53, %v3363_v53  ;;  %1334 = vmatpush.bf16.msra.mxu3 %v2953_v51  ;;  %1347 = vmatpush.bf16.msrb.mxu0 %v3053_v44 }
 0x258   :  { %1062 = vst [vmem:[#allocation11 + $0x14] sm:$0xf] %v1060_v5  ;;  %1124 = vmatmul.bf16.vlgmr.msrb.gmra.mxu1 %v1115_v61  ;;  %1137 = vmatmul.bf16.vlgmr.msrb.gmra.mxu2 %v1115_v61 }
 0x259   :  { %1150 = vmatmul.bf16.vlgmr.msrb.gmra.mxu3 %v1115_v61  ;;  %1356 = vmatpush.bf16.msrb.mxu1 %v3000_v46  ;;  %v1070_v61 = vld [vmem:[#allocation7 + $0x30] sm:$0xff] }
 0x25a   :  { %1321 = vmatpush.bf16.msra.mxu2 %v3006_v54  ;;  %1335 = vmatpush.bf16.msra.mxu3 %v2965_v63 }
 0x25b   :  { %1348 = vmatpush.bf16.msrb.mxu0 %v3063_v4 }
 0x25d   :  { %1357 = vmatpush.bf16.msrb.mxu1 %v3020_v2 }
 0x25e   :  { %1322 = vmatpush.bf16.msra.mxu2 %v3024_v6  ;;  %1336 = vmatpush.bf16.msra.mxu3 %v2977_v15 }
 0x25f   :  { %1349 = vmatpush.bf16.msrb.mxu0 %v3071_v23 }
 0x261   :  { %1358 = vmatpush.bf16.msrb.mxu1 %v3034_v21 }
 0x262   :  { %1323 = vmatpush.bf16.msra.mxu2 %v3040_v28  ;;  %1337 = vmatpush.bf16.msra.mxu3 %v2989_v35 }
 0x263   :  { %1350 = vmatpush.bf16.msrb.mxu0 %v3079_v50 }
 0x265   :  { %1359 = vmatpush.bf16.msrb.mxu1 %v3048_v37 }
 0x266   :  { %1504 = vmatpush.bf16.msrb.mxu2 %v2910_v3  ;;  %1517 = vmatpush.bf16.msrb.mxu3 %v2914_v8 }
 0x269   :  { %1360 = vmatpush.bf16.msrb.mxu1 %v3058_v57 }
 0x26a   :  { %1505 = vmatpush.bf16.msrb.mxu2 %v3751_v48  ;;  %1518 = vmatpush.bf16.msrb.mxu3 %v3753_v60 }
 0x26d   :  { %1361 = vmatpush.bf16.msrb.mxu1 %v3768_v58 }
 0x26e   :  { %1506 = vmatpush.bf16.msrb.mxu2 %v3754_v62  ;;  %1519 = vmatpush.bf16.msrb.mxu3 %v3756_v13 }
 0x271   :  { %1362 = vmatpush.bf16.msrb.mxu1 %v3771_v33 }
 0x272   :  { %1507 = vmatpush.bf16.msrb.mxu2 %v3769_v40  ;;  %1520 = vmatpush.bf16.msrb.mxu3 %v3770_v26 }
 0x275   :  { %1363 = vmatpush.bf16.msrb.mxu1 %v3774_v41 }
 0x276   :  { %1508 = vmatpush.bf16.msrb.mxu2 %v3772_v45  ;;  %1521 = vmatpush.bf16.msrb.mxu3 %v3773_v17  ;;  %v1073_v17 = vunpack.c.h.bf16 %v1070_v61  ;;  %v1065_v45 = vld [vmem:[#allocation4 + $0x2c] sm:$0xf] }
 0x277   :  { %v1068_v26 = vunpack.c.l.bf16 %v1065_v45 }
 0x27a   :  { %1509 = vmatpush.bf16.msrb.mxu2 %v3775_v20  ;;  %1522 = vmatpush.bf16.msrb.mxu3 %v3776_v27 }
 0x27e   :  { %1510 = vmatpush.bf16.msrb.mxu2 %v3777_v52  ;;  %1523 = vmatpush.bf16.msrb.mxu3 %v3778_v55 }
 0x282   :  { %1511 = vmatpush.bf16.msrb.mxu2 %v3779_v0  ;;  %1524 = vmatpush.bf16.msrb.mxu3 %v3780_v12  ;;  %v1072_v12 = vunpack.c.l.bf16 %v1070_v61 }
 0x2c2   :  { %v1111_v1 = vpop.f32.mrf.mxu0 }
 0x2c7   :  { %v1085_v19 = vpop.f32.mrf.mxu2  ;;  %v1098_v49 = vpop.f32.mrf.mxu3 }
 0x2c8   :  { %v1156_v32 = vadd.f32 %v1085_v19, %v1066_v39  ;;  %v1176_v31 = vadd.f32 %v1098_v49, %v1067_v24 }
 0x2ca   :  { %v2414_v42 = vmul.f32 -1.442695, %v1156_v32  ;;  %v2415_v22 = vmul.f32 -1.442695, %v1176_v31  ;;  %v1113_v11 = vpop.f32.mrf.mxu0 }
 0x2cc   :  { %2590 = vpow2.f32 %v2414_v42 }
 0x2cd   :  { %2592 = vpow2.f32 %v2415_v22 }
 0x2cf   :  { %v1087_v14 = vpop.f32.mrf.mxu2  ;;  %v1100_v5 = vpop.f32.mrf.mxu3 }
 0x2d2   :  { %v2591_v55 = vpop.eup %2590 }
 0x2d3   :  { %v2593_v0 = vpop.eup %2592  ;;  %v1160_v52 = vadd.f32 1.0, %v2591_v55 }
 0x2d4   :  { %v1180_v27 = vadd.f32 1.0, %v2593_v0 }
 0x2d5   :  { %2594 = vrcp.f32 %v1160_v52  ;;  %v1125_v20 = vpop.f32.mrf.mxu1  ;;  %v1172_v5 = vand.u32 2147483648, %v1160_v52  ;;  %vm1166_vm1 = vweird.f32 %v1160_v52 }
 0x2d6   :  { %2596 = vrcp.f32 %v1180_v27  ;;  %v1214_v34 = vadd.f32 %v1125_v20, %v1072_v12  ;;  %v1170_v20 = vand.u32 2147483647, %v1160_v52  ;;  %v1192_v45 = vand.u32 2147483648, %v1180_v27 }
 0x2d7   :  { %vm1186_vm5 = vweird.f32 %v1180_v27 }
 0x2d8   :  { %v2417_v39 = vmul.f32 -1.442695, %v1214_v34  ;;  %vm1171_vm3 = vcmp.eq.f32.partialorder %v1170_v20, 8.507059e+37 }
 0x2da   :  { %2598 = vpow2.f32 %v2417_v39 }
 0x2db   :  { %v2595_v24 = vpop.eup %2594  ;;  %v1138_v19 = vpop.f32.mrf.mxu2 }
 0x2dc   :  { %v2597_v49 = vpop.eup %2596  ;;  %v1162_v32 = vmul.f32 %v2595_v24, %v1160_v52  ;;  %v1234_v31 = vadd.f32 %v1138_v19, %v1073_v17  ;;  %v3403_v42 = vpop.f32.mrf.mxu3  ;;  %vm1167_vm0 = vweird.f32 %v2595_v24  ;;  %v1173_v17 = vor.u32 1.1754944e-38, %v1172_v5 }
 0x2dd   :  { %v1182_v22 = vmul.f32 %v2597_v49, %v1180_v27  ;;  %v1127_v11 = vpop.f32.mrf.mxu1  ;;  %vm1168_vm2 = vmor %vm1166_vm1, %vm1167_vm0  ;;  %vm1187_vm4 = vweird.f32 %v2597_v49  ;;  %v1190_v5 = vand.u32 2147483647, %v1180_v27 }
 0x2de   :  { %v1163_v14 = vsub.f32 1.0, %v1162_v32  ;;  %v2418_v55 = vmul.f32 -1.442695, %v1234_v31  ;;  %v3408_v32 = vld [vmem:[%s3666_s4] ss:$0 sm:$0xff]  ;;  %vm1188_vm6 = vmor %vm1186_vm5, %vm1187_vm4 }
 0x2df   :  { %v1183_v0 = vsub.f32 1.0, %v1182_v22  ;;  %v1196_v31 = vadd.f32 %v3408_v32, %v1111_v1  ;;  %v1193_v1 = vor.u32 1.1754944e-38, %v1192_v45  ;;  %vm1191_vm7 = vcmp.eq.f32.partialorder %v1190_v5, 8.507059e+37 }
 0x2e0   :  { %v1164_v41 = vmul.f32 %v2595_v24, %v1163_v14  ;;  %2600 = vpow2.f32 %v2418_v55  ;;  %v2599_v12 = vpop.eup %2598 }
 0x2e1   :  { %v1184_v61 = vmul.f32 %v2597_v49, %v1183_v0  ;;  %v1218_v39 = vadd.f32 1.0, %v2599_v12 }
 0x2e2   :  { %v1165_v34 = vadd.f32 %v2595_v24, %v1164_v41 }
 0x2e3   :  { %v1140_v19 = vpop.f32.mrf.mxu2  ;;  %2602 = vrcp.f32 %v1218_v39  ;;  %v1185_v55 = vadd.f32 %v2597_v49, %v1184_v61  ;;  %vm1224_vm9 = vweird.f32 %v1218_v39 }
 0x2e4   :  { %v1169_v22 = vsel %vm1168_vm2, %v2595_v24, %v1165_v34  ;;  %v1153_v11 = vpop.f32.mrf.mxu3 }
 0x2e5   :  { %v1174_v14 = vsel %vm1171_vm3, %v1173_v17, %v1169_v22  ;;  %v1189_v19 = vsel %vm1188_vm6, %v2597_v49, %v1185_v55  ;;  %v1230_v17 = vand.u32 2147483648, %v1218_v39  ;;  %v1071_v22 = vld [vmem:[#allocation7 + $0x38] sm:$0xf] }
 0x2e6   :  { %v2601_v41 = vpop.eup %2600  ;;  %v1197_v52 = vmul.f32 %v1196_v31, %v1174_v14  ;;  %v1194_v20 = vsel %vm1191_vm7, %v1193_v1, %v1189_v19  ;;  %v1228_v31 = vand.u32 2147483647, %v1218_v39  ;;  %v1074_v5 = vunpack.c.l.bf16 %v1071_v22  ;;  %v3415_v1 = vld [vmem:[%s3666_s4 + $0x1] ss:$0 sm:$0xff] }
 0x2e7   :  { %v1238_v0 = vadd.f32 1.0, %v2601_v41  ;;  %v1200_v14 = vsub.f32 1.0, %v1194_v20  ;;  %v1202_v55 = vmul.f32 %v1194_v20, %v3340_v18 }
 0x2e8   :  { %v1198_v12 = vadd.f32 %v1197_v52, %v1068_v26  ;;  %v1209_v26 = vpop.permute.xlu0 %1208  ;;  %vm1229_vm12 = vcmp.eq.f32.partialorder %v1228_v31, 8.507059e+37 }
 0x2e9   :  { %2604 = vrcp.f32 %v1238_v0  ;;  %v2603_v40 = vpop.eup %2602  ;;  %vm1210_vm10 = vcmp.eq.s32.totalorder %v1209_v26, 1  ;;  %vm1244_vm13 = vweird.f32 %v1238_v0  ;;  %v1248_v31 = vand.u32 2147483647, %v1238_v0 }
 0x2ea   :  { %2606 = vtanh.f32 %v1198_v12  ;;  %v1220_v24 = vmul.f32 %v2603_v40, %v1218_v39  ;;  %vm1225_vm8 = vweird.f32 %v2603_v40  ;;  %v1231_v12 = vor.u32 1.1754944e-38, %v1230_v17 }
 0x2eb   :  { %vm1226_vm11 = vmor %vm1224_vm9, %vm1225_vm8  ;;  %vm1249_vm0 = vcmp.eq.f32.partialorder %v1248_v31, 8.507059e+37  ;;  %v3788_v31 = vld [vmem:[#allocation28_spill] sm:$0xff] }
 0x2ec   :  { %v1221_v34 = vsub.f32 1.0, %v1220_v24  ;;  %v1254_v24 = vadd.f32 %v3415_v1, %v3403_v42 }
 0x2ee   :  { %v1222_v11 = vmul.f32 %v2603_v40, %v1221_v34 }
 0x2ef   :  { %v2605_v61 = vpop.eup %2604 }
 0x2f0   :  { %v2607_v27 = vpop.eup %2606  ;;  %v1240_v41 = vmul.f32 %v2605_v61, %v1238_v0  ;;  %v1223_v52 = vadd.f32 %v2603_v40, %v1222_v11  ;;  %vm1245_vm14 = vweird.f32 %v2605_v61  ;;  %v1250_v11 = vand.u32 2147483648, %v1238_v0 }
 0x2f1   :  { %v1201_v49 = vmul.f32 %v2607_v27, %v1200_v14  ;;  %vm1246_vm15 = vmor %vm1244_vm13, %vm1245_vm14 }
 0x2f2   :  { %v1241_v45 = vsub.f32 1.0, %v1240_v41  ;;  %v1227_v19 = vsel %vm1226_vm11, %v2603_v40, %v1223_v52 }
 0x2f3   :  { %v1203_v34 = vadd.f32 %v1202_v55, %v1201_v49  ;;  %v1232_v20 = vsel %vm1229_vm12, %v1231_v12, %v1227_v19  ;;  %v1251_v49 = vor.u32 1.1754944e-38, %v1250_v11  ;;  %v3784_v11 = vld [vmem:[#allocation24_spill] sm:$0xff] }
 0x2f4   :  { %v1242_v39 = vmul.f32 %v2605_v61, %v1241_v45  ;;  %v1255_v14 = vmul.f32 %v1254_v24, %v1232_v20  ;;  %v1267_v45 = vpop.permute.xlu1 %1266  ;;  %v3783_v20 = vld [vmem:[#allocation35_spill] sm:$0xff] }
 0x2f5   :  { %v3421_v17 = vsel %vm1210_vm10, %v1203_v34, %v3340_v18  ;;  %v1212_v40 = vsel %vm1210_vm10, %v1203_v34, 0.0  ;;  %vm1268_vm1 = vcmp.eq.s32.totalorder %v1267_v45, 1 }
 0x2f6   :  { %v1243_v22 = vadd.f32 %v2605_v61, %v1242_v39  ;;  %v1271_v27 = vpack.c.bf16 %v1212_v40, %v1212_v40  ;;  %v1289_v41 = vpack.c.bf16 %v3421_v17, %v3421_v17  ;;  %v1256_v42 = vadd.f32 %v1255_v14, %v1074_v5  ;;  %v3782_v39 = vld [vmem:[#allocation23_spill] sm:$0xff]  ;;  %v3785_v14 = vld [vmem:[#allocation25_spill] sm:$0xff]  ;;  %v3786_v40 = vld [vmem:[#allocation26_spill] sm:$0xff] }
 0x2f8   :  { %v1247_v52 = vsel %vm1246_vm15, %v2605_v61, %v1243_v22  ;;  %1273 = vst [vmem:[#allocation10 + $0xc] sm:$0xf] %v1271_v27  ;;  %1298 = vmatmul.bf16.vlgmr.msra.gmra.mxu0 %v1289_v41  ;;  %1311 = vmatmul.bf16.vlgmr.msra.gmra.mxu1 %v1289_v41  ;;  %2608 = vtanh.f32 %v1256_v42  ;;  %v3787_v22 = vld [vmem:[#allocation27_spill] sm:$0xff]  ;;  %v3789_v27 = vld [vmem:[#allocation29_spill] sm:$0xff] }
 0x2f9   :  { %1324 = vmatmul.bf16.vlgmr.msra.gmra.mxu2 %v1289_v41  ;;  %1530 = vmatpush.bf16.msra.mxu0 %v2943_v43  ;;  %v1252_v18 = vsel %vm1249_vm0, %v1251_v49, %v1247_v52  ;;  %v3790_v41 = vld [vmem:[#allocation30_spill] sm:$0xff]  ;;  %v3791_v42 = vld [vmem:[#allocation31_spill] sm:$0xff] }
 0x2fa   :  { %1544 = vmatpush.bf16.msra.mxu1 %v2912_v7  ;;  %1557 = vmatpush.bf16.msra.mxu2 %v2991_v36  ;;  %v1258_v0 = vsub.f32 1.0, %v1252_v18  ;;  %v1260_v55 = vmul.f32 %v1252_v18, %v3363_v53  ;;  %v1278_v52 = vld [vmem:[#allocation4 + $0x30] sm:$0xff] }
 0x2fb   :  { %v1280_v49 = vunpack.c.l.bf16 %v1278_v52  ;;  %v1281_v18 = vunpack.c.h.bf16 %v1278_v52 }
 0x2fd   :  { %1531 = vmatpush.bf16.msra.mxu0 %v2946_v47 }
 0x2fe   :  { %1545 = vmatpush.bf16.msra.mxu1 %v2921_v16  ;;  %1558 = vmatpush.bf16.msra.mxu2 %v3014_v56  ;;  %v2609_v61 = vpop.eup %2608 }
 0x2ff   :  { %v1259_v26 = vmul.f32 %v2609_v61, %v1258_v0 }
 0x301   :  { %1532 = vmatpush.bf16.msra.mxu0 %v2958_v59  ;;  %v1261_v5 = vadd.f32 %v1260_v55, %v1259_v26 }
 0x302   :  { %1546 = vmatpush.bf16.msra.mxu1 %v2930_v25  ;;  %1559 = vmatpush.bf16.msra.mxu2 %v3029_v9 }
 0x303   :  { %v1270_v12 = vsel %vm1268_vm1, %v1261_v5, 0.0  ;;  %v3437_v19 = vsel %vm1268_vm1, %v1261_v5, %v3363_v53  ;;  %v3781_v53 = vld [vmem:[#allocation22_spill] sm:$0xff] }
 0x304   :  { %v1274_v24 = vpack.c.bf16 %v1270_v12, %v1270_v12  ;;  %v1329_v34 = vpack.c.bf16 %v3437_v19, %v3437_v19 }
 0x305   :  { %1533 = vmatpush.bf16.msra.mxu0 %v2970_v10 }
 0x306   :  { %1547 = vmatpush.bf16.msra.mxu1 %v2939_v38  ;;  %1560 = vmatpush.bf16.msra.mxu2 %v3043_v29  ;;  %1276 = vst [vmem:[#allocation11 + $0x10] sm:$0xf] %v1274_v24 }
 0x307   :  { %1338 = vmatmul.bf16.vlgmr.msra.gmra.mxu3 %v1329_v34 }
 0x308   :  { %1351 = vmatmul.bf16.vlgmr.msrb.gmra.mxu0 %v1329_v34  ;;  %1364 = vmatmul.bf16.vlgmr.msrb.gmra.mxu1 %v1329_v34 }
 0x309   :  { %1534 = vmatpush.bf16.msra.mxu0 %v2982_v30  ;;  %1570 = vmatpush.bf16.msra.mxu3 %v3000_v46 }
 0x30a   :  { %1548 = vmatpush.bf16.msra.mxu1 %v2953_v51  ;;  %1561 = vmatpush.bf16.msra.mxu2 %v3053_v44 }
 0x30d   :  { %1535 = vmatpush.bf16.msra.mxu0 %v3006_v54  ;;  %1571 = vmatpush.bf16.msra.mxu3 %v3020_v2 }
 0x30e   :  { %1549 = vmatpush.bf16.msra.mxu1 %v2965_v63  ;;  %1562 = vmatpush.bf16.msra.mxu2 %v3063_v4 }
 0x311   :  { %1536 = vmatpush.bf16.msra.mxu0 %v3024_v6  ;;  %1572 = vmatpush.bf16.msra.mxu3 %v3034_v21 }
 0x312   :  { %1550 = vmatpush.bf16.msra.mxu1 %v2977_v15  ;;  %1563 = vmatpush.bf16.msra.mxu2 %v3071_v23 }
 0x315   :  { %1537 = vmatpush.bf16.msra.mxu0 %v3040_v28  ;;  %1573 = vmatpush.bf16.msra.mxu3 %v3048_v37 }
 0x316   :  { %1551 = vmatpush.bf16.msra.mxu1 %v2989_v35  ;;  %1564 = vmatpush.bf16.msra.mxu2 %v3079_v50 }
 0x319   :  { %1718 = vmatpush.bf16.msrb.mxu0 %v2910_v3  ;;  %1574 = vmatpush.bf16.msra.mxu3 %v3058_v57 }
 0x31a   :  { %1731 = vmatpush.bf16.msrb.mxu1 %v2914_v8 }
 0x31d   :  { %1719 = vmatpush.bf16.msrb.mxu0 %v3751_v48  ;;  %1575 = vmatpush.bf16.msra.mxu3 %v3768_v58 }
 0x31e   :  { %1732 = vmatpush.bf16.msrb.mxu1 %v3753_v60 }
 0x321   :  { %1720 = vmatpush.bf16.msrb.mxu0 %v3754_v62  ;;  %1576 = vmatpush.bf16.msra.mxu3 %v3771_v33 }
 0x322   :  { %1733 = vmatpush.bf16.msrb.mxu1 %v3756_v13 }
 0x325   :  { %1721 = vmatpush.bf16.msrb.mxu0 %v3781_v53  ;;  %1577 = vmatpush.bf16.msra.mxu3 %v3783_v20 }
 0x326   :  { %1734 = vmatpush.bf16.msrb.mxu1 %v3782_v39 }
 0x329   :  { %1722 = vmatpush.bf16.msrb.mxu0 %v3784_v11 }
 0x32a   :  { %1735 = vmatpush.bf16.msrb.mxu1 %v3785_v14 }
 0x32d   :  { %1723 = vmatpush.bf16.msrb.mxu0 %v3786_v40 }
 0x32e   :  { %1736 = vmatpush.bf16.msrb.mxu1 %v3787_v22 }
 0x331   :  { %1724 = vmatpush.bf16.msrb.mxu0 %v3788_v31  ;;  %v1284_v31 = vld [vmem:[#allocation7 + $0x24] sm:$0xff] }
 0x332   :  { %1737 = vmatpush.bf16.msrb.mxu1 %v3789_v27 }
 0x335   :  { %1725 = vmatpush.bf16.msrb.mxu0 %v3790_v41 }
 0x336   :  { %1738 = vmatpush.bf16.msrb.mxu1 %v3791_v42  ;;  %v1287_v42 = vunpack.c.h.bf16 %v1284_v31 }
 0x375   :  { %v1299_v0 = vpop.f32.mrf.mxu0  ;;  %v1312_v61 = vpop.f32.mrf.mxu1 }
 0x376   :  { %v1370_v26 = vadd.f32 %v1299_v0, %v1280_v49  ;;  %v1390_v55 = vadd.f32 %v1312_v61, %v1281_v18  ;;  %v1286_v18 = vunpack.c.l.bf16 %v1284_v31 }
 0x378   :  { %v2420_v45 = vmul.f32 -1.442695, %v1370_v26  ;;  %v2421_v5 = vmul.f32 -1.442695, %v1390_v55 }
 0x37a   :  { %2610 = vpow2.f32 %v2420_v45 }
 0x37b   :  { %2612 = vpow2.f32 %v2421_v5 }
 0x37c   :  { %v1325_v12 = vpop.f32.mrf.mxu2 }
 0x37d   :  { %v1301_v24 = vpop.f32.mrf.mxu0  ;;  %v1314_v34 = vpop.f32.mrf.mxu1 }
 0x380   :  { %v2611_v27 = vpop.eup %2610 }
 0x381   :  { %v2613_v22 = vpop.eup %2612  ;;  %v1374_v41 = vadd.f32 1.0, %v2611_v27 }
 0x382   :  { %v1394_v20 = vadd.f32 1.0, %v2613_v22 }
 0x383   :  { %2614 = vrcp.f32 %v1374_v41  ;;  %v1386_v22 = vand.u32 2147483648, %v1374_v41  ;;  %v1384_v58 = vand.u32 2147483647, %v1374_v41  ;;  %vm1380_vm3 = vweird.f32 %v1374_v41 }
 0x384   :  { %2616 = vrcp.f32 %v1394_v20  ;;  %v1327_v52 = vpop.f32.mrf.mxu2  ;;  %vm1400_vm7 = vweird.f32 %v1394_v20 }
 0x385   :  { %v1352_v40 = vpop.f32.mrf.mxu0  ;;  %v3480_v14 = vpop.f32.mrf.mxu1  ;;  %vm1385_vm5 = vcmp.eq.f32.partialorder %v1384_v58, 8.507059e+37 }
 0x386   :  { %v1448_v49 = vadd.f32 %v1352_v40, %v1287_v42  ;;  %v1279_v40 = vld [vmem:[#allocation4 + $0x38] sm:$0xf] }
 0x388   :  { %v2424_v0 = vmul.f32 -1.442695, %v1448_v49  ;;  %v1387_v49 = vor.u32 1.1754944e-38, %v1386_v22 }
 0x389   :  { %v2615_v61 = vpop.eup %2614 }
 0x38a   :  { %v2617_v26 = vpop.eup %2616  ;;  %v1376_v55 = vmul.f32 %v2615_v61, %v1374_v41  ;;  %2618 = vpow2.f32 %v2424_v0  ;;  %v1339_v45 = vpop.f32.mrf.mxu3  ;;  %vm1381_vm2 = vweird.f32 %v2615_v61  ;;  %v1404_v41 = vand.u32 2147483647, %v1394_v20 }
 0x38b   :  { %v1396_v5 = vmul.f32 %v2617_v26, %v1394_v20  ;;  %v1428_v24 = vadd.f32 %v1339_v45, %v1286_v18  ;;  %vm1382_vm4 = vmor %vm1380_vm3, %vm1381_vm2  ;;  %v1282_v18 = vunpack.c.l.bf16 %v1279_v40  ;;  %v1410_v45 = vadd.f32 %v3408_v32, %v1325_v12 }
 0x38c   :  { %v1377_v34 = vsub.f32 1.0, %v1376_v55  ;;  %vm1401_vm6 = vweird.f32 %v2617_v26  ;;  %vm1405_vm9 = vcmp.eq.f32.partialorder %v1404_v41, 8.507059e+37 }
 0x38d   :  { %v1397_v27 = vsub.f32 1.0, %v1396_v5  ;;  %v2423_v33 = vmul.f32 -1.442695, %v1428_v24  ;;  %v1354_v11 = vpop.f32.mrf.mxu0  ;;  %v1367_v39 = vpop.f32.mrf.mxu1  ;;  %v1406_v24 = vand.u32 2147483648, %v1394_v20  ;;  %vm1402_vm8 = vmor %vm1400_vm7, %vm1401_vm6 }
 0x38e   :  { %v1378_v52 = vmul.f32 %v2615_v61, %v1377_v34  ;;  %v1423_v20 = vpop.permute.xlu2 %1422 }
 0x38f   :  { %v1398_v53 = vmul.f32 %v2617_v26, %v1397_v27  ;;  %2620 = vpow2.f32 %v2423_v33  ;;  %v1407_v40 = vor.u32 1.1754944e-38, %v1406_v24  ;;  %vm1424_vm10 = vcmp.eq.s32.totalorder %v1423_v20, 1 }
 0x390   :  { %v2619_v31 = vpop.eup %2618  ;;  %v1379_v42 = vadd.f32 %v2615_v61, %v1378_v52 }
 0x391   :  { %v3482_v0 = vadd.f32 1.0, %v2619_v31  ;;  %v1399_v39 = vadd.f32 %v2617_v26, %v1398_v53 }
 0x392   :  { %v1383_v55 = vsel %vm1382_vm4, %v2615_v61, %v1379_v42  ;;  %v1341_v11 = vpop.f32.mrf.mxu3 }
 0x393   :  { %v1388_v5 = vsel %vm1385_vm5, %v1387_v49, %v1383_v55  ;;  %2622 = vrcp.f32 %v3482_v0  ;;  %v1403_v52 = vsel %vm1402_vm8, %v2617_v26, %v1399_v39  ;;  %vm1458_vm0 = vweird.f32 %v3482_v0 }
 0x394   :  { %v1411_v34 = vmul.f32 %v1410_v45, %v1388_v5  ;;  %v1408_v12 = vsel %vm1405_vm9, %v1407_v40, %v1403_v52  ;;  %v1285_v40 = vld [vmem:[#allocation7 + $0x2c] sm:$0xf]  ;;  %v1462_v20 = vand.u32 2147483647, %v3482_v0 }
 0x395   :  { %v2621_v33 = vpop.eup %2620  ;;  %v1414_v53 = vsub.f32 1.0, %v1408_v12  ;;  %v1416_v55 = vmul.f32 %v1408_v12, %v3421_v17 }
 0x396   :  { %v1412_v27 = vadd.f32 %v1411_v34, %v1282_v18  ;;  %v1432_v22 = vadd.f32 1.0, %v2621_v33  ;;  %vm1463_vm2 = vcmp.eq.f32.partialorder %v1462_v20, 8.507059e+37 }
 0x398   :  { %2624 = vtanh.f32 %v1412_v27  ;;  %v1442_v5 = vand.u32 2147483647, %v1432_v22  ;;  %v1444_v24 = vand.u32 2147483648, %v1432_v22  ;;  %vm1438_vm12 = vweird.f32 %v1432_v22 }
 0x399   :  { %2626 = vrcp.f32 %v1432_v22  ;;  %v2623_v58 = vpop.eup %2622 }
 0x39a   :  { %v1454_v61 = vmul.f32 %v2623_v58, %v3482_v0  ;;  %vm1443_vm14 = vcmp.eq.f32.partialorder %v1442_v5, 8.507059e+37  ;;  %vm1459_vm15 = vweird.f32 %v2623_v58  ;;  %v1481_v5 = vpop.permute.xlu0 %1480 }
 0x39b   :  { %vm1460_vm1 = vmor %vm1458_vm0, %vm1459_vm15  ;;  %vm1482_vm3 = vcmp.eq.s32.totalorder %v1481_v5, 1  ;;  %v1498_v5 = vld [vmem:[#allocation7 + $0x18] sm:$0xff] }
 0x39c   :  { %v1455_v18 = vsub.f32 1.0, %v1454_v61  ;;  %v1288_v61 = vunpack.c.l.bf16 %v1285_v40  ;;  %v3794_v40 = vld [vmem:[#allocation23_spill] sm:$0xff] }
 0x39e   :  { %v2625_v31 = vpop.eup %2624  ;;  %v1456_v52 = vmul.f32 %v2623_v58, %v1455_v18 }
 0x39f   :  { %v2627_v42 = vpop.eup %2626  ;;  %v1415_v49 = vmul.f32 %v2625_v31, %v1414_v53  ;;  %v1445_v53 = vor.u32 1.1754944e-38, %v1444_v24 }
 0x3a0   :  { %v1434_v45 = vmul.f32 %v2627_v42, %v1432_v22  ;;  %vm1439_vm11 = vweird.f32 %v2627_v42 }
 0x3a1   :  { %v1417_v11 = vadd.f32 %v1416_v55, %v1415_v49  ;;  %vm1440_vm13 = vmor %vm1438_vm12, %vm1439_vm11  ;;  %v1457_v49 = vadd.f32 %v2623_v58, %v1456_v52  ;;  %v1464_v55 = vand.u32 2147483648, %v3482_v0 }
 0x3a2   :  { %v1435_v26 = vsub.f32 1.0, %v1434_v45 }
 0x3a3   :  { %v1426_v39 = vsel %vm1424_vm10, %v1417_v11, 0.0  ;;  %v3489_v34 = vsel %vm1424_vm10, %v1417_v11, %v3421_v17  ;;  %v1468_v17 = vadd.f32 %v3415_v1, %v3480_v14  ;;  %v1465_v11 = vor.u32 1.1754944e-38, %v1464_v55 }
 0x3a4   :  { %v1485_v33 = vpack.c.bf16 %v1426_v39, %v1426_v39  ;;  %v1436_v41 = vmul.f32 %v2627_v42, %v1435_v26  ;;  %v1503_v27 = vpack.c.bf16 %v3489_v34, %v3489_v34 }
 0x3a6   :  { %1487 = vst [vmem:[#allocation10 + $0x10] sm:$0xf] %v1485_v33  ;;  %v1437_v12 = vadd.f32 %v2627_v42, %v1436_v41  ;;  %1512 = vmatmul.bf16.vlgmr.msrb.gmra.mxu2 %v1503_v27  ;;  %1525 = vmatmul.bf16.vlgmr.msrb.gmra.mxu3 %v1503_v27 }
 0x3a7   :  { %1538 = vmatmul.bf16.vlgmr.msra.gmra.mxu0 %v1503_v27  ;;  %1744 = vmatpush.bf16.msrb.mxu2 %v2943_v43 }
 0x3a8   :  { %v1441_v31 = vsel %vm1440_vm13, %v2627_v42, %v1437_v12  ;;  %1758 = vmatpush.bf16.msrb.mxu3 %v2912_v7  ;;  %1771 = vmatpush.bf16.msra.mxu0 %v2991_v36  ;;  %v1461_v42 = vsel %vm1460_vm1, %v2623_v58, %v1457_v49  ;;  %v3795_v12 = vld [vmem:[#allocation24_spill] sm:$0xff] }
 0x3a9   :  { %v1446_v22 = vsel %vm1443_vm14, %v1445_v53, %v1441_v31  ;;  %v1466_v18 = vsel %vm1463_vm2, %v1465_v11, %v1461_v42  ;;  %v3798_v53 = vld [vmem:[#allocation26_spill] sm:$0xff]  ;;  %v3804_v31 = vld [vmem:[#allocation31_spill] sm:$0xff] }
 0x3aa   :  { %v1469_v45 = vmul.f32 %v1468_v17, %v1446_v22  ;;  %v1472_v0 = vsub.f32 1.0, %v1466_v18  ;;  %v1474_v58 = vmul.f32 %v1466_v18, %v3437_v19  ;;  %v3801_v17 = vld [vmem:[#allocation28_spill] sm:$0xff] }
 0x3ab   :  { %1745 = vmatpush.bf16.msrb.mxu2 %v2946_v47  ;;  %v1492_v49 = vld [vmem:[#allocation4 + $0x3c] sm:$0xff] }
 0x3ac   :  { %v1470_v14 = vadd.f32 %v1469_v45, %v1288_v61  ;;  %1759 = vmatpush.bf16.msrb.mxu3 %v2921_v16  ;;  %1772 = vmatpush.bf16.msra.mxu0 %v3014_v56  ;;  %v3803_v61 = vld [vmem:[#allocation30_spill] sm:$0xff]  ;;  %v1494_v55 = vunpack.c.l.bf16 %v1492_v49  ;;  %v1495_v45 = vunpack.c.h.bf16 %v1492_v49 }
 0x3ae   :  { %2628 = vtanh.f32 %v1470_v14 }
 0x3af   :  { %1746 = vmatpush.bf16.msrb.mxu2 %v2958_v59 }
 0x3b0   :  { %1760 = vmatpush.bf16.msrb.mxu3 %v2930_v25  ;;  %1773 = vmatpush.bf16.msra.mxu0 %v3029_v9 }
 0x3b3   :  { %1747 = vmatpush.bf16.msrb.mxu2 %v2970_v10 }
 0x3b4   :  { %v2629_v26 = vpop.eup %2628  ;;  %1761 = vmatpush.bf16.msrb.mxu3 %v2939_v38  ;;  %1774 = vmatpush.bf16.msra.mxu0 %v3043_v29 }
 0x3b5   :  { %v1473_v39 = vmul.f32 %v2629_v26, %v1472_v0 }
 0x3b7   :  { %v1475_v24 = vadd.f32 %v1474_v58, %v1473_v39  ;;  %1748 = vmatpush.bf16.msrb.mxu2 %v2982_v30 }
 0x3b8   :  { %1762 = vmatpush.bf16.msrb.mxu3 %v2953_v51  ;;  %1775 = vmatpush.bf16.msra.mxu0 %v3053_v44 }
 0x3b9   :  { %v3515_v33 = vsel %vm1482_vm3, %v1475_v24, %v3437_v19  ;;  %v1484_v41 = vsel %vm1482_vm3, %v1475_v24, 0.0  ;;  %v3793_v19 = vld [vmem:[#allocation33_spill] sm:$0xff] }
 0x3ba   :  { %v1488_v27 = vpack.c.bf16 %v1484_v41, %v1484_v41  ;;  %v1543_v52 = vpack.c.bf16 %v3515_v33, %v3515_v33 }
 0x3bb   :  { %1749 = vmatpush.bf16.msrb.mxu2 %v3006_v54 }
 0x3bc   :  { %1490 = vst [vmem:[#allocation11 + $0xc] sm:$0xf] %v1488_v27  ;;  %1552 = vmatmul.bf16.vlgmr.msra.gmra.mxu1 %v1543_v52  ;;  %1565 = vmatmul.bf16.vlgmr.msra.gmra.mxu2 %v1543_v52 }
 0x3bd   :  { %1578 = vmatmul.bf16.vlgmr.msra.gmra.mxu3 %v1543_v52  ;;  %1784 = vmatpush.bf16.msra.mxu1 %v3000_v46 }
 0x3be   :  { %1763 = vmatpush.bf16.msrb.mxu3 %v2965_v63  ;;  %1776 = vmatpush.bf16.msra.mxu0 %v3063_v4 }
 0x3bf   :  { %1750 = vmatpush.bf16.msrb.mxu2 %v3024_v6 }
 0x3c1   :  { %1785 = vmatpush.bf16.msra.mxu1 %v3020_v2 }
 0x3c2   :  { %1764 = vmatpush.bf16.msrb.mxu3 %v2977_v15  ;;  %1777 = vmatpush.bf16.msra.mxu0 %v3071_v23 }
 0x3c3   :  { %1751 = vmatpush.bf16.msrb.mxu2 %v3040_v28 }
 0x3c5   :  { %1786 = vmatpush.bf16.msra.mxu1 %v3034_v21 }
 0x3c6   :  { %1765 = vmatpush.bf16.msrb.mxu3 %v2989_v35  ;;  %1778 = vmatpush.bf16.msra.mxu0 %v3079_v50 }
 0x3c7   :  { %1931 = vmatpush.bf16.msra.mxu2 %v2910_v3  ;;  %v3792_v3 = vld [vmem:[#allocation22_spill] sm:$0xff] }
 0x3c9   :  { %1787 = vmatpush.bf16.msra.mxu1 %v3048_v37 }
 0x3ca   :  { %1944 = vmatpush.bf16.msra.mxu3 %v2914_v8  ;;  %v3796_v8 = vld [vmem:[#allocation34_spill] sm:$0xff] }
 0x3cb   :  { %1932 = vmatpush.bf16.msra.mxu2 %v3751_v48  ;;  %v3797_v48 = vld [vmem:[#allocation25_spill] sm:$0xff] }
 0x3cd   :  { %1788 = vmatpush.bf16.msra.mxu1 %v3058_v57 }
 0x3ce   :  { %1945 = vmatpush.bf16.msra.mxu3 %v3753_v60  ;;  %v3799_v60 = vld [vmem:[#allocation35_spill] sm:$0xff] }
 0x3cf   :  { %1933 = vmatpush.bf16.msra.mxu2 %v3754_v62  ;;  %v3800_v62 = vld [vmem:[#allocation27_spill] sm:$0xff] }
 0x3d1   :  { %1789 = vmatpush.bf16.msra.mxu1 %v3793_v19 }
 0x3d2   :  { %1946 = vmatpush.bf16.msra.mxu3 %v3756_v13  ;;  %v3802_v13 = vld [vmem:[#allocation29_spill] sm:$0xff] }
 0x3d3   :  { %1934 = vmatpush.bf16.msra.mxu2 %v3792_v3  ;;  %v1500_v3 = vunpack.c.l.bf16 %v1498_v5 }
 0x3d5   :  { %1790 = vmatpush.bf16.msra.mxu1 %v3796_v8 }
 0x3d6   :  { %1947 = vmatpush.bf16.msra.mxu3 %v3794_v40 }
 0x3d7   :  { %1935 = vmatpush.bf16.msra.mxu2 %v3795_v12 }
 0x3d9   :  { %1791 = vmatpush.bf16.msra.mxu1 %v3799_v60 }
 0x3da   :  { %1948 = vmatpush.bf16.msra.mxu3 %v3797_v48 }
 0x3db   :  { %1936 = vmatpush.bf16.msra.mxu2 %v3798_v53  ;;  %v1501_v53 = vunpack.c.h.bf16 %v1498_v5 }
 0x3de   :  { %1949 = vmatpush.bf16.msra.mxu3 %v3800_v62 }
 0x3df   :  { %1937 = vmatpush.bf16.msra.mxu2 %v3801_v17 }
 0x3e2   :  { %1950 = vmatpush.bf16.msra.mxu3 %v3802_v13 }
 0x3e3   :  { %1938 = vmatpush.bf16.msra.mxu2 %v3803_v61 }
 0x3e6   :  { %1951 = vmatpush.bf16.msra.mxu3 %v3804_v31 }
 0x424   :  { %v1539_v22 = vpop.f32.mrf.mxu0 }
 0x429   :  { %v1513_v20 = vpop.f32.mrf.mxu2  ;;  %v1526_v14 = vpop.f32.mrf.mxu3 }
 0x42a   :  { %v1584_v42 = vadd.f32 %v1513_v20, %v1494_v55  ;;  %v1604_v11 = vadd.f32 %v1526_v14, %v1495_v45 }
 0x42c   :  { %v2426_v18 = vmul.f32 -1.442695, %v1584_v42  ;;  %v2427_v0 = vmul.f32 -1.442695, %v1604_v11  ;;  %v1541_v26 = vpop.f32.mrf.mxu0 }
 0x42d   :  { %v1493_v26 = vld [vmem:[#allocation4 + $0x44] sm:$0xf] }
 0x42e   :  { %2630 = vpow2.f32 %v2426_v18 }
 0x42f   :  { %2632 = vpow2.f32 %v2427_v0 }
 0x431   :  { %v1515_v39 = vpop.f32.mrf.mxu2  ;;  %v1528_v58 = vpop.f32.mrf.mxu3 }
 0x434   :  { %v2631_v24 = vpop.eup %2630 }
 0x435   :  { %v2633_v41 = vpop.eup %2632  ;;  %v1588_v27 = vadd.f32 1.0, %v2631_v24 }
 0x436   :  { %v1608_v52 = vadd.f32 1.0, %v2633_v41 }
 0x437   :  { %2634 = vrcp.f32 %v1588_v27  ;;  %v1600_v20 = vand.u32 2147483648, %v1588_v27  ;;  %v1598_v18 = vand.u32 2147483647, %v1588_v27  ;;  %vm1594_vm5 = vweird.f32 %v1588_v27 }
 0x438   :  { %2636 = vrcp.f32 %v1608_v52  ;;  %vm1614_vm9 = vweird.f32 %v1608_v52 }
 0x439   :  { %v1553_v40 = vpop.f32.mrf.mxu1  ;;  %v1601_v24 = vor.u32 1.1754944e-38, %v1600_v20  ;;  %vm1599_vm7 = vcmp.eq.f32.partialorder %v1598_v18, 8.507059e+37 }
 0x43a   :  { %v1642_v12 = vadd.f32 %v1553_v40, %v1500_v3  ;;  %v1624_v3 = vadd.f32 %v3408_v32, %v1539_v22  ;;  %v1496_v40 = vunpack.c.l.bf16 %v1493_v26 }
 0x43c   :  { %v2429_v48 = vmul.f32 -1.442695, %v1642_v12 }
 0x43d   :  { %v2635_v62 = vpop.eup %2634 }
 0x43e   :  { %v2637_v17 = vpop.eup %2636  ;;  %v1590_v13 = vmul.f32 %v2635_v62, %v1588_v27  ;;  %2638 = vpow2.f32 %v2429_v48  ;;  %vm1595_vm4 = vweird.f32 %v2635_v62 }
 0x43f   :  { %v1610_v61 = vmul.f32 %v2637_v17, %v1608_v52  ;;  %v1566_v31 = vpop.f32.mrf.mxu2  ;;  %vm1596_vm6 = vmor %vm1594_vm5, %vm1595_vm4  ;;  %vm1615_vm8 = vweird.f32 %v2637_v17 }
 0x440   :  { %v1591_v49 = vsub.f32 1.0, %v1590_v13  ;;  %v1662_v55 = vadd.f32 %v1566_v31, %v1501_v53  ;;  %v1579_v45 = vpop.f32.mrf.mxu3  ;;  %v1620_v31 = vand.u32 2147483648, %v1608_v52  ;;  %vm1616_vm10 = vmor %vm1614_vm9, %vm1615_vm8 }
 0x441   :  { %v1611_v14 = vsub.f32 1.0, %v1610_v61  ;;  %v1555_v42 = vpop.f32.mrf.mxu1 }
 0x442   :  { %v1592_v11 = vmul.f32 %v2635_v62, %v1591_v49  ;;  %v2430_v0 = vmul.f32 -1.442695, %v1662_v55  ;;  %v1618_v55 = vand.u32 2147483647, %v1608_v52  ;;  %v1621_v32 = vor.u32 1.1754944e-38, %v1620_v31 }
 0x443   :  { %v1612_v39 = vmul.f32 %v2637_v17, %v1611_v14 }
 0x444   :  { %v2639_v58 = vpop.eup %2638  ;;  %v1593_v5 = vadd.f32 %v2635_v62, %v1592_v11  ;;  %2640 = vpow2.f32 %v2430_v0  ;;  %vm1619_vm11 = vcmp.eq.f32.partialorder %v1618_v55, 8.507059e+37 }
 0x445   :  { %v1646_v41 = vadd.f32 1.0, %v2639_v58  ;;  %v1613_v53 = vadd.f32 %v2637_v17, %v1612_v39  ;;  %v1499_v58 = vld [vmem:[#allocation7 + $0x20] sm:$0xf] }
 0x446   :  { %v1597_v12 = vsel %vm1596_vm6, %v2635_v62, %v1593_v5 }
 0x447   :  { %v1602_v48 = vsel %vm1599_vm7, %v1601_v24, %v1597_v12  ;;  %2642 = vrcp.f32 %v1646_v41  ;;  %v1568_v13 = vpop.f32.mrf.mxu2  ;;  %v1617_v20 = vsel %vm1616_vm10, %v2637_v17, %v1613_v53  ;;  %v1658_v0 = vand.u32 2147483648, %v1646_v41 }
 0x448   :  { %v1625_v61 = vmul.f32 %v1624_v3, %v1602_v48  ;;  %v1581_v49 = vpop.f32.mrf.mxu3  ;;  %v1622_v11 = vsel %vm1619_vm11, %v1621_v32, %v1617_v20  ;;  %v1656_v52 = vand.u32 2147483647, %v1646_v41  ;;  %v1637_v3 = vpop.permute.xlu1 %1636  ;;  %vm1652_vm14 = vweird.f32 %v1646_v41 }
 0x449   :  { %v1628_v26 = vsub.f32 1.0, %v1622_v11  ;;  %v1630_v17 = vmul.f32 %v1622_v11, %v3489_v34  ;;  %vm1638_vm13 = vcmp.eq.s32.totalorder %v1637_v3, 1  ;;  %v1502_v53 = vunpack.c.l.bf16 %v1499_v58 }
 0x44a   :  { %v2641_v27 = vpop.eup %2640  ;;  %v1626_v14 = vadd.f32 %v1625_v61, %v1496_v40  ;;  %v1659_v13 = vor.u32 1.1754944e-38, %v1658_v0  ;;  %v1682_v61 = vadd.f32 %v3415_v1, %v1579_v45  ;;  %vm1657_vm0 = vcmp.eq.f32.partialorder %v1656_v52, 8.507059e+37 }
 0x44b   :  { %v1666_v42 = vadd.f32 1.0, %v2641_v27 }
 0x44c   :  { %2644 = vtanh.f32 %v1626_v14 }
 0x44d   :  { %v2643_v22 = vpop.eup %2642  ;;  %2646 = vrcp.f32 %v1666_v42  ;;  %v1678_v55 = vand.u32 2147483648, %v1666_v42  ;;  %v1676_v1 = vand.u32 2147483647, %v1666_v42  ;;  %vm1672_vm2 = vweird.f32 %v1666_v42 }
 0x44e   :  { %v1648_v62 = vmul.f32 %v2643_v22, %v1646_v41  ;;  %vm1653_vm12 = vweird.f32 %v2643_v22 }
 0x44f   :  { %vm1654_vm15 = vmor %vm1652_vm14, %vm1653_vm12  ;;  %vm1677_vm4 = vcmp.eq.f32.partialorder %v1676_v1, 8.507059e+37 }
 0x450   :  { %v1649_v18 = vsub.f32 1.0, %v1648_v62 }
 0x452   :  { %v2645_v39 = vpop.eup %2644  ;;  %v1650_v5 = vmul.f32 %v2643_v22, %v1649_v18 }
 0x453   :  { %v2647_v24 = vpop.eup %2646  ;;  %v1629_v40 = vmul.f32 %v2645_v39, %v1628_v26 }
 0x454   :  { %v1668_v12 = vmul.f32 %v2647_v24, %v1666_v42  ;;  %v1651_v48 = vadd.f32 %v2643_v22, %v1650_v5  ;;  %vm1673_vm1 = vweird.f32 %v2647_v24 }
 0x455   :  { %v1631_v31 = vadd.f32 %v1630_v17, %v1629_v40  ;;  %vm1674_vm3 = vmor %vm1672_vm2, %vm1673_vm1 }
 0x456   :  { %v1669_v49 = vsub.f32 1.0, %v1668_v12  ;;  %v1655_v27 = vsel %vm1654_vm15, %v2643_v22, %v1651_v48 }
 0x457   :  { %v1660_v14 = vsel %vm1657_vm0, %v1659_v13, %v1655_v27  ;;  %v3557_v20 = vsel %vm1638_vm13, %v1631_v31, %v3489_v34  ;;  %v1640_v32 = vsel %vm1638_vm13, %v1631_v31, 0.0  ;;  %v1679_v34 = vor.u32 1.1754944e-38, %v1678_v55  ;;  %v1707_v55 = vld [vmem:[#allocation4 + $0x50] sm:$0xf] }
 0x458   :  { %v1670_v62 = vmul.f32 %v2647_v24, %v1669_v49  ;;  %v1683_v41 = vmul.f32 %v1682_v61, %v1660_v14  ;;  %v1699_v11 = vpack.c.bf16 %v1640_v32, %v1640_v32  ;;  %v1717_v18 = vpack.c.bf16 %v3557_v20, %v3557_v20 }
 0x45a   :  { %v1671_v45 = vadd.f32 %v2647_v24, %v1670_v62  ;;  %v1684_v0 = vadd.f32 %v1683_v41, %v1502_v53  ;;  %1701 = vst [vmem:[#allocation10 + $0x14] sm:$0xf] %v1699_v11  ;;  %1726 = vmatmul.bf16.vlgmr.msrb.gmra.mxu0 %v1717_v18  ;;  %1739 = vmatmul.bf16.vlgmr.msrb.gmra.mxu1 %v1717_v18  ;;  %v1710_v41 = vunpack.c.l.bf16 %v1707_v55 }
 0x45b   :  { %1752 = vmatmul.bf16.vlgmr.msrb.gmra.mxu2 %v1717_v18  ;;  %1957 = vmatpush.bf16.msrb.mxu0 %v2943_v43  ;;  %v3608_v18 = vld [vmem:[%s3666_s4] ss:$0 sm:$0xff] }
 0x45c   :  { %v1675_v22 = vsel %vm1674_vm3, %v2647_v24, %v1671_v45  ;;  %2648 = vtanh.f32 %v1684_v0  ;;  %1971 = vmatpush.bf16.msrb.mxu1 %v2912_v7  ;;  %1984 = vmatpush.bf16.msrb.mxu2 %v2991_v36  ;;  %v1695_v7 = vpop.permute.xlu2 %1694 }
 0x45d   :  { %v1680_v26 = vsel %vm1677_vm4, %v1679_v34, %v1675_v22  ;;  %vm1696_vm5 = vcmp.eq.s32.totalorder %v1695_v7, 1 }
 0x45e   :  { %v1686_v42 = vsub.f32 1.0, %v1680_v26  ;;  %v1688_v43 = vmul.f32 %v1680_v26, %v3515_v33 }
 0x45f   :  { %1958 = vmatpush.bf16.msrb.mxu0 %v2946_v47 }
 0x460   :  { %1972 = vmatpush.bf16.msrb.mxu1 %v2921_v16  ;;  %1985 = vmatpush.bf16.msrb.mxu2 %v3014_v56 }
 0x462   :  { %v2649_v39 = vpop.eup %2648 }
 0x463   :  { %v1687_v58 = vmul.f32 %v2649_v39, %v1686_v42  ;;  %1959 = vmatpush.bf16.msrb.mxu0 %v2958_v59 }
 0x464   :  { %1973 = vmatpush.bf16.msrb.mxu1 %v2930_v25  ;;  %1986 = vmatpush.bf16.msrb.mxu2 %v3029_v9  ;;  %v1706_v25 = vld [vmem:[#allocation4 + $0x48] sm:$0xff] }
 0x465   :  { %v1689_v36 = vadd.f32 %v1688_v43, %v1687_v58 }
 0x467   :  { %v1698_v5 = vsel %vm1696_vm5, %v1689_v36, 0.0  ;;  %v3574_v47 = vsel %vm1696_vm5, %v1689_v36, %v3515_v33  ;;  %1960 = vmatpush.bf16.msrb.mxu0 %v2970_v10 }
 0x468   :  { %v1702_v16 = vpack.c.bf16 %v1698_v5, %v1698_v5  ;;  %v1757_v56 = vpack.c.bf16 %v3574_v47, %v3574_v47  ;;  %1974 = vmatpush.bf16.msrb.mxu1 %v2939_v38  ;;  %1987 = vmatpush.bf16.msrb.mxu2 %v3043_v29  ;;  %v1708_v38 = vunpack.c.l.bf16 %v1706_v25 }
 0x46a   :  { %1704 = vst [vmem:[#allocation11 + $0x8] sm:$0xf] %v1702_v16  ;;  %1766 = vmatmul.bf16.vlgmr.msrb.gmra.mxu3 %v1757_v56  ;;  %1779 = vmatmul.bf16.vlgmr.msra.gmra.mxu0 %v1757_v56 }
 0x46b   :  { %1792 = vmatmul.bf16.vlgmr.msra.gmra.mxu1 %v1757_v56  ;;  %1961 = vmatpush.bf16.msrb.mxu0 %v2982_v30 }
 0x46c   :  { %1997 = vmatpush.bf16.msrb.mxu3 %v3000_v46  ;;  %1975 = vmatpush.bf16.msrb.mxu1 %v2953_v51  ;;  %v1709_v51 = vunpack.c.h.bf16 %v1706_v25 }
 0x46d   :  { %1988 = vmatpush.bf16.msrb.mxu2 %v3053_v44 }
 0x46f   :  { %1962 = vmatpush.bf16.msrb.mxu0 %v3006_v54 }
 0x470   :  { %1998 = vmatpush.bf16.msrb.mxu3 %v3020_v2  ;;  %1976 = vmatpush.bf16.msrb.mxu1 %v2965_v63 }
 0x471   :  { %1989 = vmatpush.bf16.msrb.mxu2 %v3063_v4 }
 0x473   :  { %1963 = vmatpush.bf16.msrb.mxu0 %v3024_v6  ;;  %v1712_v6 = vld [vmem:[#allocation7 + $0xc] sm:$0xff] }
 0x474   :  { %1999 = vmatpush.bf16.msrb.mxu3 %v3034_v21  ;;  %1977 = vmatpush.bf16.msrb.mxu1 %v2977_v15  ;;  %v1714_v33 = vunpack.c.l.bf16 %v1712_v6 }
 0x475   :  { %1990 = vmatpush.bf16.msrb.mxu2 %v3071_v23 }
 0x477   :  { %1964 = vmatpush.bf16.msrb.mxu0 %v3040_v28 }
 0x478   :  { %2000 = vmatpush.bf16.msrb.mxu3 %v3048_v37  ;;  %1978 = vmatpush.bf16.msrb.mxu1 %v2989_v35  ;;  %v1715_v37 = vunpack.c.h.bf16 %v1712_v6 }
 0x479   :  { %1991 = vmatpush.bf16.msrb.mxu2 %v3079_v50 }
 0x47c   :  { %2001 = vmatpush.bf16.msrb.mxu3 %v3058_v57 }
 0x480   :  { %2002 = vmatpush.bf16.msrb.mxu3 %v3793_v19 }
 0x484   :  { %2003 = vmatpush.bf16.msrb.mxu3 %v3796_v8 }
 0x488   :  { %2004 = vmatpush.bf16.msrb.mxu3 %v3799_v60 }
 0x4d7   :  { %v1727_v59 = vpop.f32.mrf.mxu0  ;;  %v1740_v63 = vpop.f32.mrf.mxu1 }
 0x4d8   :  { %v1798_v10 = vadd.f32 %v1727_v59, %v1708_v38  ;;  %v1818_v15 = vadd.f32 %v1740_v63, %v1709_v51 }
 0x4da   :  { %v2432_v30 = vmul.f32 -1.442695, %v1798_v10  ;;  %v2433_v46 = vmul.f32 -1.442695, %v1818_v15  ;;  %v1851_v15 = vpop.permute.xlu0 %1850 }
 0x4db   :  { %vm1852_vm14 = vcmp.eq.s32.totalorder %v1851_v15, 1 }
 0x4dc   :  { %2650 = vpow2.f32 %v2432_v30 }
 0x4dd   :  { %2652 = vpow2.f32 %v2433_v46 }
 0x4de   :  { %v1753_v35 = vpop.f32.mrf.mxu2 }
 0x4df   :  { %v1729_v54 = vpop.f32.mrf.mxu0  ;;  %v1742_v2 = vpop.f32.mrf.mxu1  ;;  %v1838_v1 = vadd.f32 %v3608_v18, %v1753_v35 }
 0x4e2   :  { %v2651_v9 = vpop.eup %2650 }
 0x4e3   :  { %v2653_v21 = vpop.eup %2652  ;;  %v1802_v28 = vadd.f32 1.0, %v2651_v9 }
 0x4e4   :  { %v1822_v29 = vadd.f32 1.0, %v2653_v21 }
 0x4e5   :  { %2654 = vrcp.f32 %v1802_v28  ;;  %v1814_v12 = vand.u32 2147483648, %v1802_v28  ;;  %v1812_v13 = vand.u32 2147483647, %v1802_v28  ;;  %vm1808_vm7 = vweird.f32 %v1802_v28 }
 0x4e6   :  { %2656 = vrcp.f32 %v1822_v29  ;;  %v1755_v44 = vpop.f32.mrf.mxu2  ;;  %v1834_v22 = vand.u32 2147483648, %v1822_v29  ;;  %vm1828_vm11 = vweird.f32 %v1822_v29  ;;  %v1832_v42 = vand.u32 2147483647, %v1822_v29 }
 0x4e7   :  { %v1780_v57 = vpop.f32.mrf.mxu0  ;;  %v1815_v32 = vor.u32 1.1754944e-38, %v1814_v12  ;;  %vm1813_vm9 = vcmp.eq.f32.partialorder %v1812_v13, 8.507059e+37  ;;  %v1713_v44 = vld [vmem:[#allocation7 + $0x14] sm:$0xf]  ;;  %v1909_v13 = vpop.permute.xlu1 %1908 }
 0x4e8   :  { %v1876_v4 = vadd.f32 %v1780_v57, %v1715_v37  ;;  %v3601_v23 = vpop.f32.mrf.mxu1  ;;  %v1835_v36 = vor.u32 1.1754944e-38, %v1834_v22  ;;  %vm1833_vm13 = vcmp.eq.f32.partialorder %v1832_v42, 8.507059e+37 }
 0x4ea   :  { %v2436_v50 = vmul.f32 -1.442695, %v1876_v4 }
 0x4eb   :  { %v2655_v19 = vpop.eup %2654 }
 0x4ec   :  { %v2657_v8 = vpop.eup %2656  ;;  %v1804_v60 = vmul.f32 %v2655_v19, %v1802_v28  ;;  %2658 = vpow2.f32 %v2436_v50  ;;  %vm1809_vm6 = vweird.f32 %v2655_v19 }
 0x4ed   :  { %v1824_v52 = vmul.f32 %v2657_v8, %v1822_v29  ;;  %v1767_v24 = vpop.f32.mrf.mxu3  ;;  %vm1810_vm8 = vmor %vm1808_vm7, %vm1809_vm6  ;;  %vm1829_vm10 = vweird.f32 %v2657_v8  ;;  %vm1910_vm7 = vcmp.eq.s32.totalorder %v1909_v13, 1 }
 0x4ee   :  { %v1805_v3 = vsub.f32 1.0, %v1804_v60  ;;  %v1856_v40 = vadd.f32 %v1767_v24, %v1714_v33  ;;  %vm1830_vm12 = vmor %vm1828_vm11, %vm1829_vm10  ;;  %v1716_v33 = vunpack.c.l.bf16 %v1713_v44 }
 0x4ef   :  { %v1825_v17 = vsub.f32 1.0, %v1824_v52  ;;  %v1782_v48 = vpop.f32.mrf.mxu0 }
 0x4f0   :  { %v1806_v53 = vmul.f32 %v2655_v19, %v1805_v3  ;;  %v2435_v61 = vmul.f32 -1.442695, %v1856_v40  ;;  %v1795_v31 = vpop.f32.mrf.mxu1 }
 0x4f1   :  { %v1826_v49 = vmul.f32 %v2657_v8, %v1825_v17 }
 0x4f2   :  { %v2659_v27 = vpop.eup %2658  ;;  %v1807_v14 = vadd.f32 %v2655_v19, %v1806_v53  ;;  %2660 = vpow2.f32 %v2435_v61 }
 0x4f3   :  { %v3603_v62 = vadd.f32 1.0, %v2659_v27  ;;  %v1827_v45 = vadd.f32 %v2657_v8, %v1826_v49 }
 0x4f4   :  { %v1811_v11 = vsel %vm1810_vm8, %v2655_v19, %v1807_v14 }
 0x4f5   :  { %v1816_v0 = vsel %vm1813_vm9, %v1815_v32, %v1811_v11  ;;  %v1769_v34 = vpop.f32.mrf.mxu3  ;;  %2662 = vrcp.f32 %v3603_v62  ;;  %v1831_v43 = vsel %vm1830_vm12, %v2657_v8, %v1827_v45  ;;  %v1892_v52 = vand.u32 2147483648, %v3603_v62 }
 0x4f6   :  { %v1839_v26 = vmul.f32 %v1838_v1, %v1816_v0  ;;  %v1836_v16 = vsel %vm1833_vm13, %v1835_v36, %v1831_v43  ;;  %vm1886_vm4 = vweird.f32 %v3603_v62  ;;  %v1890_v3 = vand.u32 2147483647, %v3603_v62  ;;  %v1925_v43 = vld [vmem:[#allocation7] sm:$0xff] }
 0x4f7   :  { %v1842_v56 = vsub.f32 1.0, %v1836_v16  ;;  %v1844_v63 = vmul.f32 %v1836_v16, %v3557_v20  ;;  %v1893_v12 = vor.u32 1.1754944e-38, %v1892_v52 }
 0x4f8   :  { %v2661_v39 = vpop.eup %2660  ;;  %v1840_v58 = vadd.f32 %v1839_v26, %v1710_v41  ;;  %vm1891_vm6 = vcmp.eq.f32.partialorder %v1890_v3, 8.507059e+37 }
 0x4f9   :  { %v1860_v7 = vadd.f32 1.0, %v2661_v39 }
 0x4fa   :  { %2664 = vtanh.f32 %v1840_v58 }
 0x4fb   :  { %2666 = vrcp.f32 %v1860_v7  ;;  %v2663_v5 = vpop.eup %2662  ;;  %v1870_v2 = vand.u32 2147483647, %v1860_v7  ;;  %v1872_v6 = vand.u32 2147483648, %v1860_v7  ;;  %vm1866_vm0 = vweird.f32 %v1860_v7 }
 0x4fc   :  { %v1882_v25 = vmul.f32 %v2663_v5, %v3603_v62  ;;  %vm1887_vm3 = vweird.f32 %v2663_v5  ;;  %v1920_v62 = vld [vmem:[#allocation4 + $0x54] sm:$0xff] }
 0x4fd   :  { %v1873_v4 = vor.u32 1.1754944e-38, %v1872_v6  ;;  %vm1871_vm2 = vcmp.eq.f32.partialorder %v1870_v2, 8.507059e+37  ;;  %vm1888_vm5 = vmor %vm1886_vm4, %vm1887_vm3  ;;  %v1922_v11 = vunpack.c.l.bf16 %v1920_v62  ;;  %v1923_v1 = vunpack.c.h.bf16 %v1920_v62 }
 0x4fe   :  { %v1883_v46 = vsub.f32 1.0, %v1882_v25 }
 0x500   :  { %v2665_v38 = vpop.eup %2664  ;;  %v1884_v37 = vmul.f32 %v2663_v5, %v1883_v46 }
 0x501   :  { %v2667_v51 = vpop.eup %2666  ;;  %v1843_v59 = vmul.f32 %v2665_v38, %v1842_v56  ;;  %v1927_v56 = vunpack.c.l.bf16 %v1925_v43 }
 0x502   :  { %v1862_v10 = vmul.f32 %v2667_v51, %v1860_v7  ;;  %vm1867_vm15 = vweird.f32 %v2667_v51  ;;  %v1885_v8 = vadd.f32 %v2663_v5, %v1884_v37 }
 0x503   :  { %v1845_v30 = vadd.f32 %v1844_v63, %v1843_v59  ;;  %vm1868_vm1 = vmor %vm1866_vm0, %vm1867_vm15  ;;  %v1928_v59 = vunpack.c.h.bf16 %v1925_v43 }
 0x504   :  { %v1863_v35 = vsub.f32 1.0, %v1862_v10  ;;  %v1889_v17 = vsel %vm1888_vm5, %v2663_v5, %v1885_v8 }
 0x505   :  { %v1854_v54 = vsel %vm1852_vm14, %v1845_v30, 0.0  ;;  %v3615_v9 = vsel %vm1852_vm14, %v1845_v30, %v3557_v20  ;;  %v3622_v20 = vld [vmem:[%s3666_s4 + $0x1] ss:$0 sm:$0xff]  ;;  %s2854_s4 = smov [#allocation10]  }
 0x506   :  { %v1913_v21 = vpack.c.bf16 %v1854_v54, %v1854_v54  ;;  %v1864_v28 = vmul.f32 %v2667_v51, %v1863_v35  ;;  %v1930_v29 = vpack.c.bf16 %v3615_v9, %v3615_v9  ;;  %v1896_v50 = vadd.f32 %v3622_v20, %v3601_v23  ;;  %s3639_s30 = sshll.u32 %s2854_s4, 4  ;;  %s2143_s30 = int_to_ptr.vmem [resolvable:$true] %s3639_s30 }
 0x507   :  { %v1894_v23 = vsel %vm1891_vm6, %v1893_v12, %v1889_v17 }
 0x508   :  { %1915 = vst [vmem:[#allocation10 + $0x18] sm:$0xf] %v1913_v21  ;;  %v1865_v57 = vadd.f32 %v2667_v51, %v1864_v28  ;;  %1939 = vmatmul.bf16.vlgmr.msra.gmra.mxu2 %v1930_v29  ;;  %1952 = vmatmul.bf16.vlgmr.msra.gmra.mxu3 %v1930_v29  ;;  %v1900_v48 = vsub.f32 1.0, %v1894_v23  ;;  %v1902_v31 = vmul.f32 %v1894_v23, %v3574_v47 }
 0x509   :  { %1965 = vmatmul.bf16.vlgmr.msrb.gmra.mxu0 %v1930_v29 }
 0x50a   :  { %v1869_v19 = vsel %vm1868_vm1, %v2667_v51, %v1865_v57  ;;  %v1921_v57 = vld [vmem:[#allocation4 + $0x5c] sm:$0xf] }
 0x50b   :  { %v1874_v60 = vsel %vm1871_vm2, %v1873_v4, %v1869_v19  ;;  %v1924_v52 = vunpack.c.l.bf16 %v1921_v57 }
 0x50c   :  { %v1897_v24 = vmul.f32 %v1896_v50, %v1874_v60 }
 0x50e   :  { %v1898_v40 = vadd.f32 %v1897_v24, %v1716_v33 }
 0x510   :  { %2668 = vtanh.f32 %v1898_v40 }
 0x516   :  { %v2669_v53 = vpop.eup %2668 }
 0x517   :  { %v1901_v61 = vmul.f32 %v2669_v53, %v1900_v48 }
 0x519   :  { %v1903_v49 = vadd.f32 %v1902_v31, %v1901_v61 }
 0x51b   :  { %v3631_v55 = vsel %vm1910_vm7, %v1903_v49, %v3574_v47  ;;  %v1912_v27 = vsel %vm1910_vm7, %v1903_v49, 0.0 }
 0x51c   :  { %v1916_v14 = vpack.c.bf16 %v1912_v27, %v1912_v27  ;;  %v1970_v32 = vpack.c.bf16 %v3631_v55, %v3631_v55 }
 0x51e   :  { %1918 = vst [vmem:[#allocation11 + $0x4] sm:$0xf] %v1916_v14  ;;  %1979 = vmatmul.bf16.vlgmr.msrb.gmra.mxu1 %v1970_v32  ;;  %1992 = vmatmul.bf16.vlgmr.msrb.gmra.mxu2 %v1970_v32 }
 0x51f   :  { %2005 = vmatmul.bf16.vlgmr.msrb.gmra.mxu3 %v1970_v32 }
 0x586   :  { %v1966_v41 = vpop.f32.mrf.mxu0 }
 0x587   :  { %v2051_v60 = vadd.f32 %v3608_v18, %v1966_v41 }
 0x58b   :  { %v1940_v45 = vpop.f32.mrf.mxu2  ;;  %v1953_v0 = vpop.f32.mrf.mxu3 }
 0x58c   :  { %v2011_v34 = vadd.f32 %v1940_v45, %v1922_v11  ;;  %v2031_v22 = vadd.f32 %v1953_v0, %v1923_v1  ;;  %v2064_v45 = vpop.permute.xlu0 %2063  ;;  %v1926_v0 = vld [vmem:[#allocation7 + $0x8] sm:$0xf] }
 0x58d   :  { %vm2065_vm2 = vcmp.eq.s32.totalorder %v2064_v45, 1 }
 0x58e   :  { %v2438_v26 = vmul.f32 -1.442695, %v2011_v34  ;;  %v2439_v47 = vmul.f32 -1.442695, %v2031_v22  ;;  %v1968_v42 = vpop.f32.mrf.mxu0 }
 0x590   :  { %2670 = vpow2.f32 %v2438_v26 }
 0x591   :  { %2672 = vpow2.f32 %v2439_v47 }
 0x593   :  { %v1942_v39 = vpop.f32.mrf.mxu2  ;;  %v1955_v58 = vpop.f32.mrf.mxu3 }
 0x596   :  { %v2671_v7 = vpop.eup %2670 }
 0x597   :  { %v2673_v36 = vpop.eup %2672  ;;  %v2015_v5 = vadd.f32 1.0, %v2671_v7  ;;  %v1929_v7 = vunpack.c.l.bf16 %v1926_v0 }
 0x598   :  { %v2035_v16 = vadd.f32 1.0, %v2673_v36 }
 0x599   :  { %2674 = vrcp.f32 %v2015_v5  ;;  %v2027_v6 = vand.u32 2147483648, %v2015_v5  ;;  %v2025_v37 = vand.u32 2147483647, %v2015_v5  ;;  %vm2021_vm9 = vweird.f32 %v2015_v5 }
 0x59a   :  { %2676 = vrcp.f32 %v2035_v16  ;;  %v2047_v23 = vand.u32 2147483648, %v2035_v16  ;;  %vm2041_vm13 = vweird.f32 %v2035_v16  ;;  %v2045_v53 = vand.u32 2147483647, %v2035_v16 }
 0x59b   :  { %v1980_v25 = vpop.f32.mrf.mxu1  ;;  %v2028_v19 = vor.u32 1.1754944e-38, %v2027_v6  ;;  %vm2026_vm11 = vcmp.eq.f32.partialorder %v2025_v37, 8.507059e+37 }
 0x59c   :  { %v2068_v38 = vadd.f32 %v1980_v25, %v1927_v56  ;;  %v2048_v18 = vor.u32 1.1754944e-38, %v2047_v23  ;;  %vm2046_vm15 = vcmp.eq.f32.partialorder %v2045_v53, 8.507059e+37 }
 0x59e   :  { %v2441_v51 = vmul.f32 -1.442695, %v2068_v38 }
 0x59f   :  { %v2675_v63 = vpop.eup %2674 }
 0x5a0   :  { %v2677_v10 = vpop.eup %2676  ;;  %v2017_v15 = vmul.f32 %v2675_v63, %v2015_v5  ;;  %2678 = vpow2.f32 %v2441_v51  ;;  %vm2022_vm8 = vweird.f32 %v2675_v63 }
 0x5a1   :  { %v2037_v30 = vmul.f32 %v2677_v10, %v2035_v16  ;;  %v1993_v46 = vpop.f32.mrf.mxu2  ;;  %vm2023_vm10 = vmor %vm2021_vm9, %vm2022_vm8  ;;  %vm2042_vm12 = vweird.f32 %v2677_v10 }
 0x5a2   :  { %v2018_v35 = vsub.f32 1.0, %v2017_v15  ;;  %v2088_v54 = vadd.f32 %v1993_v46, %v1928_v59  ;;  %v3635_v2 = vpop.f32.mrf.mxu3  ;;  %vm2043_vm14 = vmor %vm2041_vm13, %vm2042_vm12 }
 0x5a3   :  { %v2038_v21 = vsub.f32 1.0, %v2037_v30  ;;  %v1982_v28 = vpop.f32.mrf.mxu1  ;;  %v2108_v56 = vadd.f32 %v3622_v20, %v3635_v2 }
 0x5a4   :  { %v2019_v29 = vmul.f32 %v2675_v63, %v2018_v35  ;;  %v2442_v44 = vmul.f32 -1.442695, %v2088_v54 }
 0x5a5   :  { %v2039_v4 = vmul.f32 %v2677_v10, %v2038_v21  ;;  %v2121_v21 = vpop.permute.xlu2 %2120 }
 0x5a6   :  { %v2679_v50 = vpop.eup %2678  ;;  %v2020_v33 = vadd.f32 %v2675_v63, %v2019_v29  ;;  %2680 = vpow2.f32 %v2442_v44  ;;  %vm2122_vm9 = vcmp.eq.s32.totalorder %v2121_v21, 1 }
 0x5a7   :  { %v2072_v8 = vadd.f32 1.0, %v2679_v50  ;;  %v2040_v40 = vadd.f32 %v2677_v10, %v2039_v4 }
 0x5a8   :  { %v2024_v24 = vsel %vm2023_vm10, %v2675_v63, %v2020_v33 }
 0x5a9   :  { %v2029_v3 = vsel %vm2026_vm11, %v2028_v19, %v2024_v24  ;;  %2682 = vrcp.f32 %v2072_v8  ;;  %v1995_v17 = vpop.f32.mrf.mxu2  ;;  %v2044_v31 = vsel %vm2043_vm14, %v2677_v10, %v2040_v40  ;;  %v2084_v11 = vand.u32 2147483648, %v2072_v8 }
 0x5aa   :  { %v2052_v12 = vmul.f32 %v2051_v60, %v2029_v3  ;;  %v2008_v48 = vpop.f32.mrf.mxu3  ;;  %v2049_v14 = vsel %vm2046_vm15, %v2048_v18, %v2044_v31  ;;  %v2082_v22 = vand.u32 2147483647, %v2072_v8  ;;  %vm2078_vm1 = vweird.f32 %v2072_v8 }
 0x5ab   :  { %v2055_v41 = vsub.f32 1.0, %v2049_v14  ;;  %v2057_v42 = vmul.f32 %v2049_v14, %v3615_v9  ;;  %v2085_v36 = vor.u32 1.1754944e-38, %v2084_v11 }
 0x5ac   :  { %v2681_v13 = vpop.eup %2680  ;;  %v2053_v61 = vadd.f32 %v2052_v12, %v1924_v52  ;;  %vm2083_vm4 = vcmp.eq.f32.partialorder %v2082_v22, 8.507059e+37 }
 0x5ad   :  { %v2092_v49 = vadd.f32 1.0, %v2681_v13 }
 0x5ae   :  { %2684 = vtanh.f32 %v2053_v61 }
 0x5af   :  { %v2683_v27 = vpop.eup %2682  ;;  %2686 = vrcp.f32 %v2092_v49  ;;  %v2104_v38 = vand.u32 2147483648, %v2092_v49  ;;  %v2102_v30 = vand.u32 2147483647, %v2092_v49  ;;  %vm2098_vm6 = vweird.f32 %v2092_v49 }
 0x5b0   :  { %v2074_v32 = vmul.f32 %v2683_v27, %v2072_v8  ;;  %vm2079_vm0 = vweird.f32 %v2683_v27 }
 0x5b1   :  { %vm2080_vm3 = vmor %vm2078_vm1, %vm2079_vm0  ;;  %vm2103_vm8 = vcmp.eq.f32.partialorder %v2102_v30, 8.507059e+37 }
 0x5b2   :  { %v2075_v62 = vsub.f32 1.0, %v2074_v32 }
 0x5b4   :  { %v2685_v1 = vpop.eup %2684  ;;  %v2076_v34 = vmul.f32 %v2683_v27, %v2075_v62 }
 0x5b5   :  { %v2687_v26 = vpop.eup %2686  ;;  %v2056_v47 = vmul.f32 %v2685_v1, %v2055_v41 }
 0x5b6   :  { %v2094_v39 = vmul.f32 %v2687_v26, %v2092_v49  ;;  %v2077_v58 = vadd.f32 %v2683_v27, %v2076_v34  ;;  %vm2099_vm5 = vweird.f32 %v2687_v26 }
 0x5b7   :  { %v2058_v43 = vadd.f32 %v2057_v42, %v2056_v47  ;;  %vm2100_vm7 = vmor %vm2098_vm6, %vm2099_vm5 }
 0x5b8   :  { %v2095_v5 = vsub.f32 1.0, %v2094_v39  ;;  %v2081_v16 = vsel %vm2080_vm3, %v2683_v27, %v2077_v58 }
 0x5b9   :  { %v2067_v25 = vsel %vm2065_vm2, %v2058_v43, 0.0  ;;  %v2086_v51 = vsel %vm2083_vm4, %v2085_v36, %v2081_v16  ;;  %v2066_v59 = vsel %vm2065_vm2, %v2058_v43, %v3615_v9  ;;  %v2105_v9 = vor.u32 1.1754944e-38, %v2104_v38 }
 0x5ba   :  { %v2125_v63 = vpack.c.bf16 %v2067_v25, %v2067_v25  ;;  %v2096_v10 = vmul.f32 %v2687_v26, %v2095_v5  ;;  %v2109_v15 = vmul.f32 %v2108_v56, %v2086_v51  ;;  %2135 = vst [vmem:[#allocation13] sm:$0xff] %v2066_v59 }
 0x5bc   :  { %2127 = vst [vmem:[#allocation10 + $0x1c] sm:$0xf] %v2125_v63  ;;  %v2097_v46 = vadd.f32 %v2687_v26, %v2096_v10  ;;  %v2110_v35 = vadd.f32 %v2109_v15, %v1929_v7 }
 0x5bd   :  { %2150 = dma.vmem_to_hbm [thread:$0]  %s2143_s30, 512, %s2145_s10, [#allocation6], %s2855_s5, %s2855_s5, %s2856_s11  }
 0x5be   :  { %v2101_v20 = vsel %vm2100_vm7, %v2687_v26, %v2097_v46  ;;  %2688 = vtanh.f32 %v2110_v35 }
 0x5bf   :  { %v2106_v54 = vsel %vm2103_vm8, %v2105_v9, %v2101_v20 }
 0x5c0   :  { %v2112_v2 = vsub.f32 1.0, %v2106_v54  ;;  %v2114_v29 = vmul.f32 %v2106_v54, %v3631_v55 }
 0x5c4   :  { %v2689_v6 = vpop.eup %2688 }
 0x5c5   :  { %v2113_v28 = vmul.f32 %v2689_v6, %v2112_v2 }
 0x5c7   :  { %v2115_v37 = vadd.f32 %v2114_v29, %v2113_v28 }
 0x5c9   :  { %v2124_v44 = vsel %vm2122_vm9, %v2115_v37, 0.0  ;;  %v2123_v57 = vsel %vm2122_vm9, %v2115_v37, %v3631_v55 }
 0x5ca   :  { %v2128_v4 = vpack.c.bf16 %v2124_v44, %v2124_v44  ;;  %2137 = vst [vmem:[#allocation13 + $0x8] sm:$0xff] %v2123_v57 }
 0x5cc   :  { %2129 = vst [vmem:[#allocation11] sm:$0xf] %v2128_v4 }
 0x5cd   :  { %2167 = dma.vmem_to_hbm [thread:$0]  %s2160_s13, 512, %s2162_s16, [#allocation12], %s2855_s5, %s2855_s5, %s2856_s11  }
 0x5ce   :  { %2180 = dma.vmem_to_hbm [thread:$0]  %s2173_s17, 256, %s2175_s3, [#allocation12], %s2859_s6, %s2859_s6, %s2860_s0  }
 0x5cf   :  { %2842 = dma.done.wait [#allocation6], 512  }
 0x5d0   :  { %2843 = vsyncadd [#allocation6], 4294966784 }
 0x5d1   :  { %2844 = dma.done.wait [#allocation12], 768  }
 0x5d2   :  { %2845 = vsyncadd [#allocation12], 4294966528 }
 0x5d3   :  { %2193 = vsyncpa [#allocation5], 1 }
 0x5d4   :  { %2194 = vsyncpa [#allocation8], 1 }
 0x5d5   :  { %2195 = vsyncpa [#allocation6], 1 }
 0x5d6   :  { %2196 = vsyncpa [#allocation12], 1 }

</bundles_post_ra>
